<compile_context>
chip_gen: v6e
topology: v6e:2x2x1
jax: 0.10.0
libtpu: 0.0.40
codegen_flags: <defaults>
</compile_context>

<pallas_src>
import functools

import jax
import jax.numpy as jnp
from jax.experimental import pallas as pl
from jax.experimental.pallas import tpu as pltpu


def _round_up(x, m):
    return (x + m - 1) // m * m


def _pick_row_tile(m):
    for t in (1024, 512, 256, 128, 64, 32, 16, 8):
        if m % t == 0:
            return t
    return m  # non-multiple-of-8 fallback: single full block


# ------------------- implicit-im2col conv (one image per grid step) -------------------
def _conv_accumulate(x_ref, w_ref, *, KH, KW, OH, OW, Cp, OCp, stride):
    """Conv for one padded NHWC image -> (OH*OW, OCp) f32 accumulator."""
    acc = None
    for kh in range(KH):
        for kw in range(KW):
            if stride == 1:
                xs = x_ref[0, pl.ds(kh, OH), pl.ds(kw, OW), :]
            else:
                xs = x_ref[0, pl.ds(kh, OH, stride), pl.ds(kw, OW, stride), :]
            a2 = xs.reshape(OH * OW, Cp)                 # bf16
            w_k = w_ref[kh * KW + kw]                    # (Cp, OCp) bf16, VMEM-resident
            part = jnp.dot(a2, w_k, preferred_element_type=jnp.float32)
            acc = part if acc is None else acc + part
    return acc


def _conv_bn_stats_kernel(x_ref, w_ref, y_ref, stats_ref, *,
                          KH, KW, OH, OW, Cp, OCp, stride):
    acc = _conv_accumulate(x_ref, w_ref, KH=KH, KW=KW, OH=OH, OW=OW,
                           Cp=Cp, OCp=OCp, stride=stride)
    Mb = OH * OW
    s = jnp.sum(acc, axis=0, keepdims=True)              # (1, OCp) per-image sum
    mean_b = s * (1.0 / Mb)
    c = jnp.sum((acc - mean_b) ** 2, axis=0, keepdims=True)  # centered SS (stable)
    y_ref[0] = acc
    stats_ref[0, 0:1, :] = s
    stats_ref[0, 1:2, :] = c


def _conv_bias_leaky_kernel(x_ref, w_ref, bias_ref, y_ref, *,
                            KH, KW, OH, OW, Cp, OCp, stride, slope):
    acc = _conv_accumulate(x_ref, w_ref, KH=KH, KW=KW, OH=OH, OW=OW,
                           Cp=Cp, OCp=OCp, stride=stride)
    yb = acc + bias_ref[...]
    y_ref[0] = jnp.where(yb >= 0, yb, slope * yb)


# ------------------- tiled BN-apply + LeakyReLU (in-place) -------------------
def _bn_apply_leaky_kernel(y_ref, scale_ref, shift_ref, o_ref, *, slope):
    yn = y_ref[...] * scale_ref[...] + shift_ref[...]
    o_ref[...] = jnp.where(yn >= 0, yn, slope * yn)


# ------------------------------- wrapper -------------------------------
@functools.partial(jax.jit, static_argnames=("stride", "padding", "need_bn",
                                             "eps", "negative_slope"))
def convention_forward(x, weight, gamma=None, beta=None, bias=None, *,
                       stride, padding, need_bn=True,
                       eps=1e-5, negative_slope=0.01):
    """x: (N, C, H, W) f32; weight: (OC, C, KH, KW) f32 -> (N, OC, OH, OW) f32."""
    N, C, H, W = x.shape
    OC, _, KH, KW = weight.shape
    OH = (H + 2 * padding - KH) // stride + 1
    OW = (W + 2 * padding - KW) // stride + 1
    Mb = OH * OW

    Cp = _round_up(C, 8)       # sublane-align the contraction dim
    OCp = _round_up(OC, 128)   # lane-align output channels (lane-dense out_spec)
    cdt = jnp.bfloat16         # MXU input dtype (f32 accumulation)

    # NCHW -> padded NHWC via a single jnp.pad (no im2col, no scatter-pad copies).
    x_nhwc = jnp.transpose(x, (0, 2, 3, 1)).astype(cdt)
    xp = jnp.pad(x_nhwc, ((0, 0), (padding, padding), (padding, padding),
                          (0, Cp - C)))
    HP, WP = H + 2 * padding, W + 2 * padding

    # (OC, C, KH, KW) -> (KH*KW, Cp, OCp); fetched once, VMEM-resident.
    w_r = jnp.transpose(weight, (2, 3, 1, 0)).astype(cdt)        # (KH, KW, C, OC)
    w_p = jnp.pad(w_r, ((0, 0), (0, 0), (0, Cp - C), (0, OCp - OC)))
    w_p = w_p.reshape(KH * KW, Cp, OCp)

    cparams = pltpu.CompilerParams(dimension_semantics=("parallel",),
                                   vmem_limit_bytes=32 * 1024 * 1024)

    x_spec = pl.BlockSpec((1, HP, WP, Cp), lambda n: (n, 0, 0, 0))
    w_spec = pl.BlockSpec((KH * KW, Cp, OCp), lambda n: (0, 0, 0))   # constant -> 1 DMA
    y_spec = pl.BlockSpec((1, Mb, OCp), lambda n: (n, 0, 0))

    if need_bn:
        kern = functools.partial(_conv_bn_stats_kernel, KH=KH, KW=KW, OH=OH,
                                 OW=OW, Cp=Cp, OCp=OCp, stride=stride)
        y, stats = pl.pallas_call(
            kern,
            out_shape=[jax.ShapeDtypeStruct((N, Mb, OCp), jnp.float32),
                       jax.ShapeDtypeStruct((N, 2, OCp), jnp.float32)],
            grid_spec=pltpu.PrefetchScalarGridSpec(
                num_scalar_prefetch=0, grid=(N,),
                in_specs=[x_spec, w_spec],
                out_specs=[y_spec,
                           pl.BlockSpec((1, 2, OCp), lambda n: (n, 0, 0))]),
            compiler_params=cparams,
        )(xp, w_p)

        # Pool per-image (sum, centered SS) -> batch mean / biased variance (tiny jnp).
        s_b = stats[:, 0, :]                         # (N, OCp)
        c_b = stats[:, 1, :]
        M = N * Mb
        mean = jnp.sum(s_b, axis=0) / M
        mean_b = s_b / Mb
        ss = jnp.sum(c_b, axis=0) + Mb * jnp.sum((mean_b - mean) ** 2, axis=0)
        var = ss / M
        gamma_p = jnp.pad(gamma.astype(jnp.float32), (0, OCp - OC))
        beta_p = jnp.pad(beta.astype(jnp.float32), (0, OCp - OC))
        scale = (gamma_p * jax.lax.rsqrt(var + eps)).reshape(1, OCp)
        shift = (beta_p - mean * scale[0]).reshape(1, OCp)

        # Tiled, in-place normalize + LeakyReLU over the flat activation.
        y_flat = y.reshape(N * Mb, OCp)
        tm = _pick_row_tile(N * Mb)
        out = pl.pallas_call(
            functools.partial(_bn_apply_leaky_kernel, slope=negative_slope),
            out_shape=jax.ShapeDtypeStruct((N * Mb, OCp), jnp.float32),
            grid_spec=pltpu.PrefetchScalarGridSpec(
                num_scalar_prefetch=0, grid=((N * Mb) // tm,),
                in_specs=[pl.BlockSpec((tm, OCp), lambda i: (i, 0)),
                          pl.BlockSpec((1, OCp), lambda i: (0, 0)),
                          pl.BlockSpec((1, OCp), lambda i: (0, 0))],
                out_specs=pl.BlockSpec((tm, OCp), lambda i: (i, 0))),
            compiler_params=cparams,
            input_output_aliases={0: 0},
        )(y_flat, scale, shift)
        out = out.reshape(N, OH, OW, OCp)
    else:
        bias_p = jnp.pad(bias.astype(jnp.float32), (0, OCp - OC)).reshape(1, OCp)
        kern = functools.partial(_conv_bias_leaky_kernel, KH=KH, KW=KW, OH=OH,
                                 OW=OW, Cp=Cp, OCp=OCp, stride=stride,
                                 slope=negative_slope)
        y = pl.pallas_call(
            kern,
            out_shape=jax.ShapeDtypeStruct((N, Mb, OCp), jnp.float32),
            grid_spec=pltpu.PrefetchScalarGridSpec(
                num_scalar_prefetch=0, grid=(N,),
                in_specs=[x_spec, w_spec,
                          pl.BlockSpec((1, OCp), lambda n: (0, 0))],
                out_specs=y_spec),
            compiler_params=cparams,
        )(xp, w_p, bias_p)
        out = y.reshape(N, OH, OW, OCp)

    # (N, OH, OW, OCp) -> NCHW, drop channel padding.
    return jnp.transpose(out[..., :OC], (0, 3, 1, 2))


# ------------------------- pure-JAX reference -------------------------
def _reference(x, weight, *, stride, padding, gamma=None, beta=None, bias=None,
               need_bn=True, eps=1e-5, slope=0.01):
    y = jax.lax.conv_general_dilated(
        x, weight, (stride, stride),
        [(padding, padding), (padding, padding)],
        dimension_numbers=('NCHW', 'OIHW', 'NCHW'))
    if need_bn:
        mean = y.mean(axis=(0, 2, 3), keepdims=True)
        var = ((y - mean) ** 2).mean(axis=(0, 2, 3), keepdims=True)  # biased
        y = (y - mean) * jax.lax.rsqrt(var + eps)
        y = y * gamma.reshape(1, -1, 1, 1) + beta.reshape(1, -1, 1, 1)
    else:
        y = y + bias.reshape(1, -1, 1, 1)
    return jnp.where(y >= 0, y, slope * y)


if __name__ == "__main__":
    key = jax.random.PRNGKey(0)
    N, Cin, H, W = 2, 4, 16, 16
    Cout, ksize, stride, pad = 8, 3, 1, 1

    kx, kw, kb = jax.random.split(key, 3)
    x = jax.random.normal(kx, (N, Cin, H, W), jnp.float32)
    fan_in = Cin * ksize * ksize
    # kaiming_normal_-like init
    weight = jax.random.normal(kw, (Cout, Cin, ksize, ksize), jnp.float32) * jnp.sqrt(2.0 / fan_in)
    gamma = jnp.ones((Cout,), jnp.float32)   # BN weight init (fill 1)
    beta = jnp.zeros((Cout,), jnp.float32)   # BN bias init (zero)
    bias = jax.random.normal(kb, (Cout,), jnp.float32) * 0.1

    # --- need_bn=True branch (conv -> BN(batch stats) -> LeakyReLU) ---
    out_bn = convention_forward(x, weight, gamma=gamma, beta=beta,
                                stride=stride, padding=pad, need_bn=True)
    out_bn = jax.block_until_ready(out_bn)
    ref_bn = _reference(x, weight, stride=stride, padding=pad,
                        gamma=gamma, beta=beta, need_bn=True)
    assert out_bn.shape == (N, Cout, H, W), out_bn.shape
    err_bn = float(jnp.max(jnp.abs(out_bn - ref_bn)))
    # bf16 MXU inputs (f32 accumulation) -> loosened tolerance vs the f32 reference.
    assert err_bn < 3e-2, err_bn

    # --- need_bn=False branch (conv+bias -> LeakyReLU, fused epilogue) ---
    out_b = convention_forward(x, weight, bias=bias,
                               stride=stride, padding=pad, need_bn=False)
    out_b = jax.block_until_ready(out_b)
    ref_b = _reference(x, weight, stride=stride, padding=pad,
                       bias=bias, need_bn=False)
    err_b = float(jnp.max(jnp.abs(out_b - ref_b)))
    assert err_b < 3e-2, err_b

    print("KERNEL_OK")
</pallas_src>

<mosaic_0001>
module attributes {stable_mosaic.version = 11 : i64} {
  func.func @_conv_bn_stats_kernel(%arg0: i32, %arg1: memref<1x18x18x8xbf16, #tpu.memory_space<vmem>>, %arg2: memref<9x8x128xbf16, #tpu.memory_space<vmem>>, %arg3: memref<1x256x128xf32, #tpu.memory_space<vmem>>, %arg4: memref<1x2x128xf32, #tpu.memory_space<vmem>>) attributes {dimension_semantics = [#tpu.dimension_semantics<parallel>], iteration_bounds = array<i64: 2>, scalar_prefetch = 0 : i64, scratch_operands = 0 : i64, tpu.core_type = #tpu.core_type<tc>, window_params = [{transform_indices = @transform_0, window_bounds = array<i64: 1, 18, 18, 8>}, {pipeline_mode = #tpu.pipeline_mode<synchronous>, transform_indices = @transform_1, window_bounds = array<i64: 9, 8, 128>}, {transform_indices = @transform_2, window_bounds = array<i64: 1, 256, 128>}, {transform_indices = @transform_3, window_bounds = array<i64: 1, 2, 128>}]} {
    %c0 = arith.constant 0 : index
    %c0_0 = arith.constant 0 : index
    %c0_1 = arith.constant 0 : index
    %c0_2 = arith.constant 0 : index
    %0 = vector.load %arg1[%c0, %c0_0, %c0_1, %c0_2] : memref<1x18x18x8xbf16, #tpu.memory_space<vmem>>, vector<1x16x16x8xbf16>
    %1 = vector.shape_cast %0 : vector<1x16x16x8xbf16> to vector<16x16x8xbf16>
    %2 = vector.shape_cast %1 : vector<16x16x8xbf16> to vector<256x8xbf16>
    %c0_3 = arith.constant 0 : index
    %c0_4 = arith.constant 0 : index
    %c0_5 = arith.constant 0 : index
    %3 = vector.load %arg2[%c0_3, %c0_4, %c0_5] : memref<9x8x128xbf16, #tpu.memory_space<vmem>>, vector<1x8x128xbf16>
    %4 = vector.shape_cast %3 : vector<1x8x128xbf16> to vector<8x128xbf16>
    %cst = arith.constant dense<0.000000e+00> : vector<256x128xf32>
    %5 = tpu.matmul %2, %4, %cst {dimension_numbers = #tpu.dot_dimension_numbers<[1], [0], [0], [1], [0, 0, 1, 1], [], []>} : vector<256x8xbf16>, vector<8x128xbf16>, vector<256x128xf32> -> vector<256x128xf32>
    %c0_6 = arith.constant 0 : index
    %c0_7 = arith.constant 0 : index
    %c1 = arith.constant 1 : index
    %c0_8 = arith.constant 0 : index
    %6 = vector.load %arg1[%c0_6, %c0_7, %c1, %c0_8] : memref<1x18x18x8xbf16, #tpu.memory_space<vmem>>, vector<1x16x16x8xbf16>
    %7 = vector.shape_cast %6 : vector<1x16x16x8xbf16> to vector<16x16x8xbf16>
    %8 = vector.shape_cast %7 : vector<16x16x8xbf16> to vector<256x8xbf16>
    %c1_9 = arith.constant 1 : index
    %c0_10 = arith.constant 0 : index
    %c0_11 = arith.constant 0 : index
    %9 = vector.load %arg2[%c1_9, %c0_10, %c0_11] : memref<9x8x128xbf16, #tpu.memory_space<vmem>>, vector<1x8x128xbf16>
    %10 = vector.shape_cast %9 : vector<1x8x128xbf16> to vector<8x128xbf16>
    %cst_12 = arith.constant dense<0.000000e+00> : vector<256x128xf32>
    %11 = tpu.matmul %8, %10, %cst_12 {dimension_numbers = #tpu.dot_dimension_numbers<[1], [0], [0], [1], [0, 0, 1, 1], [], []>} : vector<256x8xbf16>, vector<8x128xbf16>, vector<256x128xf32> -> vector<256x128xf32>
    %12 = arith.addf %5, %11 : vector<256x128xf32>
    %c0_13 = arith.constant 0 : index
    %c0_14 = arith.constant 0 : index
    %c2 = arith.constant 2 : index
    %c0_15 = arith.constant 0 : index
    %13 = vector.load %arg1[%c0_13, %c0_14, %c2, %c0_15] : memref<1x18x18x8xbf16, #tpu.memory_space<vmem>>, vector<1x16x16x8xbf16>
    %14 = vector.shape_cast %13 : vector<1x16x16x8xbf16> to vector<16x16x8xbf16>
    %15 = vector.shape_cast %14 : vector<16x16x8xbf16> to vector<256x8xbf16>
    %c2_16 = arith.constant 2 : index
    %c0_17 = arith.constant 0 : index
    %c0_18 = arith.constant 0 : index
    %16 = vector.load %arg2[%c2_16, %c0_17, %c0_18] : memref<9x8x128xbf16, #tpu.memory_space<vmem>>, vector<1x8x128xbf16>
    %17 = vector.shape_cast %16 : vector<1x8x128xbf16> to vector<8x128xbf16>
    %cst_19 = arith.constant dense<0.000000e+00> : vector<256x128xf32>
    %18 = tpu.matmul %15, %17, %cst_19 {dimension_numbers = #tpu.dot_dimension_numbers<[1], [0], [0], [1], [0, 0, 1, 1], [], []>} : vector<256x8xbf16>, vector<8x128xbf16>, vector<256x128xf32> -> vector<256x128xf32>
    %19 = arith.addf %12, %18 : vector<256x128xf32>
    %c0_20 = arith.constant 0 : index
    %c1_21 = arith.constant 1 : index
    %c0_22 = arith.constant 0 : index
    %c0_23 = arith.constant 0 : index
    %20 = vector.load %arg1[%c0_20, %c1_21, %c0_22, %c0_23] : memref<1x18x18x8xbf16, #tpu.memory_space<vmem>>, vector<1x16x16x8xbf16>
    %21 = vector.shape_cast %20 : vector<1x16x16x8xbf16> to vector<16x16x8xbf16>
    %22 = vector.shape_cast %21 : vector<16x16x8xbf16> to vector<256x8xbf16>
    %c3 = arith.constant 3 : index
    %c0_24 = arith.constant 0 : index
    %c0_25 = arith.constant 0 : index
    %23 = vector.load %arg2[%c3, %c0_24, %c0_25] : memref<9x8x128xbf16, #tpu.memory_space<vmem>>, vector<1x8x128xbf16>
    %24 = vector.shape_cast %23 : vector<1x8x128xbf16> to vector<8x128xbf16>
    %cst_26 = arith.constant dense<0.000000e+00> : vector<256x128xf32>
    %25 = tpu.matmul %22, %24, %cst_26 {dimension_numbers = #tpu.dot_dimension_numbers<[1], [0], [0], [1], [0, 0, 1, 1], [], []>} : vector<256x8xbf16>, vector<8x128xbf16>, vector<256x128xf32> -> vector<256x128xf32>
    %26 = arith.addf %19, %25 : vector<256x128xf32>
    %c0_27 = arith.constant 0 : index
    %c1_28 = arith.constant 1 : index
    %c1_29 = arith.constant 1 : index
    %c0_30 = arith.constant 0 : index
    %27 = vector.load %arg1[%c0_27, %c1_28, %c1_29, %c0_30] : memref<1x18x18x8xbf16, #tpu.memory_space<vmem>>, vector<1x16x16x8xbf16>
    %28 = vector.shape_cast %27 : vector<1x16x16x8xbf16> to vector<16x16x8xbf16>
    %29 = vector.shape_cast %28 : vector<16x16x8xbf16> to vector<256x8xbf16>
    %c4 = arith.constant 4 : index
    %c0_31 = arith.constant 0 : index
    %c0_32 = arith.constant 0 : index
    %30 = vector.load %arg2[%c4, %c0_31, %c0_32] : memref<9x8x128xbf16, #tpu.memory_space<vmem>>, vector<1x8x128xbf16>
    %31 = vector.shape_cast %30 : vector<1x8x128xbf16> to vector<8x128xbf16>
    %cst_33 = arith.constant dense<0.000000e+00> : vector<256x128xf32>
    %32 = tpu.matmul %29, %31, %cst_33 {dimension_numbers = #tpu.dot_dimension_numbers<[1], [0], [0], [1], [0, 0, 1, 1], [], []>} : vector<256x8xbf16>, vector<8x128xbf16>, vector<256x128xf32> -> vector<256x128xf32>
    %33 = arith.addf %26, %32 : vector<256x128xf32>
    %c0_34 = arith.constant 0 : index
    %c1_35 = arith.constant 1 : index
    %c2_36 = arith.constant 2 : index
    %c0_37 = arith.constant 0 : index
    %34 = vector.load %arg1[%c0_34, %c1_35, %c2_36, %c0_37] : memref<1x18x18x8xbf16, #tpu.memory_space<vmem>>, vector<1x16x16x8xbf16>
    %35 = vector.shape_cast %34 : vector<1x16x16x8xbf16> to vector<16x16x8xbf16>
    %36 = vector.shape_cast %35 : vector<16x16x8xbf16> to vector<256x8xbf16>
    %c5 = arith.constant 5 : index
    %c0_38 = arith.constant 0 : index
    %c0_39 = arith.constant 0 : index
    %37 = vector.load %arg2[%c5, %c0_38, %c0_39] : memref<9x8x128xbf16, #tpu.memory_space<vmem>>, vector<1x8x128xbf16>
    %38 = vector.shape_cast %37 : vector<1x8x128xbf16> to vector<8x128xbf16>
    %cst_40 = arith.constant dense<0.000000e+00> : vector<256x128xf32>
    %39 = tpu.matmul %36, %38, %cst_40 {dimension_numbers = #tpu.dot_dimension_numbers<[1], [0], [0], [1], [0, 0, 1, 1], [], []>} : vector<256x8xbf16>, vector<8x128xbf16>, vector<256x128xf32> -> vector<256x128xf32>
    %40 = arith.addf %33, %39 : vector<256x128xf32>
    %c0_41 = arith.constant 0 : index
    %c2_42 = arith.constant 2 : index
    %c0_43 = arith.constant 0 : index
    %c0_44 = arith.constant 0 : index
    %41 = vector.load %arg1[%c0_41, %c2_42, %c0_43, %c0_44] : memref<1x18x18x8xbf16, #tpu.memory_space<vmem>>, vector<1x16x16x8xbf16>
    %42 = vector.shape_cast %41 : vector<1x16x16x8xbf16> to vector<16x16x8xbf16>
    %43 = vector.shape_cast %42 : vector<16x16x8xbf16> to vector<256x8xbf16>
    %c6 = arith.constant 6 : index
    %c0_45 = arith.constant 0 : index
    %c0_46 = arith.constant 0 : index
    %44 = vector.load %arg2[%c6, %c0_45, %c0_46] : memref<9x8x128xbf16, #tpu.memory_space<vmem>>, vector<1x8x128xbf16>
    %45 = vector.shape_cast %44 : vector<1x8x128xbf16> to vector<8x128xbf16>
    %cst_47 = arith.constant dense<0.000000e+00> : vector<256x128xf32>
    %46 = tpu.matmul %43, %45, %cst_47 {dimension_numbers = #tpu.dot_dimension_numbers<[1], [0], [0], [1], [0, 0, 1, 1], [], []>} : vector<256x8xbf16>, vector<8x128xbf16>, vector<256x128xf32> -> vector<256x128xf32>
    %47 = arith.addf %40, %46 : vector<256x128xf32>
    %c0_48 = arith.constant 0 : index
    %c2_49 = arith.constant 2 : index
    %c1_50 = arith.constant 1 : index
    %c0_51 = arith.constant 0 : index
    %48 = vector.load %arg1[%c0_48, %c2_49, %c1_50, %c0_51] : memref<1x18x18x8xbf16, #tpu.memory_space<vmem>>, vector<1x16x16x8xbf16>
    %49 = vector.shape_cast %48 : vector<1x16x16x8xbf16> to vector<16x16x8xbf16>
    %50 = vector.shape_cast %49 : vector<16x16x8xbf16> to vector<256x8xbf16>
    %c7 = arith.constant 7 : index
    %c0_52 = arith.constant 0 : index
    %c0_53 = arith.constant 0 : index
    %51 = vector.load %arg2[%c7, %c0_52, %c0_53] : memref<9x8x128xbf16, #tpu.memory_space<vmem>>, vector<1x8x128xbf16>
    %52 = vector.shape_cast %51 : vector<1x8x128xbf16> to vector<8x128xbf16>
    %cst_54 = arith.constant dense<0.000000e+00> : vector<256x128xf32>
    %53 = tpu.matmul %50, %52, %cst_54 {dimension_numbers = #tpu.dot_dimension_numbers<[1], [0], [0], [1], [0, 0, 1, 1], [], []>} : vector<256x8xbf16>, vector<8x128xbf16>, vector<256x128xf32> -> vector<256x128xf32>
    %54 = arith.addf %47, %53 : vector<256x128xf32>
    %c0_55 = arith.constant 0 : index
    %c2_56 = arith.constant 2 : index
    %c2_57 = arith.constant 2 : index
    %c0_58 = arith.constant 0 : index
    %55 = vector.load %arg1[%c0_55, %c2_56, %c2_57, %c0_58] : memref<1x18x18x8xbf16, #tpu.memory_space<vmem>>, vector<1x16x16x8xbf16>
    %56 = vector.shape_cast %55 : vector<1x16x16x8xbf16> to vector<16x16x8xbf16>
    %57 = vector.shape_cast %56 : vector<16x16x8xbf16> to vector<256x8xbf16>
    %c8 = arith.constant 8 : index
    %c0_59 = arith.constant 0 : index
    %c0_60 = arith.constant 0 : index
    %58 = vector.load %arg2[%c8, %c0_59, %c0_60] : memref<9x8x128xbf16, #tpu.memory_space<vmem>>, vector<1x8x128xbf16>
    %59 = vector.shape_cast %58 : vector<1x8x128xbf16> to vector<8x128xbf16>
    %cst_61 = arith.constant dense<0.000000e+00> : vector<256x128xf32>
    %60 = tpu.matmul %57, %59, %cst_61 {dimension_numbers = #tpu.dot_dimension_numbers<[1], [0], [0], [1], [0, 0, 1, 1], [], []>} : vector<256x8xbf16>, vector<8x128xbf16>, vector<256x128xf32> -> vector<256x128xf32>
    %61 = arith.addf %54, %60 : vector<256x128xf32>
    %cst_62 = arith.constant dense<0.000000e+00> : vector<128xf32>
    %62 = vector.multi_reduction <add>, %61, %cst_62 [0] : vector<256x128xf32> to vector<128xf32>
    %63 = vector.shape_cast %62 : vector<128xf32> to vector<1x128xf32>
    %cst_63 = arith.constant 3.906250e-03 : f32
    %64 = vector.broadcast %cst_63 : f32 to vector<1x128xf32>
    %65 = arith.mulf %63, %64 : vector<1x128xf32>
    %66 = vector.broadcast %65 : vector<1x128xf32> to vector<256x128xf32>
    %67 = arith.subf %61, %66 : vector<256x128xf32>
    %68 = arith.mulf %67, %67 : vector<256x128xf32>
    %cst_64 = arith.constant dense<0.000000e+00> : vector<128xf32>
    %69 = vector.multi_reduction <add>, %68, %cst_64 [0] : vector<256x128xf32> to vector<128xf32>
    %70 = vector.shape_cast %69 : vector<128xf32> to vector<1x128xf32>
    %c0_65 = arith.constant 0 : index
    %c0_66 = arith.constant 0 : index
    %c0_67 = arith.constant 0 : index
    %71 = vector.load %arg3[%c0_65, %c0_66, %c0_67] : memref<1x256x128xf32, #tpu.memory_space<vmem>>, vector<1x256x128xf32>
    %72 = vector.shape_cast %71 : vector<1x256x128xf32> to vector<256x128xf32>
    %73 = vector.shape_cast %61 : vector<256x128xf32> to vector<1x256x128xf32>
    tpu.vector_store %arg3[%c0_65, %c0_66, %c0_67], %73 {strides = array<i32>} : memref<1x256x128xf32, #tpu.memory_space<vmem>>, vector<1x256x128xf32>,
    %c0_68 = arith.constant 0 : index
    %c0_69 = arith.constant 0 : index
    %c0_70 = arith.constant 0 : index
    %74 = vector.load %arg4[%c0_68, %c0_69, %c0_70] : memref<1x2x128xf32, #tpu.memory_space<vmem>>, vector<1x1x128xf32>
    %75 = vector.shape_cast %74 : vector<1x1x128xf32> to vector<1x128xf32>
    %76 = vector.shape_cast %63 : vector<1x128xf32> to vector<1x1x128xf32>
    tpu.vector_store %arg4[%c0_68, %c0_69, %c0_70], %76 {strides = array<i32>} : memref<1x2x128xf32, #tpu.memory_space<vmem>>, vector<1x1x128xf32>,
    %c0_71 = arith.constant 0 : index
    %c1_72 = arith.constant 1 : index
    %c0_73 = arith.constant 0 : index
    %77 = vector.load %arg4[%c0_71, %c1_72, %c0_73] : memref<1x2x128xf32, #tpu.memory_space<vmem>>, vector<1x1x128xf32>
    %78 = vector.shape_cast %77 : vector<1x1x128xf32> to vector<1x128xf32>
    %79 = vector.shape_cast %70 : vector<1x128xf32> to vector<1x1x128xf32>
    tpu.vector_store %arg4[%c0_71, %c1_72, %c0_73], %79 {strides = array<i32>} : memref<1x2x128xf32, #tpu.memory_space<vmem>>, vector<1x1x128xf32>,
    return
  }
  func.func @transform_0(%arg0: i32) -> (i32, i32, i32, i32) {
    %c0_i32 = arith.constant 0 : i32
    %c0_i32_0 = arith.constant 0 : i32
    %c0_i32_1 = arith.constant 0 : i32
    %c0_i32_2 = arith.constant 0 : i32
    return %arg0, %c0_i32, %c0_i32_0, %c0_i32_1 : i32, i32, i32, i32
  }
  func.func @transform_1(%arg0: i32) -> (i32, i32, i32) {
    %c0_i32 = arith.constant 0 : i32
    %c0_i32_0 = arith.constant 0 : i32
    %c0_i32_1 = arith.constant 0 : i32
    %c0_i32_2 = arith.constant 0 : i32
    return %c0_i32, %c0_i32_0, %c0_i32_1 : i32, i32, i32
  }
  func.func @transform_2(%arg0: i32) -> (i32, i32, i32) {
    %c0_i32 = arith.constant 0 : i32
    %c0_i32_0 = arith.constant 0 : i32
    %c0_i32_1 = arith.constant 0 : i32
    return %arg0, %c0_i32, %c0_i32_0 : i32, i32, i32
  }
  func.func @transform_3(%arg0: i32) -> (i32, i32, i32) {
    %c0_i32 = arith.constant 0 : i32
    %c0_i32_0 = arith.constant 0 : i32
    %c0_i32_1 = arith.constant 0 : i32
    return %arg0, %c0_i32, %c0_i32_0 : i32, i32, i32
  }
}

module attributes {stable_mosaic.version = 11 : i64} {
  func.func @_bn_apply_leaky_kernel(%arg0: i32, %arg1: memref<512x128xf32, #tpu.memory_space<vmem>>, %arg2: memref<1x128xf32, #tpu.memory_space<vmem>>, %arg3: memref<1x128xf32, #tpu.memory_space<vmem>>, %arg4: memref<512x128xf32, #tpu.memory_space<vmem>>) attributes {dimension_semantics = [#tpu.dimension_semantics<parallel>], iteration_bounds = array<i64: 1>, scalar_prefetch = 0 : i64, scratch_operands = 0 : i64, tpu.core_type = #tpu.core_type<tc>, window_params = [{transform_indices = @transform_0, window_bounds = array<i64: 512, 128>}, {pipeline_mode = #tpu.pipeline_mode<synchronous>, transform_indices = @transform_1, window_bounds = array<i64: 1, 128>}, {pipeline_mode = #tpu.pipeline_mode<synchronous>, transform_indices = @transform_2, window_bounds = array<i64: 1, 128>}, {transform_indices = @transform_3, window_bounds = array<i64: 512, 128>}]} {
    %c0 = arith.constant 0 : index
    %c0_0 = arith.constant 0 : index
    %0 = vector.load %arg1[%c0, %c0_0] : memref<512x128xf32, #tpu.memory_space<vmem>>, vector<512x128xf32>
    %c0_1 = arith.constant 0 : index
    %c0_2 = arith.constant 0 : index
    %1 = vector.load %arg2[%c0_1, %c0_2] : memref<1x128xf32, #tpu.memory_space<vmem>>, vector<1x128xf32>
    %2 = vector.broadcast %1 : vector<1x128xf32> to vector<512x128xf32>
    %3 = arith.mulf %0, %2 : vector<512x128xf32>
    %c0_3 = arith.constant 0 : index
    %c0_4 = arith.constant 0 : index
    %4 = vector.load %arg3[%c0_3, %c0_4] : memref<1x128xf32, #tpu.memory_space<vmem>>, vector<1x128xf32>
    %5 = vector.broadcast %4 : vector<1x128xf32> to vector<512x128xf32>
    %6 = arith.addf %3, %5 : vector<512x128xf32>
    %cst = arith.constant 0.000000e+00 : f32
    %7 = vector.broadcast %cst : f32 to vector<512x128xf32>
    %8 = arith.cmpf oge, %6, %7 : vector<512x128xf32>
    %cst_5 = arith.constant 0.00999999977 : f32
    %9 = vector.broadcast %cst_5 : f32 to vector<512x128xf32>
    %10 = arith.mulf %9, %6 : vector<512x128xf32>
    %11 = arith.select %8, %6, %10 : vector<512x128xi1>, vector<512x128xf32>
    %c0_6 = arith.constant 0 : index
    %c0_7 = arith.constant 0 : index
    %12 = vector.load %arg4[%c0_6, %c0_7] : memref<512x128xf32, #tpu.memory_space<vmem>>, vector<512x128xf32>
    tpu.vector_store %arg4[%c0_6, %c0_7], %11 {strides = array<i32>} : memref<512x128xf32, #tpu.memory_space<vmem>>, vector<512x128xf32>,
    return
  }
  func.func @transform_0(%arg0: i32) -> (i32, i32) {
    %c0_i32 = arith.constant 0 : i32
    %c0_i32_0 = arith.constant 0 : i32
    return %arg0, %c0_i32 : i32, i32
  }
  func.func @transform_1(%arg0: i32) -> (i32, i32) {
    %c0_i32 = arith.constant 0 : i32
    %c0_i32_0 = arith.constant 0 : i32
    %c0_i32_1 = arith.constant 0 : i32
    return %c0_i32, %c0_i32_0 : i32, i32
  }
  func.func @transform_2(%arg0: i32) -> (i32, i32) {
    %c0_i32 = arith.constant 0 : i32
    %c0_i32_0 = arith.constant 0 : i32
    %c0_i32_1 = arith.constant 0 : i32
    return %c0_i32, %c0_i32_0 : i32, i32
  }
  func.func @transform_3(%arg0: i32) -> (i32, i32) {
    %c0_i32 = arith.constant 0 : i32
    %c0_i32_0 = arith.constant 0 : i32
    return %arg0, %c0_i32 : i32, i32
  }
}

</mosaic_0001>

<bundles_post_ra>
// kernel: convention_forward.3
= control target key start
LH: loop header
LB: loop body
LE: loop exit
PB: predicated region body
PF: predicated region fallthrough
CT: control target
= control target key end

     0   :  { %s1030_s0 = inlined_call_operand.vmem [shape: f32[512,128], index: 0, kind: input, shape index: {}, may-alias: {0,3}]   ;;  %s1031_s1 = inlined_call_operand.vmem [shape: f32[1,128], index: 1, kind: input, shape index: {}]   ;;  %s1032_s2 = inlined_call_operand.vmem [shape: f32[1,128], index: 2, kind: input, shape index: {}]   ;;  %s1033_s3 = inlined_call_operand.vmem [shape: f32[512,128], index: 3, kind: output, shape index: {}, may-alias: {0,3}]  }
   0x1   :  { %v14_v0 = vld [vmem:[%s1030_s0] sm:$0xff]  ;;  %v15_v4 = vld [vmem:[%s1030_s0 + $0x8] sm:$0xff]  ;;  %v16_v5 = vld [vmem:[%s1030_s0 + $0x10] sm:$0xff] }
   0x2   :  { %v508_v1 = vld [vmem:[%s1031_s1] ss:$0 sm:$0xff]  ;;  %v17_v6 = vld [vmem:[%s1030_s0 + $0x18] sm:$0xff]  ;;  %v19_v11 = vld [vmem:[%s1030_s0 + $0x28] sm:$0xff] }
   0x3   :  { %v513_v2 = vld [vmem:[%s1032_s2] ss:$0 sm:$0xff]  ;;  %v85_v3 = vmul.f32 %v508_v1, %v14_v0  ;;  %v86_v7 = vmul.f32 %v508_v1, %v15_v4  ;;  %v87_v8 = vmul.f32 %v508_v1, %v16_v5  ;;  %v88_v9 = vmul.f32 %v508_v1, %v17_v6  ;;  %v20_v12 = vld [vmem:[%s1030_s0 + $0x30] sm:$0xff]  ;;  %v21_v17 = vld [vmem:[%s1030_s0 + $0x38] sm:$0xff] }
   0x4   :  { %v18_v10 = vld [vmem:[%s1030_s0 + $0x20] sm:$0xff]  ;;  %v90_v15 = vmul.f32 %v508_v1, %v19_v11  ;;  %v91_v16 = vmul.f32 %v508_v1, %v20_v12  ;;  %v92_v21 = vmul.f32 %v508_v1, %v21_v17  ;;  %v23_v30 = vld [vmem:[%s1030_s0 + $0x48] sm:$0xff]  ;;  %v24_v31 = vld [vmem:[%s1030_s0 + $0x50] sm:$0xff] }
   0x5   :  { %v156_v13 = vadd.f32 %v513_v2, %v85_v3  ;;  %v89_v14 = vmul.f32 %v508_v1, %v18_v10  ;;  %v157_v18 = vadd.f32 %v513_v2, %v86_v7  ;;  %v158_v19 = vadd.f32 %v513_v2, %v87_v8  ;;  %v22_v25 = vld [vmem:[%s1030_s0 + $0x40] sm:$0xff] }
   0x6   :  { %v159_v20 = vadd.f32 %v513_v2, %v88_v9  ;;  %v161_v24 = vadd.f32 %v513_v2, %v90_v15  ;;  %v162_v37 = vadd.f32 %v513_v2, %v91_v16  ;;  %v163_v38 = vadd.f32 %v513_v2, %v92_v21 }
   0x7   :  { %vm220_vm0 = vcmp.ge.f32.partialorder %v156_v13, 0.0  ;;  %v284_v22 = vmul.f32 0.01, %v156_v13  ;;  %v160_v23 = vadd.f32 %v513_v2, %v89_v14  ;;  %vm221_vm1 = vcmp.ge.f32.partialorder %v157_v18, 0.0 }
   0x8   :  { %v285_v26 = vmul.f32 0.01, %v157_v18  ;;  %vm222_vm2 = vcmp.ge.f32.partialorder %v158_v19, 0.0  ;;  %v286_v27 = vmul.f32 0.01, %v158_v19  ;;  %vm223_vm3 = vcmp.ge.f32.partialorder %v159_v20, 0.0 }
   0x9   :  { %v348_v28 = vsel %vm220_vm0, %v156_v13, %v284_v22  ;;  %v287_v29 = vmul.f32 0.01, %v159_v20  ;;  %vm224_vm4 = vcmp.ge.f32.partialorder %v160_v23, 0.0  ;;  %v288_v34 = vmul.f32 0.01, %v160_v23 }
   0xa   :  { %412 = vst [vmem:[%s1033_s3] sm:$0xff] %v348_v28  ;;  %v349_v32 = vsel %vm221_vm1, %v157_v18, %v285_v26  ;;  %v350_v33 = vsel %vm222_vm2, %v158_v19, %v286_v27  ;;  %vm225_vm5 = vcmp.ge.f32.partialorder %v161_v24, 0.0  ;;  %v289_v36 = vmul.f32 0.01, %v161_v24 }
   0xb   :  { %413 = vst [vmem:[%s1033_s3 + $0x8] sm:$0xff] %v349_v32  ;;  %414 = vst [vmem:[%s1033_s3 + $0x10] sm:$0xff] %v350_v33  ;;  %v351_v35 = vsel %vm223_vm3, %v159_v20, %v287_v29  ;;  %v352_v39 = vsel %vm224_vm4, %v160_v23, %v288_v34  ;;  %v93_v40 = vmul.f32 %v508_v1, %v22_v25  ;;  %vm226_vm6 = vcmp.ge.f32.partialorder %v162_v37, 0.0 }
   0xc   :  { %415 = vst [vmem:[%s1033_s3 + $0x18] sm:$0xff] %v351_v35  ;;  %v94_v41 = vmul.f32 %v508_v1, %v23_v30  ;;  %v95_v42 = vmul.f32 %v508_v1, %v24_v31  ;;  %v353_v46 = vsel %vm225_vm5, %v161_v24, %v289_v36  ;;  %v290_v47 = vmul.f32 0.01, %v162_v37 }
   0xd   :  { %vm227_vm7 = vcmp.ge.f32.partialorder %v163_v38, 0.0  ;;  %v291_v48 = vmul.f32 0.01, %v163_v38  ;;  %v164_v49 = vadd.f32 %v513_v2, %v93_v40 }
   0xe   :  { %v165_v50 = vadd.f32 %v513_v2, %v94_v41  ;;  %v166_v51 = vadd.f32 %v513_v2, %v95_v42  ;;  %v354_v52 = vsel %vm226_vm6, %v162_v37, %v290_v47 }
   0xf   :  { %v355_v57 = vsel %vm227_vm7, %v163_v38, %v291_v48  ;;  %vm228_vm8 = vcmp.ge.f32.partialorder %v164_v49, 0.0  ;;  %v292_v58 = vmul.f32 0.01, %v164_v49 }
  0x10   :  { %vm229_vm9 = vcmp.ge.f32.partialorder %v165_v50, 0.0  ;;  %v293_v59 = vmul.f32 0.01, %v165_v50  ;;  %vm230_vm10 = vcmp.ge.f32.partialorder %v166_v51, 0.0  ;;  %v294_v60 = vmul.f32 0.01, %v166_v51 }
  0x11   :  { %v356_v62 = vsel %vm228_vm8, %v164_v49, %v292_v58 }
  0x12   :  { %v357_v6 = vsel %vm229_vm9, %v165_v50, %v293_v59  ;;  %v358_v7 = vsel %vm230_vm10, %v166_v51, %v294_v60 }
  0x13   :  { %v25_v43 = vld [vmem:[%s1030_s0 + $0x58] sm:$0xff]  ;;  %v26_v44 = vld [vmem:[%s1030_s0 + $0x60] sm:$0xff]  ;;  %v27_v45 = vld [vmem:[%s1030_s0 + $0x68] sm:$0xff] }
  0x14   :  { %416 = vst [vmem:[%s1033_s3 + $0x20] sm:$0xff] %v352_v39  ;;  %417 = vst [vmem:[%s1033_s3 + $0x28] sm:$0xff] %v353_v46  ;;  %v96_v53 = vmul.f32 %v508_v1, %v25_v43  ;;  %v97_v54 = vmul.f32 %v508_v1, %v26_v44  ;;  %v98_v55 = vmul.f32 %v508_v1, %v27_v45 }
  0x16   :  { %v167_v61 = vadd.f32 %v513_v2, %v96_v53  ;;  %v168_v63 = vadd.f32 %v513_v2, %v97_v54  ;;  %v169_v0 = vadd.f32 %v513_v2, %v98_v55 }
  0x18   :  { %vm231_vm11 = vcmp.ge.f32.partialorder %v167_v61, 0.0  ;;  %v295_v8 = vmul.f32 0.01, %v167_v61  ;;  %vm232_vm12 = vcmp.ge.f32.partialorder %v168_v63, 0.0  ;;  %v296_v11 = vmul.f32 0.01, %v168_v63 }
  0x19   :  { %vm233_vm13 = vcmp.ge.f32.partialorder %v169_v0, 0.0  ;;  %v297_v12 = vmul.f32 0.01, %v169_v0 }
  0x1a   :  { %v359_v13 = vsel %vm231_vm11, %v167_v61, %v295_v8  ;;  %v360_v19 = vsel %vm232_vm12, %v168_v63, %v296_v11 }
  0x1b   :  { %v28_v56 = vld [vmem:[%s1030_s0 + $0x70] sm:$0xff]  ;;  %v361_v20 = vsel %vm233_vm13, %v169_v0, %v297_v12 }
  0x1c   :  { %418 = vst [vmem:[%s1033_s3 + $0x30] sm:$0xff] %v354_v52  ;;  %419 = vst [vmem:[%s1033_s3 + $0x38] sm:$0xff] %v355_v57  ;;  %v99_v3 = vmul.f32 %v508_v1, %v28_v56 }
  0x1e   :  { %v170_v14 = vadd.f32 %v513_v2, %v99_v3 }
  0x20   :  { %vm234_vm14 = vcmp.ge.f32.partialorder %v170_v14, 0.0  ;;  %v298_v23 = vmul.f32 0.01, %v170_v14 }
  0x22   :  { %v362_v30 = vsel %vm234_vm14, %v170_v14, %v298_v23 }
  0x23   :  { %v29_v4 = vld [vmem:[%s1030_s0 + $0x78] sm:$0xff]  ;;  %v30_v5 = vld [vmem:[%s1030_s0 + $0x80] sm:$0xff] }
  0x24   :  { %420 = vst [vmem:[%s1033_s3 + $0x40] sm:$0xff] %v356_v62  ;;  %v100_v15 = vmul.f32 %v508_v1, %v29_v4  ;;  %v101_v16 = vmul.f32 %v508_v1, %v30_v5 }
  0x26   :  { %v171_v24 = vadd.f32 %v513_v2, %v100_v15  ;;  %v172_v25 = vadd.f32 %v513_v2, %v101_v16 }
  0x28   :  { %vm235_vm15 = vcmp.ge.f32.partialorder %v171_v24, 0.0  ;;  %v299_v31 = vmul.f32 0.01, %v171_v24  ;;  %vm236_vm0 = vcmp.ge.f32.partialorder %v172_v25, 0.0  ;;  %v300_v34 = vmul.f32 0.01, %v172_v25 }
  0x2a   :  { %v363_v36 = vsel %vm235_vm15, %v171_v24, %v299_v31  ;;  %v364_v41 = vsel %vm236_vm0, %v172_v25, %v300_v34 }
  0x2b   :  { %v31_v9 = vld [vmem:[%s1030_s0 + $0x88] sm:$0xff]  ;;  %v32_v10 = vld [vmem:[%s1030_s0 + $0x90] sm:$0xff] }
  0x2c   :  { %421 = vst [vmem:[%s1033_s3 + $0x48] sm:$0xff] %v357_v6  ;;  %422 = vst [vmem:[%s1033_s3 + $0x50] sm:$0xff] %v358_v7  ;;  %v102_v21 = vmul.f32 %v508_v1, %v31_v9  ;;  %v103_v22 = vmul.f32 %v508_v1, %v32_v10 }
  0x2e   :  { %v173_v26 = vadd.f32 %v513_v2, %v102_v21  ;;  %v174_v27 = vadd.f32 %v513_v2, %v103_v22 }
  0x30   :  { %vm237_vm1 = vcmp.ge.f32.partialorder %v173_v26, 0.0  ;;  %v301_v35 = vmul.f32 0.01, %v173_v26  ;;  %vm238_vm2 = vcmp.ge.f32.partialorder %v174_v27, 0.0  ;;  %v302_v37 = vmul.f32 0.01, %v174_v27 }
  0x32   :  { %v365_v42 = vsel %vm237_vm1, %v173_v26, %v301_v35  ;;  %v366_v48 = vsel %vm238_vm2, %v174_v27, %v302_v37 }
  0x33   :  { %v33_v17 = vld [vmem:[%s1030_s0 + $0x98] sm:$0xff]  ;;  %v34_v18 = vld [vmem:[%s1030_s0 + $0xa0] sm:$0xff] }
  0x34   :  { %423 = vst [vmem:[%s1033_s3 + $0x58] sm:$0xff] %v359_v13  ;;  %424 = vst [vmem:[%s1033_s3 + $0x60] sm:$0xff] %v360_v19  ;;  %v104_v28 = vmul.f32 %v508_v1, %v33_v17  ;;  %v105_v29 = vmul.f32 %v508_v1, %v34_v18 }
  0x35   :  { %425 = vst [vmem:[%s1033_s3 + $0x68] sm:$0xff] %v361_v20 }
  0x36   :  { %v175_v38 = vadd.f32 %v513_v2, %v104_v28  ;;  %v176_v39 = vadd.f32 %v513_v2, %v105_v29 }
  0x38   :  { %vm239_vm3 = vcmp.ge.f32.partialorder %v175_v38, 0.0  ;;  %v303_v49 = vmul.f32 0.01, %v175_v38  ;;  %vm240_vm4 = vcmp.ge.f32.partialorder %v176_v39, 0.0  ;;  %v304_v50 = vmul.f32 0.01, %v176_v39 }
  0x3a   :  { %v367_v54 = vsel %vm239_vm3, %v175_v38, %v303_v49  ;;  %v368_v60 = vsel %vm240_vm4, %v176_v39, %v304_v50 }
  0x3c   :  { %v35_v32 = vld [vmem:[%s1030_s0 + $0xa8] sm:$0xff]  ;;  %v36_v33 = vld [vmem:[%s1030_s0 + $0xb0] sm:$0xff] }
  0x3d   :  { %426 = vst [vmem:[%s1033_s3 + $0x70] sm:$0xff] %v362_v30  ;;  %v106_v43 = vmul.f32 %v508_v1, %v35_v32  ;;  %v107_v44 = vmul.f32 %v508_v1, %v36_v33 }
  0x3f   :  { %v177_v51 = vadd.f32 %v513_v2, %v106_v43  ;;  %v178_v52 = vadd.f32 %v513_v2, %v107_v44 }
  0x41   :  { %vm241_vm5 = vcmp.ge.f32.partialorder %v177_v51, 0.0  ;;  %v305_v61 = vmul.f32 0.01, %v177_v51  ;;  %vm242_vm6 = vcmp.ge.f32.partialorder %v178_v52, 0.0  ;;  %v306_v62 = vmul.f32 0.01, %v178_v52 }
  0x43   :  { %v369_v4 = vsel %vm241_vm5, %v177_v51, %v305_v61  ;;  %v370_v8 = vsel %vm242_vm6, %v178_v52, %v306_v62 }
  0x44   :  { %v37_v40 = vld [vmem:[%s1030_s0 + $0xb8] sm:$0xff] }
  0x45   :  { %427 = vst [vmem:[%s1033_s3 + $0x78] sm:$0xff] %v363_v36  ;;  %v108_v53 = vmul.f32 %v508_v1, %v37_v40 }
  0x47   :  { %v179_v63 = vadd.f32 %v513_v2, %v108_v53 }
  0x49   :  { %vm243_vm7 = vcmp.ge.f32.partialorder %v179_v63, 0.0  ;;  %v307_v9 = vmul.f32 0.01, %v179_v63 }
  0x4b   :  { %v371_v14 = vsel %vm243_vm7, %v179_v63, %v307_v9 }
  0x4c   :  { %v38_v45 = vld [vmem:[%s1030_s0 + $0xc0] sm:$0xff]  ;;  %v39_v46 = vld [vmem:[%s1030_s0 + $0xc8] sm:$0xff]  ;;  %v40_v47 = vld [vmem:[%s1030_s0 + $0xd0] sm:$0xff] }
  0x4d   :  { %428 = vst [vmem:[%s1033_s3 + $0x80] sm:$0xff] %v364_v41  ;;  %429 = vst [vmem:[%s1033_s3 + $0x88] sm:$0xff] %v365_v42  ;;  %v109_v55 = vmul.f32 %v508_v1, %v38_v45  ;;  %v110_v56 = vmul.f32 %v508_v1, %v39_v46  ;;  %v111_v57 = vmul.f32 %v508_v1, %v40_v47 }
  0x4e   :  { %430 = vst [vmem:[%s1033_s3 + $0x90] sm:$0xff] %v366_v48 }
  0x4f   :  { %v180_v0 = vadd.f32 %v513_v2, %v109_v55  ;;  %v181_v3 = vadd.f32 %v513_v2, %v110_v56  ;;  %v182_v5 = vadd.f32 %v513_v2, %v111_v57 }
  0x51   :  { %vm244_vm8 = vcmp.ge.f32.partialorder %v180_v0, 0.0  ;;  %v308_v12 = vmul.f32 0.01, %v180_v0  ;;  %vm245_vm9 = vcmp.ge.f32.partialorder %v181_v3, 0.0  ;;  %v309_v13 = vmul.f32 0.01, %v181_v3 }
  0x52   :  { %vm246_vm10 = vcmp.ge.f32.partialorder %v182_v5, 0.0  ;;  %v310_v15 = vmul.f32 0.01, %v182_v5 }
  0x53   :  { %v372_v19 = vsel %vm244_vm8, %v180_v0, %v308_v12  ;;  %v373_v20 = vsel %vm245_vm9, %v181_v3, %v309_v13 }
  0x54   :  { %v374_v26 = vsel %vm246_vm10, %v182_v5, %v310_v15 }
  0x55   :  { %v41_v58 = vld [vmem:[%s1030_s0 + $0xd8] sm:$0xff]  ;;  %v42_v59 = vld [vmem:[%s1030_s0 + $0xe0] sm:$0xff] }
  0x56   :  { %431 = vst [vmem:[%s1033_s3 + $0x98] sm:$0xff] %v367_v54  ;;  %432 = vst [vmem:[%s1033_s3 + $0xa0] sm:$0xff] %v368_v60  ;;  %v112_v6 = vmul.f32 %v508_v1, %v41_v58  ;;  %v113_v7 = vmul.f32 %v508_v1, %v42_v59 }
  0x57   :  { %433 = vst [vmem:[%s1033_s3 + $0xa8] sm:$0xff] %v369_v4 }
  0x58   :  { %v183_v16 = vadd.f32 %v513_v2, %v112_v6  ;;  %v184_v17 = vadd.f32 %v513_v2, %v113_v7 }
  0x5a   :  { %vm247_vm11 = vcmp.ge.f32.partialorder %v183_v16, 0.0  ;;  %v311_v27 = vmul.f32 0.01, %v183_v16  ;;  %vm248_vm12 = vcmp.ge.f32.partialorder %v184_v17, 0.0  ;;  %v312_v28 = vmul.f32 0.01, %v184_v17 }
  0x5c   :  { %v375_v32 = vsel %vm247_vm11, %v183_v16, %v311_v27  ;;  %v376_v38 = vsel %vm248_vm12, %v184_v17, %v312_v28 }
  0x5e   :  { %v43_v10 = vld [vmem:[%s1030_s0 + $0xe8] sm:$0xff]  ;;  %v44_v11 = vld [vmem:[%s1030_s0 + $0xf0] sm:$0xff] }
  0x5f   :  { %434 = vst [vmem:[%s1033_s3 + $0xb0] sm:$0xff] %v370_v8  ;;  %v114_v21 = vmul.f32 %v508_v1, %v43_v10  ;;  %v115_v22 = vmul.f32 %v508_v1, %v44_v11 }
  0x61   :  { %v185_v29 = vadd.f32 %v513_v2, %v114_v21  ;;  %v186_v30 = vadd.f32 %v513_v2, %v115_v22 }
  0x63   :  { %vm249_vm13 = vcmp.ge.f32.partialorder %v185_v29, 0.0  ;;  %v313_v39 = vmul.f32 0.01, %v185_v29  ;;  %vm250_vm14 = vcmp.ge.f32.partialorder %v186_v30, 0.0  ;;  %v314_v40 = vmul.f32 0.01, %v186_v30 }
  0x65   :  { %v377_v44 = vsel %vm249_vm13, %v185_v29, %v313_v39  ;;  %v378_v48 = vsel %vm250_vm14, %v186_v30, %v314_v40 }
  0x66   :  { %v45_v18 = vld [vmem:[%s1030_s0 + $0xf8] sm:$0xff] }
  0x67   :  { %435 = vst [vmem:[%s1033_s3 + $0xb8] sm:$0xff] %v371_v14  ;;  %v116_v31 = vmul.f32 %v508_v1, %v45_v18 }
  0x69   :  { %v187_v41 = vadd.f32 %v513_v2, %v116_v31 }
  0x6b   :  { %vm251_vm15 = vcmp.ge.f32.partialorder %v187_v41, 0.0  ;;  %v315_v49 = vmul.f32 0.01, %v187_v41 }
  0x6d   :  { %v379_v54 = vsel %vm251_vm15, %v187_v41, %v315_v49 }
  0x6e   :  { %v46_v23 = vld [vmem:[%s1030_s0 + $0x100] sm:$0xff]  ;;  %v47_v24 = vld [vmem:[%s1030_s0 + $0x108] sm:$0xff]  ;;  %v48_v25 = vld [vmem:[%s1030_s0 + $0x110] sm:$0xff] }
  0x6f   :  { %436 = vst [vmem:[%s1033_s3 + $0xc0] sm:$0xff] %v372_v19  ;;  %437 = vst [vmem:[%s1033_s3 + $0xc8] sm:$0xff] %v373_v20  ;;  %v117_v33 = vmul.f32 %v508_v1, %v46_v23  ;;  %v118_v34 = vmul.f32 %v508_v1, %v47_v24  ;;  %v119_v35 = vmul.f32 %v508_v1, %v48_v25 }
  0x70   :  { %438 = vst [vmem:[%s1033_s3 + $0xd0] sm:$0xff] %v374_v26 }
  0x71   :  { %v188_v42 = vadd.f32 %v513_v2, %v117_v33  ;;  %v189_v43 = vadd.f32 %v513_v2, %v118_v34  ;;  %v190_v45 = vadd.f32 %v513_v2, %v119_v35 }
  0x73   :  { %vm252_vm0 = vcmp.ge.f32.partialorder %v188_v42, 0.0  ;;  %v316_v52 = vmul.f32 0.01, %v188_v42  ;;  %vm253_vm1 = vcmp.ge.f32.partialorder %v189_v43, 0.0  ;;  %v317_v53 = vmul.f32 0.01, %v189_v43 }
  0x74   :  { %vm254_vm2 = vcmp.ge.f32.partialorder %v190_v45, 0.0  ;;  %v318_v55 = vmul.f32 0.01, %v190_v45 }
  0x75   :  { %v380_v59 = vsel %vm252_vm0, %v188_v42, %v316_v52  ;;  %v381_v60 = vsel %vm253_vm1, %v189_v43, %v317_v53 }
  0x76   :  { %v382_v4 = vsel %vm254_vm2, %v190_v45, %v318_v55 }
  0x77   :  { %v49_v36 = vld [vmem:[%s1030_s0 + $0x118] sm:$0xff]  ;;  %v50_v37 = vld [vmem:[%s1030_s0 + $0x120] sm:$0xff] }
  0x78   :  { %439 = vst [vmem:[%s1033_s3 + $0xd8] sm:$0xff] %v375_v32  ;;  %440 = vst [vmem:[%s1033_s3 + $0xe0] sm:$0xff] %v376_v38  ;;  %v120_v46 = vmul.f32 %v508_v1, %v49_v36  ;;  %v121_v47 = vmul.f32 %v508_v1, %v50_v37 }
  0x79   :  { %441 = vst [vmem:[%s1033_s3 + $0xe8] sm:$0xff] %v377_v44 }
  0x7a   :  { %v191_v56 = vadd.f32 %v513_v2, %v120_v46  ;;  %v192_v57 = vadd.f32 %v513_v2, %v121_v47 }
  0x7c   :  { %vm255_vm3 = vcmp.ge.f32.partialorder %v191_v56, 0.0  ;;  %v319_v5 = vmul.f32 0.01, %v191_v56  ;;  %vm256_vm4 = vcmp.ge.f32.partialorder %v192_v57, 0.0  ;;  %v320_v6 = vmul.f32 0.01, %v192_v57 }
  0x7e   :  { %v383_v10 = vsel %vm255_vm3, %v191_v56, %v319_v5  ;;  %v384_v16 = vsel %vm256_vm4, %v192_v57, %v320_v6 }
  0x80   :  { %v51_v50 = vld [vmem:[%s1030_s0 + $0x128] sm:$0xff]  ;;  %v52_v51 = vld [vmem:[%s1030_s0 + $0x130] sm:$0xff] }
  0x81   :  { %442 = vst [vmem:[%s1033_s3 + $0xf0] sm:$0xff] %v378_v48  ;;  %v122_v61 = vmul.f32 %v508_v1, %v51_v50  ;;  %v123_v62 = vmul.f32 %v508_v1, %v52_v51 }
  0x83   :  { %v193_v7 = vadd.f32 %v513_v2, %v122_v61  ;;  %v194_v8 = vadd.f32 %v513_v2, %v123_v62 }
  0x85   :  { %vm257_vm5 = vcmp.ge.f32.partialorder %v193_v7, 0.0  ;;  %v321_v17 = vmul.f32 0.01, %v193_v7  ;;  %vm258_vm6 = vcmp.ge.f32.partialorder %v194_v8, 0.0  ;;  %v322_v18 = vmul.f32 0.01, %v194_v8 }
  0x87   :  { %v385_v22 = vsel %vm257_vm5, %v193_v7, %v321_v17  ;;  %v386_v26 = vsel %vm258_vm6, %v194_v8, %v322_v18 }
  0x88   :  { %v53_v58 = vld [vmem:[%s1030_s0 + $0x138] sm:$0xff] }
  0x89   :  { %443 = vst [vmem:[%s1033_s3 + $0xf8] sm:$0xff] %v379_v54  ;;  %v124_v9 = vmul.f32 %v508_v1, %v53_v58 }
  0x8b   :  { %v195_v19 = vadd.f32 %v513_v2, %v124_v9 }
  0x8d   :  { %vm259_vm7 = vcmp.ge.f32.partialorder %v195_v19, 0.0  ;;  %v323_v27 = vmul.f32 0.01, %v195_v19 }
  0x8f   :  { %v387_v32 = vsel %vm259_vm7, %v195_v19, %v323_v27 }
  0x90   :  { %v54_v63 = vld [vmem:[%s1030_s0 + $0x140] sm:$0xff]  ;;  %v55_v0 = vld [vmem:[%s1030_s0 + $0x148] sm:$0xff]  ;;  %v56_v3 = vld [vmem:[%s1030_s0 + $0x150] sm:$0xff] }
  0x91   :  { %444 = vst [vmem:[%s1033_s3 + $0x100] sm:$0xff] %v380_v59  ;;  %445 = vst [vmem:[%s1033_s3 + $0x108] sm:$0xff] %v381_v60  ;;  %v125_v11 = vmul.f32 %v508_v1, %v54_v63  ;;  %v126_v12 = vmul.f32 %v508_v1, %v55_v0  ;;  %v127_v13 = vmul.f32 %v508_v1, %v56_v3 }
  0x92   :  { %446 = vst [vmem:[%s1033_s3 + $0x110] sm:$0xff] %v382_v4 }
  0x93   :  { %v196_v20 = vadd.f32 %v513_v2, %v125_v11  ;;  %v197_v21 = vadd.f32 %v513_v2, %v126_v12  ;;  %v198_v23 = vadd.f32 %v513_v2, %v127_v13 }
  0x95   :  { %vm260_vm8 = vcmp.ge.f32.partialorder %v196_v20, 0.0  ;;  %v324_v30 = vmul.f32 0.01, %v196_v20  ;;  %vm261_vm9 = vcmp.ge.f32.partialorder %v197_v21, 0.0  ;;  %v325_v31 = vmul.f32 0.01, %v197_v21 }
  0x96   :  { %vm262_vm10 = vcmp.ge.f32.partialorder %v198_v23, 0.0  ;;  %v326_v33 = vmul.f32 0.01, %v198_v23 }
  0x97   :  { %v388_v37 = vsel %vm260_vm8, %v196_v20, %v324_v30  ;;  %v389_v38 = vsel %vm261_vm9, %v197_v21, %v325_v31 }
  0x98   :  { %v390_v44 = vsel %vm262_vm10, %v198_v23, %v326_v33 }
  0x99   :  { %v57_v14 = vld [vmem:[%s1030_s0 + $0x158] sm:$0xff]  ;;  %v58_v15 = vld [vmem:[%s1030_s0 + $0x160] sm:$0xff] }
  0x9a   :  { %447 = vst [vmem:[%s1033_s3 + $0x118] sm:$0xff] %v383_v10  ;;  %448 = vst [vmem:[%s1033_s3 + $0x120] sm:$0xff] %v384_v16  ;;  %v128_v24 = vmul.f32 %v508_v1, %v57_v14  ;;  %v129_v25 = vmul.f32 %v508_v1, %v58_v15 }
  0x9b   :  { %449 = vst [vmem:[%s1033_s3 + $0x128] sm:$0xff] %v385_v22 }
  0x9c   :  { %v199_v34 = vadd.f32 %v513_v2, %v128_v24  ;;  %v200_v35 = vadd.f32 %v513_v2, %v129_v25 }
  0x9e   :  { %vm263_vm11 = vcmp.ge.f32.partialorder %v199_v34, 0.0  ;;  %v327_v45 = vmul.f32 0.01, %v199_v34  ;;  %vm264_vm12 = vcmp.ge.f32.partialorder %v200_v35, 0.0  ;;  %v328_v46 = vmul.f32 0.01, %v200_v35 }
  0xa0   :  { %v391_v50 = vsel %vm263_vm11, %v199_v34, %v327_v45  ;;  %v392_v56 = vsel %vm264_vm12, %v200_v35, %v328_v46 }
  0xa2   :  { %v59_v28 = vld [vmem:[%s1030_s0 + $0x168] sm:$0xff]  ;;  %v60_v29 = vld [vmem:[%s1030_s0 + $0x170] sm:$0xff] }
  0xa3   :  { %450 = vst [vmem:[%s1033_s3 + $0x130] sm:$0xff] %v386_v26  ;;  %v130_v39 = vmul.f32 %v508_v1, %v59_v28  ;;  %v131_v40 = vmul.f32 %v508_v1, %v60_v29 }
  0xa5   :  { %v201_v47 = vadd.f32 %v513_v2, %v130_v39  ;;  %v202_v48 = vadd.f32 %v513_v2, %v131_v40 }
  0xa7   :  { %vm265_vm13 = vcmp.ge.f32.partialorder %v201_v47, 0.0  ;;  %v329_v57 = vmul.f32 0.01, %v201_v47  ;;  %vm266_vm14 = vcmp.ge.f32.partialorder %v202_v48, 0.0  ;;  %v330_v58 = vmul.f32 0.01, %v202_v48 }
  0xa9   :  { %v393_v62 = vsel %vm265_vm13, %v201_v47, %v329_v57  ;;  %v394_v4 = vsel %vm266_vm14, %v202_v48, %v330_v58 }
  0xaa   :  { %v61_v36 = vld [vmem:[%s1030_s0 + $0x178] sm:$0xff] }
  0xab   :  { %451 = vst [vmem:[%s1033_s3 + $0x138] sm:$0xff] %v387_v32  ;;  %v132_v49 = vmul.f32 %v508_v1, %v61_v36 }
  0xad   :  { %v203_v59 = vadd.f32 %v513_v2, %v132_v49 }
  0xaf   :  { %vm267_vm15 = vcmp.ge.f32.partialorder %v203_v59, 0.0  ;;  %v331_v5 = vmul.f32 0.01, %v203_v59 }
  0xb1   :  { %v395_v10 = vsel %vm267_vm15, %v203_v59, %v331_v5 }
  0xb2   :  { %v62_v41 = vld [vmem:[%s1030_s0 + $0x180] sm:$0xff]  ;;  %v63_v42 = vld [vmem:[%s1030_s0 + $0x188] sm:$0xff]  ;;  %v64_v43 = vld [vmem:[%s1030_s0 + $0x190] sm:$0xff] }
  0xb3   :  { %452 = vst [vmem:[%s1033_s3 + $0x140] sm:$0xff] %v388_v37  ;;  %453 = vst [vmem:[%s1033_s3 + $0x148] sm:$0xff] %v389_v38  ;;  %v133_v51 = vmul.f32 %v508_v1, %v62_v41  ;;  %v134_v52 = vmul.f32 %v508_v1, %v63_v42  ;;  %v135_v53 = vmul.f32 %v508_v1, %v64_v43 }
  0xb4   :  { %454 = vst [vmem:[%s1033_s3 + $0x150] sm:$0xff] %v390_v44 }
  0xb5   :  { %v204_v60 = vadd.f32 %v513_v2, %v133_v51  ;;  %v205_v61 = vadd.f32 %v513_v2, %v134_v52  ;;  %v206_v63 = vadd.f32 %v513_v2, %v135_v53 }
  0xb7   :  { %vm268_vm0 = vcmp.ge.f32.partialorder %v204_v60, 0.0  ;;  %v332_v8 = vmul.f32 0.01, %v204_v60  ;;  %vm269_vm1 = vcmp.ge.f32.partialorder %v205_v61, 0.0  ;;  %v333_v9 = vmul.f32 0.01, %v205_v61 }
  0xb8   :  { %vm270_vm2 = vcmp.ge.f32.partialorder %v206_v63, 0.0  ;;  %v334_v11 = vmul.f32 0.01, %v206_v63 }
  0xb9   :  { %v396_v15 = vsel %vm268_vm0, %v204_v60, %v332_v8  ;;  %v397_v16 = vsel %vm269_vm1, %v205_v61, %v333_v9 }
  0xba   :  { %v398_v22 = vsel %vm270_vm2, %v206_v63, %v334_v11 }
  0xbb   :  { %v65_v54 = vld [vmem:[%s1030_s0 + $0x198] sm:$0xff]  ;;  %v66_v55 = vld [vmem:[%s1030_s0 + $0x1a0] sm:$0xff] }
  0xbc   :  { %455 = vst [vmem:[%s1033_s3 + $0x158] sm:$0xff] %v391_v50  ;;  %456 = vst [vmem:[%s1033_s3 + $0x160] sm:$0xff] %v392_v56  ;;  %v136_v0 = vmul.f32 %v508_v1, %v65_v54  ;;  %v137_v3 = vmul.f32 %v508_v1, %v66_v55 }
  0xbd   :  { %457 = vst [vmem:[%s1033_s3 + $0x168] sm:$0xff] %v393_v62 }
  0xbe   :  { %v207_v12 = vadd.f32 %v513_v2, %v136_v0  ;;  %v208_v13 = vadd.f32 %v513_v2, %v137_v3 }
  0xc0   :  { %vm271_vm3 = vcmp.ge.f32.partialorder %v207_v12, 0.0  ;;  %v335_v23 = vmul.f32 0.01, %v207_v12  ;;  %vm272_vm4 = vcmp.ge.f32.partialorder %v208_v13, 0.0  ;;  %v336_v24 = vmul.f32 0.01, %v208_v13 }
  0xc2   :  { %v399_v28 = vsel %vm271_vm3, %v207_v12, %v335_v23  ;;  %v400_v34 = vsel %vm272_vm4, %v208_v13, %v336_v24 }
  0xc4   :  { %v67_v6 = vld [vmem:[%s1030_s0 + $0x1a8] sm:$0xff]  ;;  %v68_v7 = vld [vmem:[%s1030_s0 + $0x1b0] sm:$0xff] }
  0xc5   :  { %458 = vst [vmem:[%s1033_s3 + $0x170] sm:$0xff] %v394_v4  ;;  %v138_v17 = vmul.f32 %v508_v1, %v67_v6  ;;  %v139_v18 = vmul.f32 %v508_v1, %v68_v7 }
  0xc7   :  { %v209_v25 = vadd.f32 %v513_v2, %v138_v17  ;;  %v210_v26 = vadd.f32 %v513_v2, %v139_v18 }
  0xc9   :  { %vm273_vm5 = vcmp.ge.f32.partialorder %v209_v25, 0.0  ;;  %v337_v35 = vmul.f32 0.01, %v209_v25  ;;  %vm274_vm6 = vcmp.ge.f32.partialorder %v210_v26, 0.0  ;;  %v338_v36 = vmul.f32 0.01, %v210_v26 }
  0xcb   :  { %v401_v40 = vsel %vm273_vm5, %v209_v25, %v337_v35  ;;  %v402_v44 = vsel %vm274_vm6, %v210_v26, %v338_v36 }
  0xcc   :  { %v69_v14 = vld [vmem:[%s1030_s0 + $0x1b8] sm:$0xff] }
  0xcd   :  { %459 = vst [vmem:[%s1033_s3 + $0x178] sm:$0xff] %v395_v10  ;;  %v140_v27 = vmul.f32 %v508_v1, %v69_v14 }
  0xcf   :  { %v211_v37 = vadd.f32 %v513_v2, %v140_v27 }
  0xd1   :  { %vm275_vm7 = vcmp.ge.f32.partialorder %v211_v37, 0.0  ;;  %v339_v45 = vmul.f32 0.01, %v211_v37 }
  0xd3   :  { %v403_v50 = vsel %vm275_vm7, %v211_v37, %v339_v45 }
  0xd4   :  { %v70_v19 = vld [vmem:[%s1030_s0 + $0x1c0] sm:$0xff]  ;;  %v71_v20 = vld [vmem:[%s1030_s0 + $0x1c8] sm:$0xff]  ;;  %v72_v21 = vld [vmem:[%s1030_s0 + $0x1d0] sm:$0xff] }
  0xd5   :  { %460 = vst [vmem:[%s1033_s3 + $0x180] sm:$0xff] %v396_v15  ;;  %461 = vst [vmem:[%s1033_s3 + $0x188] sm:$0xff] %v397_v16  ;;  %v141_v29 = vmul.f32 %v508_v1, %v70_v19  ;;  %v142_v30 = vmul.f32 %v508_v1, %v71_v20  ;;  %v143_v31 = vmul.f32 %v508_v1, %v72_v21 }
  0xd6   :  { %462 = vst [vmem:[%s1033_s3 + $0x190] sm:$0xff] %v398_v22 }
  0xd7   :  { %v212_v38 = vadd.f32 %v513_v2, %v141_v29  ;;  %v213_v39 = vadd.f32 %v513_v2, %v142_v30  ;;  %v214_v41 = vadd.f32 %v513_v2, %v143_v31 }
  0xd9   :  { %vm276_vm8 = vcmp.ge.f32.partialorder %v212_v38, 0.0  ;;  %v340_v48 = vmul.f32 0.01, %v212_v38  ;;  %vm277_vm9 = vcmp.ge.f32.partialorder %v213_v39, 0.0  ;;  %v341_v49 = vmul.f32 0.01, %v213_v39 }
  0xda   :  { %vm278_vm10 = vcmp.ge.f32.partialorder %v214_v41, 0.0  ;;  %v342_v51 = vmul.f32 0.01, %v214_v41 }
  0xdb   :  { %v404_v55 = vsel %vm276_vm8, %v212_v38, %v340_v48  ;;  %v405_v56 = vsel %vm277_vm9, %v213_v39, %v341_v49 }
  0xdc   :  { %v406_v59 = vsel %vm278_vm10, %v214_v41, %v342_v51 }
  0xdd   :  { %v73_v32 = vld [vmem:[%s1030_s0 + $0x1d8] sm:$0xff]  ;;  %v74_v33 = vld [vmem:[%s1030_s0 + $0x1e0] sm:$0xff] }
  0xde   :  { %463 = vst [vmem:[%s1033_s3 + $0x198] sm:$0xff] %v399_v28  ;;  %464 = vst [vmem:[%s1033_s3 + $0x1a0] sm:$0xff] %v400_v34  ;;  %v144_v42 = vmul.f32 %v508_v1, %v73_v32  ;;  %v145_v43 = vmul.f32 %v508_v1, %v74_v33 }
  0xdf   :  { %465 = vst [vmem:[%s1033_s3 + $0x1a8] sm:$0xff] %v401_v40 }
  0xe0   :  { %v215_v52 = vadd.f32 %v513_v2, %v144_v42  ;;  %v216_v53 = vadd.f32 %v513_v2, %v145_v43 }
  0xe2   :  { %vm279_vm11 = vcmp.ge.f32.partialorder %v215_v52, 0.0  ;;  %v343_v60 = vmul.f32 0.01, %v215_v52  ;;  %vm280_vm12 = vcmp.ge.f32.partialorder %v216_v53, 0.0  ;;  %v344_v61 = vmul.f32 0.01, %v216_v53 }
  0xe4   :  { %v407_v3 = vsel %vm279_vm11, %v215_v52, %v343_v60  ;;  %v408_v4 = vsel %vm280_vm12, %v216_v53, %v344_v61 }
  0xe6   :  { %v75_v46 = vld [vmem:[%s1030_s0 + $0x1e8] sm:$0xff]  ;;  %v76_v47 = vld [vmem:[%s1030_s0 + $0x1f0] sm:$0xff] }
  0xe7   :  { %466 = vst [vmem:[%s1033_s3 + $0x1b0] sm:$0xff] %v402_v44  ;;  %v146_v57 = vmul.f32 %v508_v1, %v75_v46  ;;  %v147_v58 = vmul.f32 %v508_v1, %v76_v47 }
  0xe9   :  { %v217_v62 = vadd.f32 %v513_v2, %v146_v57  ;;  %v218_v63 = vadd.f32 %v513_v2, %v147_v58 }
  0xeb   :  { %vm281_vm13 = vcmp.ge.f32.partialorder %v217_v62, 0.0  ;;  %v345_v5 = vmul.f32 0.01, %v217_v62  ;;  %vm282_vm14 = vcmp.ge.f32.partialorder %v218_v63, 0.0  ;;  %v346_v6 = vmul.f32 0.01, %v218_v63 }
  0xed   :  { %v409_v8 = vsel %vm281_vm13, %v217_v62, %v345_v5 }
  0xee   :  { %v77_v54 = vld [vmem:[%s1030_s0 + $0x1f8] sm:$0xff] }
  0xef   :  { %467 = vst [vmem:[%s1033_s3 + $0x1b8] sm:$0xff] %v403_v50  ;;  %468 = vst [vmem:[%s1033_s3 + $0x1c0] sm:$0xff] %v404_v55  ;;  %v148_v0 = vmul.f32 %v508_v1, %v77_v54  ;;  %v410_v1 = vsel %vm282_vm14, %v218_v63, %v346_v6 }
  0xf0   :  { %469 = vst [vmem:[%s1033_s3 + $0x1c8] sm:$0xff] %v405_v56  ;;  %470 = vst [vmem:[%s1033_s3 + $0x1d0] sm:$0xff] %v406_v59 }
  0xf1   :  { %471 = vst [vmem:[%s1033_s3 + $0x1d8] sm:$0xff] %v407_v3  ;;  %472 = vst [vmem:[%s1033_s3 + $0x1e0] sm:$0xff] %v408_v4  ;;  %v219_v7 = vadd.f32 %v513_v2, %v148_v0 }
  0xf2   :  { %473 = vst [vmem:[%s1033_s3 + $0x1e8] sm:$0xff] %v409_v8  ;;  %474 = vst [vmem:[%s1033_s3 + $0x1f0] sm:$0xff] %v410_v1 }
  0xf3   :  { %vm283_vm15 = vcmp.ge.f32.partialorder %v219_v7, 0.0  ;;  %v347_v9 = vmul.f32 0.01, %v219_v7 }
  0xf5   :  { %v411_v10 = vsel %vm283_vm15, %v219_v7, %v347_v9 }
  0xf6   :  { %475 = vst [vmem:[%s1033_s3 + $0x1f8] sm:$0xff] %v411_v10 }

// kernel: convention_forward.2
= control target key start
LH: loop header
LB: loop body
LE: loop exit
PB: predicated region body
PF: predicated region fallthrough
CT: control target
= control target key end

     0   :  { %s6107_s12 = smov 0   ;;  %s8894_s0 = inlined_call_operand.vmem [shape: bf16[2,18,18,8], index: 0, kind: input, shape index: {}]   ;;  %s8895_s1 = inlined_call_operand.vmem [shape: bf16[9,8,128], index: 1, kind: input, shape index: {}]   ;;  %s8896_s2 = inlined_call_operand.vmem [shape: f32[2,256,128], index: 2, kind: output, shape index: {0}]   ;;  %s8897_s3 = inlined_call_operand.vmem [shape: f32[2,2,128], index: 3, kind: output, shape index: {1}]  }
   0x1 LB: > { %s5001_s13 = sadd.s32 4294967295, %s6085_s12   ;;  %p5005_p0 = scmp.ge.s32.totalorder %s6085_s12, 1  ;;  %s6085_s12 = sphi %s6107_s12, %s14_s12  }
   0x2   : > { %p140_p1 = scmp.lt.s32.totalorder %s6085_s12, 3 }
   0x4   : > { %p141_p2 = pnand %p5005_p0, %p140_p1 }
   0x6   : > { %144 = sbr.rel (%p141_p2) target bundleno = 655 (0x28f), region = 28 }
   0xb   : > { %v5010_v0 = vld [vmem:[%s8895_s1 + $0x4] sm:$0xf]  ;;  %vm718_vm0 = vcmask 1043456   ;;  %p168_p3 = scmp.lt.s32.totalorder %s5001_s13, 1  ;;  %v215_v2 = vld [vmem:[%s8895_s1] sm:$0xf] }
   0xc   : > { %6011 = vmatprep.subr.msk.bf16.mxu1 %vm718_vm0, %v5010_v0  ;;  %6010 = vmatprep.subr.msk.bf16.mxu0 %vm718_vm0, %v5010_v0  ;;  %v720_v1 = vsel %vm718_vm0, %v5010_v0, 0  ;;  %v5091_v3 = vld [vmem:[%s8895_s1 + $0x8] sm:$0xf]  ;;  %vm232_vm1 = vsmask.f32 3328  ;;  %v6138_v4 = vsel %vm718_vm0, %v215_v2, 0 }
   0xd   : > { %6009 = vmatpush3.bf16.msra.mxu1 %v720_v1  ;;  %5703 = vmatpush3.bf16.msra.mxu0 %v720_v1  ;;  %s9171_s13 = smov (!%p168_p3, %s5001_s13), 1  ;;  %vm233_vm2 = vsmask.f32 7440  ;;  %vm669_vm3 = vcmask 64512   ;;  %v6164_v16 = vsel %vm718_vm0, %v5091_v3, 0  ;;  %vm1223_vm5 = vcmask 1042432  }
   0xe   : > { %6012 = vmatprep.subr.msk.bf16.mxu1 %vm718_vm0, %v215_v2  ;;  %6013 = vmatprep.subr.msk.bf16.mxu0 %vm718_vm0, %v5091_v3  ;;  %s6020_s20 = smul.u32 216, %s9171_s13  ;;  %vm6179_vm4 = vmor %vm232_vm1, %vm233_vm2  ;;  %vm1224_vm6 = vcmask 1046532   ;;  %s5548_s9 = sshll.u32 %s9171_s13, 8 }
   0xf   : > { %vm6465_vm7 = vmor %vm1223_vm5, %vm1224_vm6  ;;  %s8592_s14 = scalar_lea.vmem %s8896_s2, %s5548_s9  ;;  %s5009_s15 = sshll.u32 %s9171_s13, 1 }
  0x10   : > { %s6135_s23 = scalar_lea.vmem %s8894_s0, %s6020_s20  ;;  %s8824_s18 = scalar_lea.vmem %s8897_s3, %s5009_s15 }
  0x11   : > { %v6141_v5 = vld [vmem:[%s6135_s23] sm:$0xf]  ;;  %v6144_v6 = vld [vmem:[%s6135_s23 + $0x4] sm:$0xf]  ;;  %v6147_v7 = vld [vmem:[%s6135_s23 + $0x8] sm:$0x1] }
  0x12   : > { %v236_v8 = vshrl.u32 %v6141_v5, 16  ;;  %v239_v9 = vshll.u32 %v6141_v5, 16  ;;  %v245_v10 = vshll.u32 %v6144_v6, 16  ;;  %v249_v11 = vshrl.u32 %v6144_v6, 16  ;;  %v6154_v12 = vld [vmem:[%s6135_s23 + $0x60] sm:$0xf] }
  0x13   : > { %v255_v13 = vshll.u32 %v6147_v7, 16  ;;  %v6158_v14 = vld [vmem:[%s6135_s23 + $0x64] sm:$0xf]  ;;  %v6161_v15 = vld [vmem:[%s6135_s23 + $0x68] sm:$0x1]  ;;  %v428_v22 = vshrl.u32 %v6154_v12, 16 }
  0x14   : > { %v238_v17 = vrot.slane %v236_v8, 4  ;;  %v241_v18 = vrot.slane %v239_v9, 5  ;;  %v247_v19 = vrot.slane %v245_v10, 5  ;;  %v251_v20 = vrot.slane %v249_v11, 4  ;;  %v6172_v29 = vld [vmem:[%s6135_s23 + $0xc] sm:$0xf] }
  0x15   : > { %v257_v21 = vrot.slane %v255_v13, 5  ;;  %v431_v23 = vshll.u32 %v6154_v12, 16  ;;  %v437_v24 = vshll.u32 %v6158_v14, 16  ;;  %v441_v27 = vshrl.u32 %v6158_v14, 16  ;;  %v6175_v30 = vld [vmem:[%s6135_s23 + $0x10] sm:$0xf] }
  0x16   : > { %v242_v25 = vor.u32 %v241_v18, %v238_v17  ;;  %v252_v26 = vor.u32 %v251_v20, %v247_v19  ;;  %v447_v28 = vshll.u32 %v6161_v15, 16  ;;  %v430_v33 = vrot.slane %v428_v22, 4  ;;  %v6185_v41 = vld [vmem:[%s6135_s23 + $0x14] sm:$0x1]  ;;  %v6196_v53 = vld [vmem:[%s6135_s23 + $0x6c] sm:$0xf] }
  0x17   : > { %v433_v34 = vrot.slane %v431_v23, 5  ;;  %v439_v35 = vrot.slane %v437_v24, 5  ;;  %v443_v38 = vrot.slane %v441_v27, 4  ;;  %v260_v42 = vshrl.u32 %v6172_v29, 16  ;;  %v6200_v58 = vld [vmem:[%s6135_s23 + $0x70] sm:$0xf] }
  0x18   : > { %v243_v36 = vrot.slane %v242_v25, 4  ;;  %v253_v37 = vrot.slane %v252_v26, 4  ;;  %v449_v39 = vrot.slane %v447_v28, 5  ;;  %v263_v43 = vshll.u32 %v6172_v29, 16  ;;  %v6208_v63 = vld [vmem:[%s6135_s23 + $0x74] sm:$0x1] }
  0x19   : > { %v434_v40 = vor.u32 %v433_v34, %v430_v33  ;;  %v269_v44 = vshll.u32 %v6175_v30, 16  ;;  %v444_v47 = vor.u32 %v443_v38, %v439_v35  ;;  %v273_v48 = vshrl.u32 %v6175_v30, 16  ;;  %v6214_v8 = vld [vmem:[%s6135_s23 + $0x18] sm:$0xf]  ;;  %v6227_v25 = vld [vmem:[%s6135_s23 + $0x20] sm:$0x1] }
  0x1a   : > { %v248_v45 = vsel %vm6179_vm4, %v243_v36, %v247_v19  ;;  %v258_v46 = vsel %vm6179_vm4, %v253_v37, %v257_v21  ;;  %v262_v51 = vrot.slane %v260_v42, 4  ;;  %v265_v52 = vrot.slane %v263_v43, 5  ;;  %v6221_v21 = vld [vmem:[%s6135_s23 + $0x1c] sm:$0xf] }
  0x1b   : > { %v5011_v49 = vcombine.low %v248_v45, %v258_v46  ;;  %v435_v50 = vrot.slane %v434_v40, 4  ;;  %v445_v54 = vrot.slane %v444_v47, 4  ;;  %v271_v55 = vrot.slane %v269_v44, 5  ;;  %v6240_v40 = vld [vmem:[%s8895_s1 + $0x10] sm:$0xf] }
  0x1c   : > { %v275_v56 = vrot.slane %v273_v48, 4  ;;  %v279_v57 = vshll.u32 %v6185_v41, 16  ;;  %v266_v60 = vor.u32 %v265_v52, %v262_v51  ;;  %v452_v3 = vshrl.u32 %v6196_v53, 16  ;;  %v6245_v46 = vld [vmem:[%s6135_s23 + $0x7c] sm:$0xf] }
  0x1d   : > { %5704 = vmatprep.mubr.msk.bf16.mxu0 %vm669_vm3, %v5011_v49  ;;  %v440_v59 = vsel %vm6179_vm4, %v435_v50, %v439_v35  ;;  %v450_v0 = vsel %vm6179_vm4, %v445_v54, %v449_v39  ;;  %v455_v11 = vshll.u32 %v6196_v53, 16  ;;  %v461_v13 = vshll.u32 %v6200_v58, 16  ;;  %v6234_v35 = vld [vmem:[%s6135_s23 + $0x78] sm:$0xf] }
  0x1e   : > { %v276_v1 = vor.u32 %v275_v56, %v271_v55  ;;  %v281_v2 = vrot.slane %v279_v57, 5  ;;  %v5019_v9 = vcombine.low %v440_v59, %v450_v0  ;;  %v267_v10 = vrot.slane %v266_v60, 4  ;;  %v6252_v56 = vld [vmem:[%s6135_s23 + $0x80] sm:$0x1] }
  0x1f   : > { %v454_v18 = vrot.slane %v452_v3, 4  ;;  %v465_v19 = vshrl.u32 %v6200_v58, 16  ;;  %v471_v20 = vshll.u32 %v6208_v63, 16  ;;  %v457_v23 = vrot.slane %v455_v11, 5  ;;  %8933 = vst [vmem:[#allocation2_spill] sm:$0xff] %v6252_v56 }
  0x20   : > { %v277_v17 = vrot.slane %v276_v1, 4  ;;  %5720 = vmatprep.mubr.msk.bf16.mxu1 %vm669_vm3, %v5019_v9  ;;  %v272_v22 = vsel %vm6179_vm4, %v267_v10, %v271_v55  ;;  %v463_v24 = vrot.slane %v461_v13, 5  ;;  %v284_v26 = vshrl.u32 %v6214_v8, 16  ;;  %v6258_v1 = vld [vmem:[%s6135_s23 + $0x24] sm:$0xf] }
  0x21   : > { %v467_v28 = vrot.slane %v465_v19, 4  ;;  %v473_v33 = vrot.slane %v471_v20, 5  ;;  %v287_v34 = vshll.u32 %v6214_v8, 16  ;;  %v458_v37 = vor.u32 %v457_v23, %v454_v18  ;;  %v6266_v10 = vld [vmem:[%s6135_s23 + $0x28] sm:$0xf] }
  0x22   : > { %v282_v27 = vsel %vm6179_vm4, %v277_v17, %v281_v2  ;;  %v286_v38 = vrot.slane %v284_v26, 4  ;;  %v293_v39 = vshll.u32 %v6221_v21, 16  ;;  %v297_v44 = vshrl.u32 %v6221_v21, 16  ;;  %v6272_v19 = vld [vmem:[%s8895_s1 + $0xc] sm:$0xf] }
  0x23   : > { %v5012_v36 = vcombine.low %v272_v22, %v282_v27  ;;  %v468_v42 = vor.u32 %v467_v28, %v463_v24  ;;  %v289_v43 = vrot.slane %v287_v34, 5  ;;  %v303_v45 = vshll.u32 %v6227_v25, 16 }
  0x24   : > { %v459_v47 = vrot.slane %v458_v37, 4  ;;  %v295_v48 = vrot.slane %v293_v39, 5  ;;  %v476_v49 = vshrl.u32 %v6234_v35, 16  ;;  %v479_v50 = vshll.u32 %v6234_v35, 16 }
  0x25   : > { %5705 = vmatmul.mubr.msk.bf16.vlgmr.msra.gmra.mxu0 %vm669_vm3, %v5012_v36  ;;  %v469_v51 = vrot.slane %v468_v42, 4  ;;  %v290_v52 = vor.u32 %v289_v43, %v286_v38  ;;  %v299_v54 = vrot.slane %v297_v44, 4  ;;  %v305_v55 = vrot.slane %v303_v45, 5  ;;  %v6284_v36 = vld [vmem:[%s6135_s23 + $0x84] sm:$0xf] }
  0x26   : > { %5771 = vmatpush3.bf16.msra.mxu0 %v6164_v16  ;;  %v464_v57 = vsel %vm6179_vm4, %v459_v47, %v463_v24  ;;  %v478_v59 = vrot.slane %v476_v49, 4  ;;  %v481_v60 = vrot.slane %v479_v50, 5  ;;  %v485_v0 = vshll.u32 %v6245_v46, 16  ;;  %v6277_v24 = vld [vmem:[%s6135_s23 + $0x2c] sm:$0x1] }
  0x27   : > { %6015 = vmatprep.subr.msk.bf16.mxu0 %vm718_vm0, %v6240_v40  ;;  %v474_v16 = vsel %vm6179_vm4, %v469_v51, %v473_v33  ;;  %v291_v2 = vrot.slane %v290_v52, 4  ;;  %v300_v3 = vor.u32 %v299_v54, %v295_v48  ;;  %v489_v9 = vshrl.u32 %v6245_v46, 16  ;;  %v6291_v43 = vld [vmem:[%s6135_s23 + $0x88] sm:$0xf]  ;;  %v6299_v51 = vld [vmem:[%s6135_s23 + $0x8c] sm:$0x1] }
  0x28   : > { %v5020_v11 = vcombine.low %v464_v57, %v474_v16  ;;  %v482_v13 = vor.u32 %v481_v60, %v478_v59  ;;  %v487_v17 = vrot.slane %v485_v0, 5  ;;  %v495_v18 = vshll.u32 %v6252_v56, 16  ;;  %8934 = vst [vmem:[#allocation3_spill] sm:$0xff] %v6299_v51  ;;  %v6307_v60 = vld [vmem:[%s6135_s23 + $0x30] sm:$0xf] }
  0x29   : > { %v296_v20 = vsel %vm6179_vm4, %v291_v2, %v295_v48  ;;  %v301_v22 = vrot.slane %v300_v3, 4  ;;  %v491_v23 = vrot.slane %v489_v9, 4  ;;  %v308_v26 = vshrl.u32 %v6258_v1, 16  ;;  %v6312_v9 = vld [vmem:[%s6135_s23 + $0x34] sm:$0xf] }
  0x2a   : > { %5721 = vmatmul.mubr.msk.bf16.vlgmr.msra.gmra.mxu1 %vm669_vm3, %v5020_v11  ;;  %v483_v27 = vrot.slane %v482_v13, 4  ;;  %v497_v28 = vrot.slane %v495_v18, 5  ;;  %v311_v33 = vshll.u32 %v6258_v1, 16  ;;  %v317_v34 = vshll.u32 %v6266_v10, 16 }
  0x2b   : > { %5737 = vmatpush3.bf16.msra.mxu1 %v6138_v4  ;;  %v306_v37 = vsel %vm6179_vm4, %v301_v22, %v305_v55  ;;  %v492_v38 = vor.u32 %v491_v23, %v487_v17  ;;  %v310_v39 = vrot.slane %v308_v26, 4  ;;  %v321_v42 = vshrl.u32 %v6266_v10, 16 }
  0x2c   : > { %v5013_v44 = vcombine.low %v296_v20, %v306_v37  ;;  %v488_v45 = vsel %vm6179_vm4, %v483_v27, %v487_v17  ;;  %v313_v47 = vrot.slane %v311_v33, 5  ;;  %v319_v48 = vrot.slane %v317_v34, 5  ;;  %6014 = vmatprep.subr.msk.bf16.mxu1 %vm718_vm0, %v6272_v19  ;;  %v6320_v33 = vld [vmem:[%s6135_s23 + $0x38] sm:$0x1] }
  0x2d   : > { %v493_v4 = vrot.slane %v492_v38, 4  ;;  %v323_v49 = vrot.slane %v321_v42, 4  ;;  %v327_v50 = vshll.u32 %v6277_v24, 16  ;;  %v500_v52 = vshrl.u32 %v6284_v36, 16  ;;  %v6325_v38 = vld [vmem:[%s6135_s23 + $0x90] sm:$0xf] }
  0x2e   : > { %5708 = vmatprep.mubr.msk.bf16.mxu0 %vm669_vm3, %v5013_v44  ;;  %v314_v54 = vor.u32 %v313_v47, %v310_v39  ;;  %v503_v55 = vshll.u32 %v6284_v36, 16  ;;  %v509_v57 = vshll.u32 %v6291_v43, 16  ;;  %v513_v59 = vshrl.u32 %v6291_v43, 16  ;;  %8935 = vst [vmem:[#allocation4_spill] sm:$0xff] %v6325_v38  ;;  %v6330_v47 = vld [vmem:[%s6135_s23 + $0x94] sm:$0xf] }
  0x2f   : > { %v498_v0 = vsel %vm6179_vm4, %v493_v4, %v497_v28  ;;  %v324_v16 = vor.u32 %v323_v49, %v319_v48  ;;  %v329_v2 = vrot.slane %v327_v50, 5  ;;  %v502_v3 = vrot.slane %v500_v52, 4  ;;  %8936 = vst [vmem:[#allocation5_spill] sm:$0xff] %v6330_v47 }
  0x30   : > { %v5021_v11 = vcombine.low %v488_v45, %v498_v0  ;;  %v315_v13 = vrot.slane %v314_v54, 4  ;;  %v505_v17 = vrot.slane %v503_v55, 5  ;;  %v511_v18 = vrot.slane %v509_v57, 5 }
  0x31   : > { %v325_v20 = vrot.slane %v324_v16, 4  ;;  %v515_v22 = vrot.slane %v513_v59, 4  ;;  %v519_v23 = vshll.u32 %v6299_v51, 16  ;;  %v332_v26 = vshrl.u32 %v6307_v60, 16  ;;  %v6339_v16 = vld [vmem:[%s6135_s23 + $0x98] sm:$0x1] }
  0x32   : > { %5724 = vmatprep.mubr.msk.bf16.mxu1 %vm669_vm3, %v5021_v11  ;;  %v320_v27 = vsel %vm6179_vm4, %v315_v13, %v319_v48  ;;  %v506_v28 = vor.u32 %v505_v17, %v502_v3  ;;  %v335_v34 = vshll.u32 %v6307_v60, 16  ;;  %v341_v37 = vshll.u32 %v6312_v9, 16  ;;  %8937 = vst [vmem:[#allocation6_spill] sm:$0xff] %v6339_v16  ;;  %v6344_v11 = vld [vmem:[%s6135_s23 + $0x3c] sm:$0xf] }
  0x33   : > { %v330_v39 = vsel %vm6179_vm4, %v325_v20, %v329_v2  ;;  %v516_v42 = vor.u32 %v515_v22, %v511_v18  ;;  %v521_v44 = vrot.slane %v519_v23, 5  ;;  %v334_v45 = vrot.slane %v332_v26, 4  ;;  %v6349_v23 = vld [vmem:[%s6135_s23 + $0x40] sm:$0xf]  ;;  %v1176_v51 = vld [vmem:[%s6135_s23 + $0xc] sm:$0xe] }
  0x34   : > { %v5014_v48 = vcombine.low %v320_v27, %v330_v39  ;;  %v507_v4 = vrot.slane %v506_v28, 4  ;;  %v337_v49 = vrot.slane %v335_v34, 5  ;;  %v343_v50 = vrot.slane %v341_v37, 5 }
  0x35   : > { %v517_v52 = vrot.slane %v516_v42, 4  ;;  %v345_v54 = vshrl.u32 %v6312_v9, 16  ;;  %v351_v55 = vshll.u32 %v6320_v33, 16  ;;  %v524_v57 = vshrl.u32 %v6325_v38, 16 }
  0x36   : > { %5709 = vmatmul.mubr.msk.bf16.gmra.mxu0 %vm669_vm3, %v5014_v48  ;;  %v512_v59 = vsel %vm6179_vm4, %v507_v4, %v511_v18  ;;  %v338_v0 = vor.u32 %v337_v49, %v334_v45  ;;  %v527_v2 = vshll.u32 %v6325_v38, 16  ;;  %v533_v3 = vshll.u32 %v6330_v47, 16  ;;  %v6358_v48 = vld [vmem:[%s6135_s23 + $0x44] sm:$0x1] }
  0x37   : > { %v522_v13 = vsel %vm6179_vm4, %v517_v52, %v521_v44  ;;  %v347_v17 = vrot.slane %v345_v54, 4  ;;  %v353_v20 = vrot.slane %v351_v55, 5  ;;  %v526_v22 = vrot.slane %v524_v57, 4  ;;  %v6363_v52 = vld [vmem:[%s6135_s23 + $0x9c] sm:$0xf] }
  0x38   : > { %v5022_v18 = vcombine.low %v512_v59, %v522_v13  ;;  %v339_v26 = vrot.slane %v338_v0, 4  ;;  %v529_v27 = vrot.slane %v527_v2, 5  ;;  %v535_v28 = vrot.slane %v533_v3, 5  ;;  %8938 = vst [vmem:[#allocation7_spill] sm:$0xff] %v6363_v52  ;;  %v6367_v13 = vld [vmem:[%s6135_s23 + $0xa0] sm:$0xf] }
  0x39   : > { %v348_v34 = vor.u32 %v347_v17, %v343_v50  ;;  %v537_v37 = vshrl.u32 %v6330_v47, 16  ;;  %v543_v39 = vshll.u32 %v6339_v16, 16  ;;  %v356_v42 = vshrl.u32 %v6344_v11, 16  ;;  %8939 = vst [vmem:[#allocation8_spill] sm:$0xff] %v6367_v13 }
  0x3a   : > { %5725 = vmatmul.mubr.msk.bf16.gmra.mxu1 %vm669_vm3, %v5022_v18  ;;  %v344_v44 = vsel %vm6179_vm4, %v339_v26, %v343_v50  ;;  %v530_v45 = vor.u32 %v529_v27, %v526_v22  ;;  %v359_v4 = vshll.u32 %v6344_v11, 16  ;;  %v365_v49 = vshll.u32 %v6349_v23, 16  ;;  %v6373_v26 = vld [vmem:[%s6135_s23 + $0xa4] sm:$0x1] }
  0x3b   : > { %v349_v54 = vrot.slane %v348_v34, 4  ;;  %v539_v55 = vrot.slane %v537_v37, 4  ;;  %v545_v57 = vrot.slane %v543_v39, 5  ;;  %v358_v59 = vrot.slane %v356_v42, 4  ;;  %8940 = vst [vmem:[#allocation9_spill] sm:$0xff] %v6373_v26 }
  0x3c   : > { %v531_v0 = vrot.slane %v530_v45, 4  ;;  %v361_v2 = vrot.slane %v359_v4, 5  ;;  %v367_v3 = vrot.slane %v365_v49, 5  ;;  %v369_v50 = vshrl.u32 %v6349_v23, 16  ;;  %v6377_v34 = vld [vmem:[%s6135_s23 + $0x48] sm:$0xf] }
  0x3d   : > { %v354_v17 = vsel %vm6179_vm4, %v349_v54, %v353_v20  ;;  %v540_v22 = vor.u32 %v539_v55, %v535_v28  ;;  %v375_v18 = vshll.u32 %v6358_v48, 16  ;;  %v548_v27 = vshrl.u32 %v6363_v52, 16 }
  0x3e   : > { %v5015_v37 = vcombine.low %v344_v44, %v354_v17  ;;  %v536_v39 = vsel %vm6179_vm4, %v531_v0, %v535_v28  ;;  %v362_v42 = vor.u32 %v361_v2, %v358_v59  ;;  %v371_v45 = vrot.slane %v369_v50, 4  ;;  %v6386_v17 = vld [vmem:[%s6135_s23 + $0x4c] sm:$0xf]  ;;  %v6392_v2 = vld [vmem:[%s6135_s23 + $0x50] sm:$0x1] }
  0x3f   : > { %v541_v4 = vrot.slane %v540_v22, 4  ;;  %v377_v49 = vrot.slane %v375_v18, 5  ;;  %v550_v20 = vrot.slane %v548_v27, 4  ;;  %v551_v54 = vshll.u32 %v6363_v52, 16 }
  0x40   : > { %5712 = vmatprep.mubr.msk.bf16.mxu0 %vm669_vm3, %v5015_v37  ;;  %v363_v55 = vrot.slane %v362_v42, 4  ;;  %v372_v62 = vor.u32 %v371_v45, %v367_v3  ;;  %v557_v32 = vshll.u32 %v6367_v13, 16  ;;  %v561_v44 = vshrl.u32 %v6367_v13, 16  ;;  %v6398_v42 = vld [vmem:[%s6135_s23 + $0xa8] sm:$0xf] }
  0x41   : > { %v546_v28 = vsel %vm6179_vm4, %v541_v4, %v545_v57  ;;  %v553_v59 = vrot.slane %v551_v54, 5  ;;  %v567_v0 = vshll.u32 %v6373_v26, 16  ;;  %v380_v50 = vshrl.u32 %v6377_v34, 16  ;;  %8941 = vst [vmem:[#allocation10_spill] sm:$0xff] %v6398_v42 }
  0x42   : > { %v5023_v22 = vcombine.low %v536_v39, %v546_v28  ;;  %v368_v18 = vsel %vm6179_vm4, %v363_v55, %v367_v3  ;;  %v373_v27 = vrot.slane %v372_v62, 4  ;;  %v559_v37 = vrot.slane %v557_v32, 5 }
  0x43   : > { %v554_v45 = vor.u32 %v553_v59, %v550_v20  ;;  %v563_v61 = vrot.slane %v561_v44, 4  ;;  %v569_v57 = vrot.slane %v567_v0, 5  ;;  %v382_v4 = vrot.slane %v380_v50, 4  ;;  %v6408_v44 = vld [vmem:[%s6135_s23 + $0xac] sm:$0xf] }
  0x44   : > { %5728 = vmatprep.mubr.msk.bf16.mxu1 %vm669_vm3, %v5023_v22  ;;  %v378_v54 = vsel %vm6179_vm4, %v373_v27, %v377_v49  ;;  %v383_v39 = vshll.u32 %v6377_v34, 16  ;;  %v389_v28 = vshll.u32 %v6386_v17, 16  ;;  %v393_v62 = vshrl.u32 %v6386_v17, 16  ;;  %8942 = vst [vmem:[#allocation11_spill] sm:$0xff] %v6408_v44  ;;  %v6411_v22 = vld [vmem:[%s6135_s23 + $0xb0] sm:$0x1] }
  0x45   : > { %v5016_v3 = vcombine.low %v368_v18, %v378_v54  ;;  %v555_v32 = vrot.slane %v554_v45, 4  ;;  %v564_v55 = vor.u32 %v563_v61, %v559_v37  ;;  %v399_v20 = vshll.u32 %v6392_v2, 16  ;;  %8943 = vst [vmem:[#allocation12_spill] sm:$0xff] %v6411_v22 }
  0x46   : > { %v385_v59 = vrot.slane %v383_v39, 5  ;;  %v391_v0 = vrot.slane %v389_v28, 5  ;;  %v395_v50 = vrot.slane %v393_v62, 4  ;;  %v572_v49 = vshrl.u32 %v6398_v42, 16  ;;  %v6420_v62 = vld [vmem:[%s6135_s23 + $0x54] sm:$0xf] }
  0x47   : > { %5713 = vmatmul.mubr.msk.bf16.gmra.mxu0 %vm669_vm3, %v5016_v3  ;;  %v560_v18 = vsel %vm6179_vm4, %v555_v32, %v559_v37  ;;  %v565_v27 = vrot.slane %v564_v55, 4  ;;  %v401_v61 = vrot.slane %v399_v20, 5  ;;  %v575_v45 = vshll.u32 %v6398_v42, 16  ;;  %v6427_v55 = vld [vmem:[%s6135_s23 + $0x58] sm:$0xf] }
  0x48   : > { %v386_v54 = vor.u32 %v385_v59, %v382_v4  ;;  %v396_v56 = vor.u32 %v395_v50, %v391_v0  ;;  %v574_v39 = vrot.slane %v572_v49, 4  ;;  %v581_v28 = vshll.u32 %v6408_v44, 16  ;;  %v6430_v49 = vld [vmem:[%s6135_s23 + $0x5c] sm:$0x1] }
  0x49   : > { %v570_v3 = vsel %vm6179_vm4, %v565_v27, %v569_v57  ;;  %v577_v26 = vrot.slane %v575_v45, 5  ;;  %v585_v37 = vshrl.u32 %v6408_v44, 16  ;;  %v591_v32 = vshll.u32 %v6411_v22, 16  ;;  %v1175_v22 = vld [vmem:[%s6135_s23] sm:$0xe] }
  0x4a   : > { %v5024_v4 = vcombine.low %v560_v18, %v570_v3  ;;  %v387_v20 = vrot.slane %v386_v54, 4  ;;  %v397_v59 = vrot.slane %v396_v56, 4  ;;  %v583_v50 = vrot.slane %v581_v28, 5  ;;  %v6441_v54 = vld [vmem:[%s6135_s23 + $0xb4] sm:$0xf] }
  0x4b   : > { %v578_v42 = vor.u32 %v577_v26, %v574_v39  ;;  %v587_v52 = vrot.slane %v585_v37, 4  ;;  %v593_v13 = vrot.slane %v591_v32, 5  ;;  %v404_v57 = vshrl.u32 %v6420_v62, 16  ;;  %8944 = vst [vmem:[#allocation13_spill] sm:$0xff] %v6441_v54  ;;  %v6444_v37 = vld [vmem:[%s6135_s23 + $0xb8] sm:$0xf] }
  0x4c   : > { %5729 = vmatmul.mubr.msk.bf16.gmra.mxu1 %vm669_vm3, %v5024_v4  ;;  %v392_v27 = vsel %vm6179_vm4, %v387_v20, %v391_v0  ;;  %v402_v18 = vsel %vm6179_vm4, %v397_v59, %v401_v61  ;;  %v407_v56 = vshll.u32 %v6420_v62, 16  ;;  %v413_v45 = vshll.u32 %v6427_v55, 16  ;;  %v6449_v61 = vld [vmem:[%s6135_s23 + $0xbc] sm:$0x1] }
  0x4d   : > { %v5017_v26 = vcombine.low %v392_v27, %v402_v18  ;;  %v579_v39 = vrot.slane %v578_v42, 4  ;;  %v588_v28 = vor.u32 %v587_v52, %v583_v50  ;;  %v406_v3 = vrot.slane %v404_v57, 4 }
  0x4e   : > { %v409_v32 = vrot.slane %v407_v56, 5  ;;  %v415_v4 = vrot.slane %v413_v45, 5  ;;  %v417_v0 = vshrl.u32 %v6427_v55, 16  ;;  %v423_v20 = vshll.u32 %v6430_v49, 16 }
  0x4f   : > { %5716 = vmatprep.mubr.msk.bf16.mxu0 %vm669_vm3, %v5017_v26  ;;  %v584_v59 = vsel %vm6179_vm4, %v579_v39, %v583_v50  ;;  %v589_v27 = vrot.slane %v588_v28, 4  ;;  %v596_v52 = vshrl.u32 %v6441_v54, 16  ;;  %v599_v42 = vshll.u32 %v6441_v54, 16 }
  0x50   : > { %v410_v57 = vor.u32 %v409_v32, %v406_v3  ;;  %v419_v18 = vrot.slane %v417_v0, 4  ;;  %v425_v56 = vrot.slane %v423_v20, 5  ;;  %v605_v45 = vshll.u32 %v6444_v37, 16 }
  0x51   : > { %v594_v44 = vsel %vm6179_vm4, %v589_v27, %v593_v13  ;;  %v598_v16 = vrot.slane %v596_v52, 4  ;;  %v601_v26 = vrot.slane %v599_v42, 5  ;;  %v609_v38 = vshrl.u32 %v6444_v37, 16 }
  0x52   : > { %v5025_v50 = vcombine.low %v584_v59, %v594_v44  ;;  %v411_v39 = vrot.slane %v410_v57, 4  ;;  %v420_v28 = vor.u32 %v419_v18, %v415_v4  ;;  %v607_v47 = vrot.slane %v605_v45, 5  ;;  %v1177_v57 = vld [vmem:[%s6135_s23 + $0x18] sm:$0xe] }
  0x53   : > { %v602_v54 = vor.u32 %v601_v26, %v598_v16  ;;  %v611_v3 = vrot.slane %v609_v38, 4  ;;  %v615_v32 = vshll.u32 %v6449_v61, 16  ;;  %v5075_v13 = vrot.slane %v1175_v22, 9 }
  0x54   : > { %5732 = vmatprep.mubr.msk.bf16.mxu1 %vm669_vm3, %v5025_v50  ;;  %v416_v44 = vsel %vm6179_vm4, %v411_v39, %v415_v4  ;;  %v421_v20 = vrot.slane %v420_v28, 4  ;;  %v1228_v59 = vrot.slane %v6144_v6, 5  ;;  %v5044_v38 = vcombine.low %v6172_v29, %v6175_v30 }
  0x55   : > { %v603_v16 = vrot.slane %v602_v54, 4  ;;  %v612_v27 = vor.u32 %v611_v3, %v607_v47  ;;  %v617_v52 = vrot.slane %v615_v32, 5  ;;  %v5076_v42 = vrot.slane %v1176_v51, 9 }
  0x56   : > { %v426_v18 = vsel %vm6179_vm4, %v421_v20, %v425_v56  ;;  %v1229_v22 = vsel %vm6465_vm7, %v5075_v13, %v1228_v59  ;;  %v1230_v45 = vrot.slane %v1228_v59, 4  ;;  %v8947_v4 = vrot.slane %v6175_v30, 5 }
  0x57   : > { %v5018_v50 = vcombine.low %v416_v44, %v426_v18  ;;  %v608_v54 = vsel %vm6179_vm4, %v603_v16, %v607_v47  ;;  %v613_v39 = vrot.slane %v612_v27, 4  ;;  %v5043_v51 = vcombine.low %v6141_v5, %v6144_v6  ;;  %v1178_v27 = vld [vmem:[%s6135_s23 + $0x24] sm:$0xe] }
  0x58   : > { %v1237_v26 = vrot.slane %v8947_v4, 4  ;;  %v8948_v28 = vrot.slane %v6147_v7, 5  ;;  %v8949_v3 = vmov %v8947_v4  ;;  %v5045_v13 = vcombine.low %v6214_v8, %v6221_v21  ;;  %v1180_v4 = vld [vmem:[%s6135_s23 + $0x3c] sm:$0xe] }
  0x59   : > { %v1236_v32 = vsel %vm6465_vm7, %v5076_v42, %v8949_v3  ;;  %v5077_v44 = vrot.slane %v1177_v57, 9  ;;  %5717 = vmatmul.mubr.msk.bf16.gmra.mxu0 %vm669_vm3, %v5018_v50  ;;  %v618_v47 = vsel %vm6179_vm4, %v613_v39, %v617_v52  ;;  %v8950_v6 = vrot.slane %v6185_v41, 5  ;;  %v1179_v42 = vld [vmem:[%s6135_s23 + $0x30] sm:$0xe]  ;;  %v1181_v39 = vld [vmem:[%s6135_s23 + $0x48] sm:$0xe] }
  0x5a   : > { %v1232_v56 = vsel %vm6465_vm7, %v1230_v45, %v8948_v28  ;;  %v1242_v20 = vrot.slane %v6221_v21, 5  ;;  %v5026_v59 = vcombine.low %v608_v54, %v618_v47  ;;  %v1245_v16 = vrot.slane %v6227_v25, 5  ;;  %v1182_v47 = vld [vmem:[%s6135_s23 + $0x54] sm:$0xe]  ;;  %v6760_v21 = vld [vmem:[%s6135_s23 + $0x2c] sm:$0x1] }
  0x5b   : > { %v5092_v5 = vcombine.low %v1229_v22, %v1232_v56  ;;  %v1239_v7 = vsel %vm6465_vm7, %v1237_v26, %v8950_v6  ;;  %v1796_v52 = vsel %vm718_vm0, %v6272_v19, 0  ;;  %v1249_v18 = vrot.slane %v6266_v10, 5 }
  0x5c   : > { %v1243_v41 = vsel %vm6465_vm7, %v5077_v44, %v1242_v20  ;;  %v1244_v57 = vrot.slane %v1242_v20, 4  ;;  %5733 = vmatmul.mubr.msk.bf16.gmra.mxu1 %vm669_vm3, %v5026_v59  ;;  %v5093_v22 = vcombine.low %v1236_v32, %v1239_v7  ;;  %v2522_v25 = vsel %vm718_vm0, %v6240_v40, 0 }
  0x5d   : > { %5772 = vmatprep.mubr.msk.bf16.mxu0 %vm669_vm3, %v5092_v5  ;;  %v1256_v45 = vrot.slane %v6312_v9, 5  ;;  %5738 = vmatprep.mubr.msk.bf16.mxu1 %vm669_vm3, %v5043_v51  ;;  %v5078_v26 = vrot.slane %v1178_v27, 9  ;;  %v1252_v50 = vrot.slane %v6277_v24, 5  ;;  %v5079_v54 = vrot.slane %v1179_v42, 9  ;;  %v6532_v24 = vld [vmem:[%s8895_s1 + $0x18] sm:$0xf] }
  0x5e   : > { %v1246_v19 = vsel %vm6465_vm7, %v1244_v57, %v1245_v16  ;;  %v1251_v56 = vrot.slane %v1249_v18, 4  ;;  %v1259_v32 = vrot.slane %v6320_v33, 5  ;;  %v5080_v44 = vrot.slane %v1180_v4, 9 }
  0x5f   : > { %v5094_v28 = vcombine.low %v1243_v41, %v1246_v19  ;;  %v1258_v3 = vrot.slane %v1256_v45, 4  ;;  %v1263_v40 = vrot.slane %v6349_v23, 5  ;;  %v1287_v5 = vrot.slane %v6161_v15, 5 }
  0x60   : > { %v1266_v51 = vrot.slane %v6358_v48, 5  ;;  %v5081_v6 = vrot.slane %v1181_v39, 9  ;;  %v1270_v7 = vrot.slane %v6386_v17, 5  ;;  %v5046_v33 = vcombine.low %v6258_v1, %v6266_v10  ;;  %v1183_v1 = vld [vmem:[%s6135_s23 + $0x60] sm:$0xe] }
  0x61   : > { %5773 = vmatmul.mubr.msk.bf16.vlgmr.msra.gmra.mxu0 %vm669_vm3, %v5093_v22  ;;  %v1250_v20 = vsel %vm6465_vm7, %v5078_v26, %v1249_v18  ;;  %v1265_v59 = vrot.slane %v1263_v40, 4  ;;  %v1273_v16 = vrot.slane %v6392_v2, 5  ;;  %v1253_v48 = vsel %vm6465_vm7, %v1251_v56, %v1252_v50  ;;  %v6560_v22 = vld [vmem:[%s8895_s1 + $0x14] sm:$0xf]  ;;  %v6585_v50 = vld [vmem:[%s6135_s23 + $0x6c] sm:$0xe] }
  0x62   : > { %5839 = vmatpush3.bf16.msra.mxu0 %v2522_v25  ;;  %5776 = vmatprep.mubr.msk.bf16.mxu0 %vm669_vm3, %v5094_v28  ;;  %v1257_v27 = vsel %vm6465_vm7, %v5079_v54, %v1256_v45  ;;  %v1260_v42 = vsel %vm6465_vm7, %v1258_v3, %v1259_v32  ;;  %v1272_v41 = vrot.slane %v1270_v7, 4  ;;  %v6550_v10 = vsel %vm6465_vm7, %v5080_v44, %v1263_v40  ;;  %v1186_v39 = vld [vmem:[%s6135_s23 + $0x84] sm:$0xe]  ;;  %v6614_v44 = vld [vmem:[%s6135_s23 + $0x78] sm:$0xe] }
  0x63   : > { %v6554_v2 = vsel %vm6465_vm7, %v5081_v6, %v1270_v7  ;;  %v5082_v57 = vrot.slane %v1182_v47, 9  ;;  %v1277_v18 = vrot.slane %v6427_v55, 5  ;;  %6017 = vmatprep.subr.msk.bf16.mxu0 %vm718_vm0, %v6532_v24  ;;  %v6570_v25 = vsel %vm6465_vm7, %v1265_v59, %v1266_v51  ;;  %v1187_v40 = vld [vmem:[%s6135_s23 + $0x90] sm:$0xe] }
  0x64   : > { %5739 = vmatmul.mubr.msk.bf16.vlgmr.msra.gmra.mxu1 %vm669_vm3, %v5044_v38  ;;  %v6574_v45 = vsel %vm6465_vm7, %v1272_v41, %v1273_v16  ;;  %v1280_v4 = vrot.slane %v6430_v49, 5  ;;  %v1284_v19 = vrot.slane %v6158_v14, 5  ;;  %v5095_v29 = vcombine.low %v1250_v20, %v1253_v48  ;;  %v8951_v48 = vld [vmem:[#allocation3_spill] sm:$0xff] }
  0x65   : > { %5805 = vmatpush3.bf16.msra.mxu1 %v1796_v52  ;;  %5742 = vmatprep.mubr.msk.bf16.mxu1 %vm669_vm3, %v5045_v13  ;;  %v5047_v30 = vcombine.low %v6307_v60, %v6312_v9  ;;  %v1279_v38 = vrot.slane %v1277_v18, 4  ;;  %v5083_v26 = vrot.slane %v1183_v1, 9  ;;  %v5096_v49 = vcombine.low %v1257_v27, %v1260_v42  ;;  %v1188_v42 = vld [vmem:[%s6135_s23 + $0x9c] sm:$0xe] }
  0x66   : > { %v5048_v52 = vcombine.low %v6344_v11, %v6349_v23  ;;  %v5049_v8 = vcombine.low %v6377_v34, %v6386_v17  ;;  %6016 = vmatprep.subr.msk.bf16.mxu1 %vm718_vm0, %v6560_v22  ;;  %v5097_v60 = vcombine.low %v6550_v10, %v6570_v25  ;;  %v5098_v9 = vcombine.low %v6554_v2, %v6574_v45  ;;  %v8952_v10 = vld [vmem:[#allocation5_spill] sm:$0xff]  ;;  %v8953_v2 = vld [vmem:[#allocation4_spill] sm:$0xff] }
  0x67   : > { %v1286_v54 = vrot.slane %v1284_v19, 4  ;;  %v6604_v28 = vsel %vm6465_vm7, %v5082_v57, %v1277_v18  ;;  %v6608_v56 = vsel %vm6465_vm7, %v1279_v38, %v1280_v4  ;;  %v5084_v32 = vrot.slane %v6585_v50, 9  ;;  %v1189_v18 = vld [vmem:[%s6135_s23 + $0xa8] sm:$0xe]  ;;  %v8955_v38 = vld [vmem:[#allocation8_spill] sm:$0xff] }
  0x68   : > { %v6620_v47 = vsel %vm6465_vm7, %v5083_v26, %v1284_v19  ;;  %v1291_v51 = vrot.slane %v6200_v58, 5  ;;  %v1294_v6 = vrot.slane %v6208_v63, 5  ;;  %v5086_v59 = vrot.slane %v1186_v39, 9  ;;  %v8954_v19 = vld [vmem:[#allocation6_spill] sm:$0xff]  ;;  %v8956_v26 = vld [vmem:[#allocation7_spill] sm:$0xff] }
  0x69   : > { %5777 = vmatmul.mubr.msk.bf16.gmra.mxu0 %vm669_vm3, %v5095_v29  ;;  %v1305_v16 = vrot.slane %v6291_v43, 5  ;;  %v1308_v27 = vrot.slane %v8951_v48, 5  ;;  %v5099_v41 = vcombine.low %v6604_v28, %v6608_v56  ;;  %v6638_v63 = vsel %vm6465_vm7, %v1286_v54, %v1287_v5  ;;  %v8958_v48 = vld [vmem:[#allocation11_spill] sm:$0xff] }
  0x6a   : > { %5780 = vmatprep.mubr.msk.bf16.mxu0 %vm669_vm3, %v5096_v49  ;;  %v5085_v1 = vrot.slane %v6614_v44, 9  ;;  %v5087_v4 = vrot.slane %v1187_v40, 9  ;;  %v1312_v15 = vrot.slane %v8952_v10, 5  ;;  %v1293_v5 = vrot.slane %v1291_v51, 4  ;;  %v5189_v57 = vld [vmem:[%s6135_s23 + $0xc] sm:$0xf] }
  0x6b   : > { %v6647_v25 = vsel %vm6465_vm7, %v5086_v59, %v1305_v16  ;;  %v1307_v45 = vrot.slane %v1305_v16, 4  ;;  %v1315_v29 = vrot.slane %v8954_v19, 5  ;;  %v5088_v49 = vrot.slane %v1188_v42, 9  ;;  %v8957_v59 = vld [vmem:[#allocation9_spill] sm:$0xff]  ;;  %v8959_v42 = vld [vmem:[#allocation10_spill] sm:$0xff] }
  0x6c   : > { %5743 = vmatmul.mubr.msk.bf16.gmra.mxu1 %vm669_vm3, %v5046_v33  ;;  %v1298_v33 = vrot.slane %v6245_v46, 5  ;;  %v6661_v39 = vsel %vm6465_vm7, %v5087_v4, %v1312_v15  ;;  %v1314_v44 = vrot.slane %v1312_v15, 4  ;;  %v1319_v40 = vrot.slane %v8955_v38, 5  ;;  %v8960_v15 = vld [vmem:[#allocation12_spill] sm:$0xff] }
  0x6d   : > { %5746 = vmatprep.mubr.msk.bf16.mxu1 %vm669_vm3, %v5047_v30  ;;  %v6657_v54 = vsel %vm6465_vm7, %v1307_v45, %v1308_v27  ;;  %v1322_v16 = vrot.slane %v8957_v59, 5  ;;  %v5089_v45 = vrot.slane %v1189_v18, 9  ;;  %v1326_v4 = vrot.slane %v8958_v48, 5 }
  0x6e   : > { %v6671_v27 = vsel %vm6465_vm7, %v1314_v44, %v1315_v29  ;;  %v1329_v50 = vrot.slane %v8960_v15, 5  ;;  %v6681_v19 = vsel %vm6465_vm7, %v5088_v49, %v1319_v40  ;;  %v1321_v7 = vrot.slane %v1319_v40, 4  ;;  %v8961_v29 = vld [vmem:[#allocation13_spill] sm:$0xff]  ;;  %v8962_v15 = vld [vmem:[#allocation2_spill] sm:$0xff]  ;;  %v6696_v49 = vld [vmem:[%s6135_s23 + $0x10] sm:$0xf] }
  0x6f   : > { %v6688_v18 = vsel %vm6465_vm7, %v5084_v32, %v1291_v51  ;;  %v6693_v59 = vsel %vm6465_vm7, %v5089_v45, %v1326_v4  ;;  %v1328_v30 = vrot.slane %v1326_v4, 4  ;;  %v5192_v40 = vld [vmem:[%s6135_s23 + $0x18] sm:$0xf]  ;;  %v1300_v20 = vrot.slane %v1298_v33, 4 }
  0x70   : > { %v2040_v44 = vshrl.u32 %v5189_v57, 16  ;;  %v2043_v32 = vshll.u32 %v5189_v57, 16  ;;  %v5100_v51 = vcombine.low %v6620_v47, %v6638_v63  ;;  %v6711_v45 = vsel %vm6465_vm7, %v1293_v5, %v1294_v6  ;;  %v1190_v57 = vld [vmem:[%s6135_s23 + $0xb4] sm:$0xe]  ;;  %v6732_v47 = vld [vmem:[%s6135_s23 + $0x14] sm:$0x1] }
  0x71   : > { %5781 = vmatmul.mubr.msk.bf16.gmra.mxu0 %vm669_vm3, %v5097_v60  ;;  %v1301_v60 = vrot.slane %v8962_v15, 5  ;;  %v6726_v11 = vsel %vm6465_vm7, %v5085_v1, %v1298_v33  ;;  %v2049_v6 = vshll.u32 %v6696_v49, 16  ;;  %v5193_v63 = vld [vmem:[%s6135_s23 + $0x1c] sm:$0xf]  ;;  %v2053_v17 = vshrl.u32 %v6696_v49, 16 }
  0x72   : > { %5784 = vmatprep.mubr.msk.bf16.mxu0 %vm669_vm3, %v5098_v9  ;;  %v6701_v9 = vsel %vm6465_vm7, %v1321_v7, %v1322_v16  ;;  %v6717_v7 = vsel %vm6465_vm7, %v1328_v30, %v1329_v50  ;;  %v2042_v5 = vrot.slane %v2040_v44, 4  ;;  %v2045_v34 = vrot.slane %v2043_v32, 5  ;;  %v5195_v15 = vld [vmem:[%s6135_s23 + $0x24] sm:$0xf]  ;;  %v6745_v44 = vld [vmem:[%s6135_s23 + $0x28] sm:$0xf] }
  0x73   : > { %v2064_v50 = vshrl.u32 %v5192_v40, 16  ;;  %v1302_v1 = vsel %vm6465_vm7, %v1300_v20, %v1301_v60  ;;  %v5090_v33 = vrot.slane %v1190_v57, 9  ;;  %v6740_v30 = vrot.slane %v2049_v6, 5 }
  0x74   : > { %5747 = vmatmul.mubr.msk.bf16.gmra.mxu1 %vm669_vm3, %v5048_v52  ;;  %v1333_v52 = vrot.slane %v6444_v37, 5  ;;  %v2067_v16 = vshll.u32 %v5192_v40, 16  ;;  %v1336_v23 = vrot.slane %v6449_v61, 5  ;;  %v2055_v4 = vrot.slane %v2053_v17, 4 }
  0x75   : > { %5750 = vmatprep.mubr.msk.bf16.mxu1 %vm669_vm3, %v5049_v8  ;;  %v5194_v8 = vld [vmem:[%s6135_s23 + $0x20] sm:$0x1]  ;;  %v2066_v3 = vrot.slane %v2064_v50, 4  ;;  %v2073_v13 = vshll.u32 %v5193_v63, 16  ;;  %v2059_v20 = vshll.u32 %v6732_v47, 16  ;;  %v2077_v57 = vshrl.u32 %v5193_v63, 16 }
  0x76   : > { %v1335_v32 = vrot.slane %v1333_v52, 4  ;;  %v2069_v60 = vrot.slane %v2067_v16, 5  ;;  %v5101_v61 = vcombine.low %v6688_v18, %v6711_v45  ;;  %v5102_v40 = vcombine.low %v6726_v11, %v1302_v1 }
  0x77   : > { %v2046_v6 = vor.u32 %v2045_v34, %v2042_v5  ;;  %v6756_v17 = vrot.slane %v2073_v13, 5  ;;  %v2056_v28 = vor.u32 %v2055_v4, %v6740_v30  ;;  %v2083_v50 = vshll.u32 %v5194_v8, 16  ;;  %v6783_v5 = vld [vmem:[%s6135_s23 + $0x34] sm:$0xf] }
  0x78   : > { %v2070_v56 = vor.u32 %v2069_v60, %v2066_v3  ;;  %v6768_v18 = vsel %vm6465_vm7, %v5090_v33, %v1333_v52  ;;  %v2088_v13 = vshrl.u32 %v5195_v15, 16  ;;  %v2091_v45 = vshll.u32 %v5195_v15, 16  ;;  %v5198_v52 = vld [vmem:[%s6135_s23 + $0x30] sm:$0xf] }
  0x79   : > { %5785 = vmatmul.mubr.msk.bf16.gmra.mxu0 %vm669_vm3, %v5099_v41  ;;  %v2079_v41 = vrot.slane %v2077_v57, 4  ;;  %v2097_v11 = vshll.u32 %v6745_v44, 16  ;;  %v8964_v3 = vcombine.low %v6154_v12, %v6158_v14  ;;  %v6777_v4 = vsel %vm6465_vm7, %v1335_v32, %v1336_v23 }
  0x7a   : > { %5788 = vmatprep.mubr.msk.bf16.mxu0 %vm669_vm3, %v5100_v51  ;;  %v8963_v51 = vcombine.low %v6420_v62, %v6427_v55  ;;  %v2061_v62 = vrot.slane %v2059_v20, 5  ;;  %v2101_v63 = vshrl.u32 %v6745_v44, 16  ;;  %v2047_v34 = vrot.slane %v2046_v6, 4 }
  0x7b   : > { %v2080_v55 = vor.u32 %v2079_v41, %v6756_v17  ;;  %v2090_v8 = vrot.slane %v2088_v13, 4  ;;  %v2093_v1 = vrot.slane %v2091_v45, 5  ;;  %v6785_v33 = vrot.slane %v2097_v11, 5  ;;  %v6791_v41 = vld [vmem:[%s6135_s23 + $0x38] sm:$0x1] }
  0x7c   : > { %5751 = vmatmul.mubr.msk.bf16.gmra.mxu1 %vm669_vm3, %v8963_v51  ;;  %v2057_v12 = vrot.slane %v2056_v28, 4  ;;  %v2071_v14 = vrot.slane %v2070_v56, 4  ;;  %v2085_v16 = vrot.slane %v2083_v50, 5  ;;  %v2103_v23 = vrot.slane %v2101_v63, 4  ;;  %v5201_v13 = vld [vmem:[%s6135_s23 + $0x3c] sm:$0xf] }
  0x7d   : > { %5754 = vmatprep.mubr.msk.bf16.mxu1 %vm669_vm3, %v8964_v3  ;;  %v2081_v15 = vrot.slane %v2080_v55, 4  ;;  %v2107_v32 = vshll.u32 %v6760_v21, 16  ;;  %v2112_v20 = vshrl.u32 %v5198_v52, 16  ;;  %v2115_v60 = vshll.u32 %v5198_v52, 16 }
  0x7e   : > { %v2094_v57 = vor.u32 %v2093_v1, %v2090_v8  ;;  %v2104_v6 = vor.u32 %v2103_v23, %v6785_v33  ;;  %v2121_v28 = vshll.u32 %v6783_v5, 16  ;;  %v2125_v56 = vshrl.u32 %v6783_v5, 16  ;;  %v5204_v8 = vld [vmem:[%s6135_s23 + $0x48] sm:$0xf]  ;;  %v6818_v1 = vld [vmem:[%s6135_s23 + $0x4c] sm:$0xf] }
  0x7f   : > { %v2114_v50 = vrot.slane %v2112_v20, 4  ;;  %v2117_v51 = vrot.slane %v2115_v60, 5  ;;  %v8965_v3 = vcombine.low %v6196_v53, %v6200_v58  ;;  %v5107_v55 = vcombine.low %v6768_v18, %v6777_v4 }
  0x80   : > { %v6797_v45 = vrot.slane %v2121_v28, 5  ;;  %v2127_v11 = vrot.slane %v2125_v56, 4  ;;  %v2062_v63 = vsel %vm6179_vm4, %v2057_v12, %v2061_v62  ;;  %v2076_v52 = vsel %vm6179_vm4, %v2071_v14, %v6756_v17 }
  0x81   : > { %5789 = vmatmul.mubr.msk.bf16.gmra.mxu0 %vm669_vm3, %v5101_v61  ;;  %v6800_v61 = vld [vmem:[%s6135_s23 + $0x40] sm:$0xf]  ;;  %v8966_v53 = vcombine.low %v6234_v35, %v6245_v46  ;;  %v2086_v58 = vsel %vm6179_vm4, %v2081_v15, %v2085_v16  ;;  %v2095_v23 = vrot.slane %v2094_v57, 4  ;;  %v2118_v20 = vor.u32 %v2117_v51, %v2114_v50  ;;  %v6852_v50 = vld [vmem:[%s6135_s23 + $0x44] sm:$0x1] }
  0x82   : > { %5792 = vmatprep.mubr.msk.bf16.mxu0 %vm669_vm3, %v5102_v40  ;;  %v2052_v40 = vsel %vm6179_vm4, %v2047_v34, %v6740_v30  ;;  %v2105_v30 = vrot.slane %v2104_v6, 4  ;;  %v2109_v34 = vrot.slane %v2107_v32, 5  ;;  %v2131_v62 = vshll.u32 %v6791_v41, 16  ;;  %v5207_v51 = vld [vmem:[%s6135_s23 + $0x54] sm:$0xf] }
  0x83   : > { %v2136_v12 = vshrl.u32 %v5201_v13, 16  ;;  %v2139_v17 = vshll.u32 %v5201_v13, 16  ;;  %v6829_v14 = vsel %vm718_vm0, %v6560_v22, 0  ;;  %v2128_v35 = vor.u32 %v2127_v11, %v6797_v45 }
  0x84   : > { %5755 = vmatmul.mubr.msk.bf16.gmra.mxu1 %vm669_vm3, %v8965_v3  ;;  %v2145_v46 = vshll.u32 %v6800_v61, 16  ;;  %v2149_v16 = vshrl.u32 %v6800_v61, 16  ;;  %v6834_v15 = vcombine.low %v2052_v40, %v2062_v63  ;;  %v6838_v32 = vsel %vm718_vm0, %v6532_v24, 0  ;;  %v6861_v40 = vld [vmem:[%s6135_s23 + $0x58] sm:$0xf] }
  0x85   : > { %5758 = vmatprep.mubr.msk.bf16.mxu1 %vm669_vm3, %v8966_v53  ;;  %v2160_v60 = vshrl.u32 %v5204_v8, 16  ;;  %v2163_v57 = vshll.u32 %v5204_v8, 16  ;;  %v8967_v6 = vcombine.low %v6647_v25, %v6657_v54  ;;  %v6844_v22 = vcombine.low %v2076_v52, %v2086_v58  ;;  %v6866_v8 = vld [vmem:[%s6135_s23 + $0x50] sm:$0x1] }
  0x86   : > { %v2100_v28 = vsel %vm6179_vm4, %v2095_v23, %v6785_v33  ;;  %v2110_v56 = vsel %vm6179_vm4, %v2105_v30, %v2109_v34  ;;  %v2169_v24 = vshll.u32 %v6818_v1, 16  ;;  %v8968_v25 = vcombine.low %v6661_v39, %v6671_v27  ;;  %v5210_v34 = vld [vmem:[%s6135_s23 + $0x60] sm:$0xf] }
  0x87   : > { %v2119_v54 = vrot.slane %v2118_v20, 4  ;;  %v2133_v13 = vrot.slane %v2131_v62, 5  ;;  %v2138_v11 = vrot.slane %v2136_v12, 4  ;;  %v2141_v3 = vrot.slane %v2139_v17, 5 }
  0x88   : > { %v2129_v33 = vrot.slane %v2128_v35, 4  ;;  %v6863_v63 = vrot.slane %v2145_v46, 5  ;;  %v2151_v52 = vrot.slane %v2149_v16, 4  ;;  %v2173_v53 = vshrl.u32 %v6818_v1, 16  ;;  %v6883_v35 = vld [vmem:[%s6135_s23 + $0x5c] sm:$0x1] }
  0x89   : > { %5793 = vmatmul.mubr.msk.bf16.gmra.mxu0 %vm669_vm3, %v8967_v6  ;;  %v8969_v39 = vcombine.low %v6284_v36, %v6291_v43  ;;  %v2162_v27 = vrot.slane %v2160_v60, 4  ;;  %v2165_v58 = vrot.slane %v2163_v57, 5  ;;  %v2184_v23 = vshrl.u32 %v5207_v51, 16 }
  0x8a   : > { %5796 = vmatprep.mubr.msk.bf16.mxu0 %vm669_vm3, %v8968_v25  ;;  %v2187_v30 = vshll.u32 %v5207_v51, 16  ;;  %v8970_v20 = vcombine.low %v8953_v2, %v8952_v10  ;;  %v6878_v62 = vcombine.low %v2100_v28, %v2110_v56  ;;  %v6880_v12 = vrot.slane %v2169_v24, 5  ;;  %v6896_v28 = vld [vmem:[%s6135_s23 + $0x64] sm:$0xf] }
  0x8b   : > { %v2175_v17 = vrot.slane %v2173_v53, 4  ;;  %v2193_v36 = vshll.u32 %v6861_v40, 16  ;;  %v2155_v43 = vshll.u32 %v6852_v50, 16  ;;  %v2186_v46 = vrot.slane %v2184_v23, 4 }
  0x8c   : > { %5759 = vmatmul.mubr.msk.bf16.gmra.mxu1 %vm669_vm3, %v8969_v39  ;;  %v2189_v16 = vrot.slane %v2187_v30, 5  ;;  %v2197_v60 = vshrl.u32 %v6861_v40, 16  ;;  %v2124_v10 = vsel %vm6179_vm4, %v2119_v54, %v6797_v45  ;;  %v2134_v2 = vsel %vm6179_vm4, %v2129_v33, %v2133_v13  ;;  %v6918_v30 = vld [vmem:[%s6135_s23 + $0x68] sm:$0x1] }
  0x8d   : > { %5762 = vmatprep.mubr.msk.bf16.mxu1 %vm669_vm3, %v8970_v20  ;;  %v2142_v57 = vor.u32 %v2141_v3, %v2138_v11  ;;  %v6893_v6 = vrot.slane %v2193_v36, 5  ;;  %v2152_v56 = vor.u32 %v2151_v52, %v6863_v63  ;;  %v2166_v24 = vor.u32 %v2165_v58, %v2162_v27  ;;  %v5213_v3 = vld [vmem:[%s6135_s23 + $0x6c] sm:$0xf]  ;;  %v6915_v27 = vld [vmem:[%s6135_s23 + $0x70] sm:$0xf] }
  0x8e   : > { %v2179_v51 = vshll.u32 %v6866_v8, 16  ;;  %v2199_v25 = vrot.slane %v2197_v60, 4  ;;  %v8971_v53 = vcombine.low %v6681_v19, %v6701_v9  ;;  %v2176_v45 = vor.u32 %v2175_v17, %v6880_v12 }
  0x8f   : > { %v2190_v54 = vor.u32 %v2189_v16, %v2186_v46  ;;  %v2208_v13 = vshrl.u32 %v5210_v34, 16  ;;  %v2211_v11 = vshll.u32 %v5210_v34, 16  ;;  %v8972_v33 = vcombine.low %v6693_v59, %v6717_v7  ;;  %v5216_v16 = vld [vmem:[%s6135_s23 + $0x78] sm:$0xf] }
  0x90   : > { %v2200_v52 = vor.u32 %v2199_v25, %v6893_v6  ;;  %v2203_v39 = vshll.u32 %v6883_v35, 16  ;;  %v2217_v19 = vshll.u32 %v6896_v28, 16  ;;  %v2221_v9 = vshrl.u32 %v6896_v28, 16 }
  0x91   : > { %5797 = vmatmul.mubr.msk.bf16.gmra.mxu0 %vm669_vm3, %v8971_v53  ;;  %v2143_v58 = vrot.slane %v2142_v57, 4  ;;  %v2157_v23 = vrot.slane %v2155_v43, 5  ;;  %v2210_v34 = vrot.slane %v2208_v13, 4  ;;  %v2213_v20 = vrot.slane %v2211_v11, 5 }
  0x92   : > { %5800 = vmatprep.mubr.msk.bf16.mxu0 %vm669_vm3, %v8972_v33  ;;  %v8973_v59 = vcombine.low %v8956_v26, %v8955_v38  ;;  %v6924_v7 = vcombine.low %v2124_v10, %v2134_v2  ;;  %v2153_v17 = vrot.slane %v2152_v56, 4  ;;  %v2167_v36 = vrot.slane %v2166_v24, 4  ;;  %v6934_v2 = vld [vmem:[%s6135_s23 + $0x7c] sm:$0xf] }
  0x93   : > { %v6926_v46 = vrot.slane %v2217_v19, 5  ;;  %v8974_v43 = vcombine.low %v8959_v42, %v8958_v48  ;;  %v2177_v60 = vrot.slane %v2176_v45, 4  ;;  %v2181_v57 = vrot.slane %v2179_v51, 5  ;;  %8975 = vst [vmem:[#allocation3_spill] sm:$0xff] %v6934_v2  ;;  %v5219_v19 = vld [vmem:[%s6135_s23 + $0x84] sm:$0xf] }
  0x94   : > { %5763 = vmatmul.mubr.msk.bf16.gmra.mxu1 %vm669_vm3, %v8973_v59  ;;  %v2191_v25 = vrot.slane %v2190_v54, 4  ;;  %v2223_v38 = vrot.slane %v2221_v9, 4  ;;  %v2201_v26 = vrot.slane %v2200_v52, 4  ;;  %v2205_v53 = vrot.slane %v2203_v39, 5 }
  0x95   : > { %5766 = vmatprep.mubr.msk.bf16.mxu1 %vm669_vm3, %v8974_v43  ;;  %v2214_v13 = vor.u32 %v2213_v20, %v2210_v34  ;;  %v2232_v10 = vshrl.u32 %v5213_v3, 16  ;;  %v2148_v56 = vsel %vm6179_vm4, %v2143_v58, %v6863_v63  ;;  %v2235_v24 = vshll.u32 %v5213_v3, 16  ;;  %v6045_v63 = vld [vmem:[%s6135_s23 + $0xc] sm:$0xff]   ;;  %v6968_v34 = vld [vmem:[%s6135_s23 + $0x88] sm:$0xf] }
  0x96   : > { %v2241_v48 = vshll.u32 %v6915_v27, 16  ;;  %v2245_v42 = vshrl.u32 %v6915_v27, 16  ;;  %v2158_v51 = vsel %vm6179_vm4, %v2153_v17, %v2157_v23  ;;  %v2172_v45 = vsel %vm6179_vm4, %v2167_v36, %v6880_v12  ;;  %8976 = vst [vmem:[#allocation5_spill] sm:$0xff] %v6968_v34  ;;  %v6977_v36 = vld [vmem:[%s6135_s23 + $0x74] sm:$0x1] }
  0x97   : > { %v2224_v54 = vor.u32 %v2223_v38, %v6926_v46  ;;  %v2227_v11 = vshll.u32 %v6918_v30, 16  ;;  %v2182_v3 = vsel %vm6179_vm4, %v2177_v60, %v2181_v57  ;;  %v2196_v33 = vsel %vm6179_vm4, %v2191_v25, %v6893_v6  ;;  %8978 = vst [vmem:[#allocation4_spill] sm:$0xff] %v6977_v36  ;;  %v6987_v38 = vld [vmem:[%s6135_s23 + $0x80] sm:$0x1] }
  0x98   : > { %v2256_v52 = vshrl.u32 %v5216_v16, 16  ;;  %v2259_v12 = vshll.u32 %v5216_v16, 16  ;;  %v2206_v18 = vsel %vm6179_vm4, %v2201_v26, %v2205_v53  ;;  %v2215_v4 = vrot.slane %v2214_v13, 4  ;;  %8979 = vst [vmem:[#allocation6_spill] sm:$0xff] %v6987_v38  ;;  %v6990_v26 = vld [vmem:[%s6135_s23 + $0x8c] sm:$0x1] }
  0x99   : > { %5801 = vmatmul.mubr.msk.bf16.gmra.mxu0 %vm669_vm3, %v5107_v55  ;;  %v2234_v55 = vrot.slane %v2232_v10, 4  ;;  %v2265_v39 = vshll.u32 %v6934_v2, 16  ;;  %v2237_v9 = vrot.slane %v2235_v24, 5  ;;  %v6964_v58 = vrot.slane %v2241_v48, 5  ;;  %8980 = vst [vmem:[#allocation8_spill] sm:$0xff] %v6990_v26  ;;  %v6046_v10 = vld [vmem:[%s6135_s23 + $0x18] sm:$0xff]  }
  0x9a   : > { %5840 = vmatprep.mubr.msk.bf16.mxu0 %vm669_vm3, %v6834_v15  ;;  %v2247_v23 = vrot.slane %v2245_v42, 4  ;;  %v2269_v6 = vshrl.u32 %v6934_v2, 16  ;;  %v8977_v15 = vcombine.low %v8961_v29, %v6444_v37  ;;  %v6974_v20 = vcombine.low %v2148_v56, %v2158_v51  ;;  %v5222_v51 = vld [vmem:[%s6135_s23 + $0x90] sm:$0xf] }
  0x9b   : > { %v2225_v59 = vrot.slane %v2224_v54, 4  ;;  %v2229_v17 = vrot.slane %v2227_v11, 5  ;;  %v2258_v16 = vrot.slane %v2256_v52, 4  ;;  %v2261_v43 = vrot.slane %v2259_v12, 5 }
  0x9c   : > { %5767 = vmatmul.mubr.msk.bf16.gmra.mxu1 %vm669_vm3, %v8977_v15  ;;  %v6980_v60 = vrot.slane %v2265_v39, 5  ;;  %v2271_v57 = vrot.slane %v2269_v6, 4  ;;  %v2280_v25 = vshrl.u32 %v5219_v19, 16  ;;  %v6982_v37 = vcombine.low %v2172_v45, %v2182_v3  ;;  %v7001_v45 = vld [vmem:[%s6135_s23 + $0x94] sm:$0xf] }
  0x9d   : > { %5806 = vmatprep.mubr.msk.bf16.mxu1 %vm669_vm3, %v6045_v63  ;;  %v6984_v29 = vcombine.low %v2196_v33, %v2206_v18  ;;  %v2283_v53 = vshll.u32 %v5219_v19, 16  ;;  %v2289_v13 = vshll.u32 %v6968_v34, 16  ;;  %v2220_v56 = vsel %vm6179_vm4, %v2215_v4, %v6926_v46  ;;  %8981 = vst [vmem:[#allocation7_spill] sm:$0xff] %v7001_v45  ;;  %v7009_v33 = vld [vmem:[%s8895_s1 + $0x20] sm:$0xf]  ;;  %v6047_v46 = vld [vmem:[%s6135_s23 + $0x24] sm:$0xff]  }
  0x9e   : > { %v2238_v24 = vor.u32 %v2237_v9, %v2234_v55  ;;  %v2248_v48 = vor.u32 %v2247_v23, %v6964_v58  ;;  %v2251_v42 = vshll.u32 %v6977_v36, 16  ;;  %v2282_v54 = vrot.slane %v2280_v25, 4  ;;  %8982 = vst [vmem:[#allocation9_spill] sm:$0xff] %v7009_v33 }
  0x9f   : > { %v2285_v11 = vrot.slane %v2283_v53, 5  ;;  %v7003_v63 = vrot.slane %v2289_v13, 5  ;;  %v2293_v3 = vshrl.u32 %v6968_v34, 16  ;;  %v2230_v52 = vsel %vm6179_vm4, %v2225_v59, %v2229_v17 }
  0xa0   : > { %v2262_v12 = vor.u32 %v2261_v43, %v2258_v16  ;;  %v2272_v18 = vor.u32 %v2271_v57, %v6980_v60  ;;  %v2275_v4 = vshll.u32 %v6987_v38, 16  ;;  %v2304_v19 = vshrl.u32 %v5222_v51, 16  ;;  %v7043_v57 = vld [vmem:[%s6135_s23 + $0xa0] sm:$0xf] }
  0xa1   : > { %5841 = vmatmul.mubr.msk.bf16.vlgmr.msra.gmra.mxu0 %vm669_vm3, %v6844_v22  ;;  %v2286_v55 = vor.u32 %v2285_v11, %v2282_v54  ;;  %v2295_v39 = vrot.slane %v2293_v3, 4  ;;  %v2307_v9 = vshll.u32 %v5222_v51, 16  ;;  %v5225_v22 = vld [vmem:[%s6135_s23 + $0x9c] sm:$0xf]  ;;  %v7022_v23 = vrot.slane %v2238_v24, 4  ;;  %8984 = vst [vmem:[#allocation10_spill] sm:$0xff] %v7043_v57 }
  0xa2   : > { %5907 = vmatpush3.bf16.msra.mxu0 %v6838_v32  ;;  %5844 = vmatprep.mubr.msk.bf16.mxu0 %vm669_vm3, %v6878_v62  ;;  %v7024_v6 = vrot.slane %v2251_v42, 5  ;;  %v2299_v15 = vshll.u32 %v6990_v26, 16  ;;  %v2313_v59 = vshll.u32 %v7001_v45, 16  ;;  %v7031_v32 = vld [vmem:[%s8895_s1 + $0x1c] sm:$0xf]  ;;  %v7036_v62 = vcombine.low %v2220_v56, %v2230_v52 }
  0xa3   : > { %8983 = vst [vmem:[#allocation11_spill] sm:$0xff] %v7031_v32  ;;  %6019 = vmatprep.subr.msk.bf16.mxu0 %vm718_vm0, %v7009_v33  ;;  %v7038_v17 = vrot.slane %v2248_v48, 4  ;;  %v2296_v16 = vor.u32 %v2295_v39, %v7003_v63  ;;  %v2317_v43 = vshrl.u32 %v7001_v45, 16  ;;  %v7047_v25 = vrot.slane %v2262_v12, 4  ;;  %v7056_v56 = vld [vmem:[%s6135_s23 + $0x98] sm:$0x1] }
  0xa4   : > { %5807 = vmatmul.mubr.msk.bf16.vlgmr.msra.gmra.mxu1 %vm669_vm3, %v6046_v10  ;;  %v7049_v53 = vrot.slane %v2272_v18, 4  ;;  %v7051_v13 = vrot.slane %v2275_v4, 5  ;;  %v7053_v10 = vrot.slane %v2286_v55, 4  ;;  %8985 = vst [vmem:[#allocation12_spill] sm:$0xff] %v7056_v56  ;;  %v2306_v24 = vrot.slane %v2304_v19, 4  ;;  %v6049_v19 = vld [vmem:[%s6135_s23 + $0x3c] sm:$0xff]  }
  0xa5   : > { %5873 = vmatpush3.bf16.msra.mxu1 %v6829_v14  ;;  %5810 = vmatprep.mubr.msk.bf16.mxu1 %vm669_vm3, %v6047_v46  ;;  %v2309_v48 = vrot.slane %v2307_v9, 5  ;;  %v2328_v42 = vshrl.u32 %v5225_v22, 16  ;;  %v2331_v51 = vshll.u32 %v5225_v22, 16  ;;  %v6048_v14 = vld [vmem:[%s6135_s23 + $0x30] sm:$0xff]   ;;  %v7065_v11 = vrot.slane %v2299_v15, 5 }
  0xa6   : > { %6018 = vmatprep.subr.msk.bf16.mxu1 %vm718_vm0, %v7031_v32  ;;  %v7067_v3 = vrot.slane %v2313_v59, 5  ;;  %v2337_v46 = vshll.u32 %v7043_v57, 16  ;;  %v5228_v52 = vld [vmem:[%s6135_s23 + $0xa8] sm:$0xf]  ;;  %v7071_v12 = vrot.slane %v2296_v16, 4  ;;  %v2319_v18 = vrot.slane %v2317_v43, 4 }
  0xa7   : > { %v2323_v4 = vshll.u32 %v7056_v56, 16  ;;  %v2341_v55 = vshrl.u32 %v7043_v57, 16  ;;  %v7076_v39 = vld [vmem:[%s6135_s23 + $0xac] sm:$0xf]  ;;  %v2310_v59 = vor.u32 %v2309_v48, %v2306_v24  ;;  %v7100_v16 = vld [vmem:[%s6135_s23 + $0xa4] sm:$0x1] }
  0xa8   : > { %8986 = vst [vmem:[#allocation13_spill] sm:$0xff] %v7076_v39  ;;  %8987 = vst [vmem:[#allocation2_spill] sm:$0xff] %v7100_v16  ;;  %v2330_v43 = vrot.slane %v2328_v42, 4  ;;  %v2333_v22 = vrot.slane %v2331_v51, 5  ;;  %v2352_v54 = vshrl.u32 %v5228_v52, 16  ;;  %v7102_v9 = vrot.slane %v2337_v46, 5 }
  0xa9   : > { %5845 = vmatmul.mubr.msk.bf16.gmra.mxu0 %vm669_vm3, %v6924_v7  ;;  %v2343_v32 = vrot.slane %v2341_v55, 4  ;;  %v2355_v15 = vshll.u32 %v5228_v52, 16  ;;  %v2361_v33 = vshll.u32 %v7076_v39, 16  ;;  %v5231_v57 = vld [vmem:[%s6135_s23 + $0xb4] sm:$0xf]  ;;  %v2320_v24 = vor.u32 %v2319_v18, %v7067_v3 }
  0xaa   : > { %5848 = vmatprep.mubr.msk.bf16.mxu0 %vm669_vm3, %v6974_v20  ;;  %v2302_v20 = vsel %vm6179_vm4, %v7071_v12, %v7065_v11  ;;  %v7112_v48 = vrot.slane %v2323_v4, 5  ;;  %v7115_v42 = vld [vmem:[%s6135_s23 + $0xb0] sm:$0x1]  ;;  %v2354_v51 = vrot.slane %v2352_v54, 4  ;;  %v7118_v46 = vld [vmem:[%s6135_s23 + $0xb8] sm:$0xf]  ;;  %v2334_v18 = vor.u32 %v2333_v22, %v2330_v43 }
  0xab   : > { %8988 = vst [vmem:[#allocation14_spill] sm:$0xff] %v7115_v42  ;;  %8989 = vst [vmem:[#allocation15_spill] sm:$0xff] %v7118_v46  ;;  %v2357_v52 = vrot.slane %v2355_v15, 5  ;;  %v7122_v55 = vrot.slane %v2361_v33, 5  ;;  %v2365_v11 = vshrl.u32 %v7076_v39, 16  ;;  %v7125_v12 = vrot.slane %v2310_v59, 4 }
  0xac   : > { %5811 = vmatmul.mubr.msk.bf16.gmra.mxu1 %vm669_vm3, %v6048_v14  ;;  %v2347_v14 = vshll.u32 %v7100_v16, 16  ;;  %v7128_v4 = vld [vmem:[%s6135_s23 + $0xbc] sm:$0x1]  ;;  %v2376_v54 = vshrl.u32 %v5231_v57, 16  ;;  %v2379_v7 = vshll.u32 %v5231_v57, 16  ;;  %v2344_v56 = vor.u32 %v2343_v32, %v7102_v9  ;;  %v6050_v16 = vld [vmem:[%s6135_s23 + $0x48] sm:$0xff]  }
  0xad   : > { %5814 = vmatprep.mubr.msk.bf16.mxu1 %vm669_vm3, %v6049_v19  ;;  %v2367_v45 = vrot.slane %v2365_v11, 4  ;;  %v2371_v19 = vshll.u32 %v7115_v42, 16  ;;  %v2385_v15 = vshll.u32 %v7118_v46, 16  ;;  %v5234_v33 = vld [vmem:[%s6135_s23 + $0xc0] sm:$0xf]  ;;  %v2358_v26 = vor.u32 %v2357_v52, %v2354_v51  ;;  %v6051_v57 = vld [vmem:[%s6135_s23 + $0x54] sm:$0xff]  }
  0xae   : > { %v2378_v39 = vrot.slane %v2376_v54, 4  ;;  %v2381_v34 = vrot.slane %v2379_v7, 5  ;;  %v2389_v59 = vshrl.u32 %v7118_v46, 16  ;;  %v7137_v22 = vld [vmem:[%s6135_s23 + $0xc4] sm:$0xf]  ;;  %v2321_v43 = vrot.slane %v2320_v24, 4 }
  0xaf   : > { %v2349_v32 = vrot.slane %v2347_v14, 5  ;;  %v2368_v11 = vor.u32 %v2367_v45, %v7122_v55  ;;  %v2387_v42 = vrot.slane %v2385_v15, 5  ;;  %v2395_v7 = vshll.u32 %v7128_v4, 16  ;;  %v7149_v45 = vld [vmem:[%s6135_s23 + $0xc8] sm:$0x1] }
  0xb0   : > { %v2382_v51 = vor.u32 %v2381_v34, %v2378_v39  ;;  %v2391_v52 = vrot.slane %v2389_v59, 4  ;;  %v2400_v54 = vshrl.u32 %v5234_v33, 16  ;;  %v2335_v46 = vrot.slane %v2334_v18, 4 }
  0xb1   : > { %5849 = vmatmul.mubr.msk.bf16.gmra.mxu0 %vm669_vm3, %v6982_v37  ;;  %v2345_v38 = vrot.slane %v2344_v56, 4  ;;  %v2403_v2 = vshll.u32 %v5234_v33, 16  ;;  %v2409_v37 = vshll.u32 %v7137_v22, 16  ;;  %v2359_v24 = vrot.slane %v2358_v26, 4 }
  0xb2   : > { %5852 = vmatprep.mubr.msk.bf16.mxu0 %vm669_vm3, %v6984_v29  ;;  %v2373_v14 = vrot.slane %v2371_v19, 5  ;;  %v2392_v36 = vor.u32 %v2391_v52, %v2387_v42  ;;  %v2402_v15 = vrot.slane %v2400_v54, 4  ;;  %v2369_v34 = vrot.slane %v2368_v11, 4 }
  0xb3   : > { %v2405_v29 = vrot.slane %v2403_v2, 5  ;;  %v7152_v39 = vrot.slane %v2409_v37, 5  ;;  %v2413_v56 = vshrl.u32 %v7137_v22, 16  ;;  %v8990_v26 = vsel %vm6179_vm4, %v7038_v17, %v7024_v6 }
  0xb4   : > { %5815 = vmatmul.mubr.msk.bf16.gmra.mxu1 %vm669_vm3, %v6050_v16  ;;  %v8991_v16 = vsel %vm6179_vm4, %v7022_v23, %v6964_v58  ;;  %v2383_v19 = vrot.slane %v2382_v51, 4  ;;  %v2393_v33 = vrot.slane %v2392_v36, 4  ;;  %v2397_v2 = vrot.slane %v2395_v7, 5  ;;  %v6052_v23 = vld [vmem:[%s6135_s23 + $0x60] sm:$0xff]  }
  0xb5   : > { %5818 = vmatprep.mubr.msk.bf16.mxu1 %vm669_vm3, %v6051_v57  ;;  %v5246_v18 = vcombine.low %v8991_v16, %v8990_v26  ;;  %v8992_v59 = vsel %vm6179_vm4, %v7049_v53, %v7051_v13  ;;  %v8993_v6 = vsel %vm6179_vm4, %v7047_v25, %v6980_v60  ;;  %v2406_v57 = vor.u32 %v2405_v29, %v2402_v15  ;;  %v5272_v13 = vld [vmem:[%s6135_s23 + $0x24] sm:$0xe]  ;;  %v5275_v26 = vld [vmem:[%s6135_s23 + $0x48] sm:$0xe] }
  0xb6   : > { %v5247_v17 = vcombine.low %v8993_v6, %v8992_v59  ;;  %v2415_v11 = vrot.slane %v2413_v56, 4  ;;  %v2419_v58 = vshll.u32 %v7149_v45, 16  ;;  %v8994_v36 = vsel %vm6179_vm4, %v7053_v10, %v7003_v63  ;;  %v6053_v63 = vld [vmem:[%s6135_s23 + $0x6c] sm:$0xff]   ;;  %v5276_v6 = vld [vmem:[%s6135_s23 + $0x54] sm:$0xe] }
  0xb7   : > { %v5248_v51 = vcombine.low %v8994_v36, %v2302_v20  ;;  %v2316_v53 = vsel %vm6179_vm4, %v7125_v12, %v7067_v3  ;;  %v2326_v60 = vsel %vm6179_vm4, %v2321_v43, %v7112_v48  ;;  %v2340_v25 = vsel %vm6179_vm4, %v2335_v46, %v7102_v9  ;;  %v7205_v12 = vld [vmem:[%s6135_s23 + $0xc] sm:$0xe] }
  0xb8   : > { %v2350_v10 = vsel %vm6179_vm4, %v2345_v38, %v2349_v32  ;;  %v2364_v3 = vsel %vm6179_vm4, %v2359_v24, %v7122_v55  ;;  %v2374_v20 = vsel %vm6179_vm4, %v2369_v34, %v2373_v14  ;;  %v2416_v48 = vor.u32 %v2415_v11, %v7152_v39  ;;  %v5273_v55 = vld [vmem:[%s6135_s23 + $0x30] sm:$0xe]  ;;  %v5274_v14 = vld [vmem:[%s6135_s23 + $0x3c] sm:$0xe] }
  0xb9   : > { %5853 = vmatmul.mubr.msk.bf16.gmra.mxu0 %vm669_vm3, %v7036_v62  ;;  %v2388_v62 = vsel %vm6179_vm4, %v2383_v19, %v2387_v42  ;;  %v2398_v38 = vsel %vm6179_vm4, %v2393_v33, %v2397_v2  ;;  %v7212_v9 = vrot.slane %v2406_v57, 4  ;;  %v2783_v46 = vrot.slane %v6696_v49, 5  ;;  %v6054_v57 = vld [vmem:[%s6135_s23 + $0x78] sm:$0xff]  }
  0xba   : > { %5856 = vmatprep.mubr.msk.bf16.mxu0 %vm669_vm3, %v5246_v18  ;;  %v7216_v43 = vcombine.low %v2316_v53, %v2326_v60  ;;  %v7218_v32 = vrot.slane %v2416_v48, 4  ;;  %v7220_v52 = vrot.slane %v2419_v58, 5  ;;  %v5288_v7 = vrot.slane %v5272_v13, 9  ;;  %v6055_v53 = vld [vmem:[%s6135_s23 + $0x84] sm:$0xff]   ;;  %v5277_v13 = vld [vmem:[%s6135_s23 + $0x60] sm:$0xe] }
  0xbb   : > { %v7223_v54 = vcombine.low %v2340_v25, %v2350_v10  ;;  %v7225_v42 = vcombine.low %v2364_v3, %v2374_v20  ;;  %v5286_v37 = vrot.slane %v7205_v12, 9  ;;  %v2797_v24 = vrot.slane %v6745_v44, 5  ;;  %v6061_v49 = vld [vmem:[%s6135_s23 + $0x18] sm:$0xff]  }
  0xbc   : > { %5819 = vmatmul.mubr.msk.bf16.gmra.mxu1 %vm669_vm3, %v6052_v23  ;;  %v7231_v15 = vcombine.low %v2388_v62, %v2398_v38  ;;  %v2786_v34 = vrot.slane %v6732_v47, 5  ;;  %v2800_v29 = vrot.slane %v6760_v21, 5  ;;  %v5289_v56 = vrot.slane %v5273_v55, 9  ;;  %v5279_v55 = vld [vmem:[%s6135_s23 + $0x78] sm:$0xe] }
  0xbd   : > { %5822 = vmatprep.mubr.msk.bf16.mxu1 %vm669_vm3, %v6053_v63  ;;  %v2412_v16 = vsel %vm6179_vm4, %v7212_v9, %v7152_v39  ;;  %v7242_v44 = vrot.slane %v2783_v46, 4  ;;  %v7246_v18 = vsel %vm6465_vm7, %v5288_v7, %v2797_v24  ;;  %v2799_v19 = vrot.slane %v2797_v24, 4 }
  0xbe   : > { %v2422_v21 = vsel %vm6179_vm4, %v7218_v32, %v7220_v52  ;;  %v2804_v33 = vrot.slane %v6783_v5, 5  ;;  %v2807_v2 = vrot.slane %v6791_v41, 5  ;;  %v5290_v59 = vrot.slane %v5274_v14, 9  ;;  %v6060_v52 = vld [vmem:[%s6135_s23 + $0xc0] sm:$0xff]  }
  0xbf   : > { %v7258_v11 = vsel %vm6465_vm7, %v2799_v19, %v2800_v29  ;;  %v2811_v58 = vrot.slane %v6800_v61, 5  ;;  %v2814_v23 = vrot.slane %v6852_v50, 5  ;;  %v5291_v36 = vrot.slane %v5275_v26, 9  ;;  %v5280_v19 = vld [vmem:[%s6135_s23 + $0x84] sm:$0xe] }
  0xc0   : > { %v5305_v5 = vcombine.low %v7246_v18, %v7258_v11  ;;  %v7268_v41 = vsel %vm6465_vm7, %v5289_v56, %v2804_v33  ;;  %v2806_v60 = vrot.slane %v2804_v33, 4  ;;  %v2818_v25 = vrot.slane %v6818_v1, 5 }
  0xc1   : > { %5857 = vmatmul.mubr.msk.bf16.gmra.mxu0 %vm669_vm3, %v5247_v17  ;;  %v7275_v61 = vsel %vm6465_vm7, %v5290_v59, %v2811_v58  ;;  %v2813_v50 = vrot.slane %v2811_v58, 4  ;;  %v2821_v17 = vrot.slane %v6866_v8, 5  ;;  %v5292_v63 = vrot.slane %v5276_v6, 9  ;;  %v8995_v59 = vld [vmem:[#allocation4_spill] sm:$0xff] }
  0xc2   : > { %5860 = vmatprep.mubr.msk.bf16.mxu0 %vm669_vm3, %v5248_v51  ;;  %v7280_v10 = vsel %vm6465_vm7, %v2806_v60, %v2807_v2  ;;  %v7284_v3 = vsel %vm6465_vm7, %v5291_v36, %v2818_v25  ;;  %v2820_v1 = vrot.slane %v2818_v25, 4  ;;  %v2825_v20 = vrot.slane %v6861_v40, 5  ;;  %v5278_v51 = vld [vmem:[%s6135_s23 + $0x6c] sm:$0xe]  ;;  %v6056_v58 = vld [vmem:[%s6135_s23 + $0x90] sm:$0xff]  }
  0xc3   : > { %v5306_v48 = vcombine.low %v7268_v41, %v7280_v10  ;;  %v7293_v8 = vsel %vm6465_vm7, %v2813_v50, %v2814_v23  ;;  %v2828_v62 = vrot.slane %v6883_v35, 5  ;;  %v5293_v38 = vrot.slane %v5277_v13, 9  ;;  %v8996_v36 = vld [vmem:[#allocation3_spill] sm:$0xff]  ;;  %v5281_v60 = vld [vmem:[%s6135_s23 + $0x90] sm:$0xe]  ;;  %v8997_v50 = vld [vmem:[#allocation6_spill] sm:$0xff] }
  0xc4   : > { %5823 = vmatmul.mubr.msk.bf16.gmra.mxu1 %vm669_vm3, %v6054_v57  ;;  %v5307_v40 = vcombine.low %v7275_v61, %v7293_v8  ;;  %v7302_v7 = vsel %vm6465_vm7, %v2820_v1, %v2821_v17  ;;  %v7306_v24 = vsel %vm6465_vm7, %v5292_v63, %v2825_v20  ;;  %v2827_v14 = vrot.slane %v2825_v20, 4 }
  0xc5   : > { %5826 = vmatprep.mubr.msk.bf16.mxu1 %vm669_vm3, %v6055_v53  ;;  %v5308_v35 = vcombine.low %v7284_v3, %v7302_v7  ;;  %v2832_v29 = vrot.slane %v6896_v28, 5  ;;  %v2835_v56 = vrot.slane %v6918_v30, 5  ;;  %v5294_v26 = vrot.slane %v5278_v51, 9  ;;  %v8998_v51 = vld [vmem:[#allocation5_spill] sm:$0xff]  ;;  %v5412_v3 = vld [vmem:[%s6135_s23 + $0x48] sm:$0xf] }
  0xc6   : > { %v7315_v33 = vsel %vm6465_vm7, %v2827_v14, %v2828_v62  ;;  %v2839_v2 = vrot.slane %v6915_v27, 5  ;;  %v2842_v6 = vrot.slane %v8995_v59, 5  ;;  %v5295_v57 = vrot.slane %v5279_v55, 9  ;;  %v6057_v27 = vld [vmem:[%s6135_s23 + $0x9c] sm:$0xff]   ;;  %v9006_v55 = vld [vmem:[#allocation15_spill] sm:$0xff] }
  0xc7   : > { %v5309_v23 = vcombine.low %v7306_v24, %v7315_v33  ;;  %v7324_v28 = vsel %vm6465_vm7, %v5293_v38, %v2832_v29  ;;  %v2834_v30 = vrot.slane %v2832_v29, 4  ;;  %v2846_v53 = vrot.slane %v8996_v36, 5  ;;  %v5282_v38 = vld [vmem:[%s6135_s23 + $0x9c] sm:$0xe]  ;;  %v9001_v36 = vld [vmem:[#allocation12_spill] sm:$0xff] }
  0xc8   : > { %v7333_v25 = vsel %vm6465_vm7, %v5294_v26, %v2839_v2  ;;  %v2841_v13 = vrot.slane %v2839_v2, 4  ;;  %v2849_v17 = vrot.slane %v8997_v50, 5  ;;  %v5296_v63 = vrot.slane %v5280_v19, 9  ;;  %v5283_v26 = vld [vmem:[%s6135_s23 + $0xa8] sm:$0xe] }
  0xc9   : > { %5861 = vmatmul.mubr.msk.bf16.gmra.mxu0 %vm669_vm3, %v7216_v43  ;;  %v7340_v1 = vsel %vm6465_vm7, %v2834_v30, %v2835_v56  ;;  %v7344_v43 = vsel %vm6465_vm7, %v5295_v57, %v2846_v53  ;;  %v2848_v20 = vrot.slane %v2846_v53, 4  ;;  %v2853_v62 = vrot.slane %v8998_v51, 5  ;;  %v5285_v57 = vld [vmem:[%s6135_s23 + $0xc0] sm:$0xe]  ;;  %v6058_v19 = vld [vmem:[%s6135_s23 + $0xa8] sm:$0xff]  }
  0xca   : > { %5864 = vmatprep.mubr.msk.bf16.mxu0 %vm669_vm3, %v7223_v54  ;;  %v7352_v14 = vsel %vm6465_vm7, %v2841_v13, %v2842_v6  ;;  %v8999_v54 = vld [vmem:[#allocation8_spill] sm:$0xff]  ;;  %v5297_v56 = vrot.slane %v5281_v60, 9  ;;  %v2863_v53 = vrot.slane %v9001_v36, 5  ;;  %v5298_v60 = vrot.slane %v5282_v38, 9  ;;  %v9004_v38 = vld [vmem:[#allocation13_spill] sm:$0xff] }
  0xcb   : > { %v2856_v29 = vrot.slane %v8999_v54, 5  ;;  %v7361_v2 = vsel %vm6465_vm7, %v2848_v20, %v2849_v17  ;;  %v7365_v59 = vsel %vm6465_vm7, %v5296_v63, %v2853_v62  ;;  %v2855_v6 = vrot.slane %v2853_v62, 4  ;;  %v5284_v13 = vld [vmem:[%s6135_s23 + $0xb4] sm:$0xe]  ;;  %v9002_v17 = vld [vmem:[#allocation10_spill] sm:$0xff] }
  0xcc   : > { %5827 = vmatmul.mubr.msk.bf16.gmra.mxu1 %vm669_vm3, %v6056_v58  ;;  %v9000_v58 = vld [vmem:[#allocation7_spill] sm:$0xff]  ;;  %v2867_v63 = vrot.slane %v9002_v17, 5  ;;  %v9003_v20 = vld [vmem:[#allocation2_spill] sm:$0xff]  ;;  %v5299_v62 = vrot.slane %v5283_v26, 9  ;;  %v2874_v36 = vrot.slane %v9004_v38, 5  ;;  %v5300_v26 = vrot.slane %v5284_v13, 9 }
  0xcd   : > { %5830 = vmatprep.mubr.msk.bf16.mxu1 %vm669_vm3, %v6057_v27  ;;  %v2860_v30 = vrot.slane %v9000_v58, 5  ;;  %v7375_v50 = vsel %vm6465_vm7, %v2855_v6, %v2856_v29  ;;  %v2870_v51 = vrot.slane %v9003_v20, 5  ;;  %v9005_v17 = vld [vmem:[#allocation14_spill] sm:$0xff]  ;;  %v6059_v27 = vld [vmem:[%s6135_s23 + $0xb4] sm:$0xff]   ;;  %v2787_v39 = vsel %vm6465_vm7, %v7242_v44, %v2786_v34  ;;  %v7592_v7 = vld [vmem:[%s6135_s23 + $0x4c] sm:$0xf] }
  0xce   : > { %v7390_v29 = vsel %vm6465_vm7, %v5298_v60, %v2867_v63  ;;  %v2869_v6 = vrot.slane %v2867_v63, 4  ;;  %v2877_v20 = vrot.slane %v9005_v17, 5  ;;  %v2876_v38 = vrot.slane %v2874_v36, 4  ;;  %v6078_v44 = vld [vmem:[%s6135_s23 + $0x20] sm:$0x1] }
  0xcf   : > { %v7383_v54 = vsel %vm6465_vm7, %v5297_v56, %v2860_v30  ;;  %v2862_v58 = vrot.slane %v2860_v30, 4  ;;  %v7402_v30 = vsel %vm6465_vm7, %v5299_v62, %v2874_v36  ;;  %v2881_v60 = vrot.slane %v9006_v55, 5 }
  0xd0   : > { %v5301_v63 = vrot.slane %v5285_v57, 9  ;;  %v7418_v55 = vsel %vm6465_vm7, %v2876_v38, %v2877_v20  ;;  %v2888_v57 = vrot.slane %v7137_v22, 5  ;;  %v2784_v22 = vsel %vm6465_vm7, %v5286_v37, %v2783_v46  ;;  %v6063_v38 = vld [vmem:[%s6135_s23 + $0x30] sm:$0xff]  }
  0xd1   : > { %5865 = vmatmul.mubr.msk.bf16.gmra.mxu0 %vm669_vm3, %v7225_v42  ;;  %v7398_v56 = vsel %vm6465_vm7, %v2862_v58, %v2863_v53  ;;  %v7411_v42 = vsel %vm6465_vm7, %v2869_v6, %v2870_v51  ;;  %v2884_v53 = vrot.slane %v7128_v4, 5  ;;  %v2883_v58 = vrot.slane %v2881_v60, 4 }
  0xd2   : > { %5868 = vmatprep.mubr.msk.bf16.mxu0 %vm669_vm3, %v7231_v15  ;;  %v7422_v15 = vsel %vm6465_vm7, %v5300_v26, %v2881_v60  ;;  %v2891_v51 = vrot.slane %v7149_v45, 5  ;;  %v5271_v45 = vld [vmem:[%s6135_s23 + $0x18] sm:$0xe]  ;;  %v7462_v9 = vsel %vm6465_vm7, %v5301_v63, %v2888_v57  ;;  %v2890_v46 = vrot.slane %v2888_v57, 4  ;;  %v6062_v26 = vld [vmem:[%s6135_s23 + $0x24] sm:$0xff]  }
  0xd3   : > { %v7450_v32 = vsel %vm6465_vm7, %v2883_v58, %v2884_v53  ;;  %v5287_v37 = vrot.slane %v5271_v45, 9  ;;  %v5303_v34 = vcombine.low %v2784_v22, %v2787_v39  ;;  %v9007_v60 = vld [vmem:[#allocation9_spill] sm:$0xff] }
  0xd4   : > { %5831 = vmatmul.mubr.msk.bf16.gmra.mxu1 %vm669_vm3, %v6058_v19  ;;  %v5253_v19 = vcombine.low %v2412_v16, %v2422_v21  ;;  %v7467_v47 = vsel %vm6465_vm7, %v2890_v46, %v2891_v51  ;;  %v2793_v21 = vrot.slane %v6078_v44, 5  ;;  %v4547_v53 = vsel %vm718_vm0, %v9007_v60, 0  ;;  %v5400_v63 = vld [vmem:[%s6135_s23 + $0x18] sm:$0xf]  ;;  %v5401_v57 = vld [vmem:[%s6135_s23 + $0x1c] sm:$0xf] }
  0xd5   : > { %5834 = vmatprep.mubr.msk.bf16.mxu1 %vm669_vm3, %v6059_v27  ;;  %v6077_v27 = vld [vmem:[%s6135_s23 + $0x1c] sm:$0xf]  ;;  %v5403_v51 = vld [vmem:[%s6135_s23 + $0x24] sm:$0xf]  ;;  %v3595_v45 = vshrl.u32 %v5400_v63, 16  ;;  %v3604_v39 = vshll.u32 %v5401_v57, 16 }
  0xd6   : > { %v2790_v36 = vrot.slane %v6077_v27, 5  ;;  %v3598_v27 = vshll.u32 %v5400_v63, 16  ;;  %v3619_v46 = vshrl.u32 %v5403_v51, 16  ;;  %v6065_v44 = vld [vmem:[%s6135_s23 + $0x48] sm:$0xff]   ;;  %v5481_v60 = vld [vmem:[%s6135_s23 + $0x18] sm:$0xe] }
  0xd7   : > { %v7508_v63 = vld [vmem:[%s6135_s23 + $0x2c] sm:$0x1] }
  0xd8   : > { %v2792_v16 = vrot.slane %v2790_v36, 4  ;;  %v2791_v17 = vsel %vm6465_vm7, %v5287_v37, %v2790_v36  ;;  %v7492_v36 = vld [vmem:[%s6135_s23 + $0x28] sm:$0xf]  ;;  %v6064_v37 = vld [vmem:[%s6135_s23 + $0x3c] sm:$0xff]   ;;  %v3621_v18 = vrot.slane %v3619_v46, 4 }
  0xd9   : > { %5869 = vmatmul.mubr.msk.bf16.gmra.mxu0 %vm669_vm3, %v5253_v19  ;;  %v9008_v19 = vld [vmem:[#allocation11_spill] sm:$0xff] }
  0xda   : > { %5908 = vmatprep.mubr.msk.bf16.mxu0 %vm669_vm3, %v6061_v49  ;;  %v2794_v20 = vsel %vm6465_vm7, %v2792_v16, %v2793_v21  ;;  %v4077_v22 = vsel %vm718_vm0, %v9008_v19, 0  ;;  %v3608_v49 = vshrl.u32 %v5401_v57, 16  ;;  %v3632_v16 = vshrl.u32 %v7492_v36, 16  ;;  %v5402_v21 = vld [vmem:[%s6135_s23 + $0x20] sm:$0x1] }
  0xdb   : > { %v5304_v58 = vcombine.low %v2791_v17, %v2794_v20  ;;  %v3597_v17 = vrot.slane %v3595_v45, 4  ;;  %v3600_v20 = vrot.slane %v3598_v27, 5  ;;  %v5406_v19 = vld [vmem:[%s6135_s23 + $0x30] sm:$0xf]  ;;  %v3614_v45 = vshll.u32 %v5402_v21, 16 }
  0xdc   : > { %5835 = vmatmul.mubr.msk.bf16.gmra.mxu1 %vm669_vm3, %v6060_v52  ;;  %v3622_v52 = vshll.u32 %v5403_v51, 16  ;;  %v3634_v51 = vrot.slane %v3632_v16, 4  ;;  %v5497_v27 = vrot.slane %v5481_v60, 9  ;;  %v4341_v46 = vrot.slane %v5402_v21, 5  ;;  %v5482_v16 = vld [vmem:[%s6135_s23 + $0x24] sm:$0xe] }
  0xdd   : > { %5874 = vmatprep.mubr.msk.bf16.mxu1 %vm669_vm3, %v5303_v34  ;;  %v3628_v34 = vshll.u32 %v7492_v36, 16  ;;  %v6066_v21 = vld [vmem:[%s6135_s23 + $0x54] sm:$0xff]   ;;  %v3646_v10 = vshll.u32 %v5406_v19, 16  ;;  %v6067_v60 = vld [vmem:[%s6135_s23 + $0x60] sm:$0xff]  }
  0xde   : > { %v3624_v11 = vrot.slane %v3622_v52, 5  ;;  %v3638_v52 = vshll.u32 %v7508_v63, 16 }
  0xe1   : > { %5909 = vmatmul.mubr.msk.bf16.vlgmr.msra.gmra.mxu0 %vm669_vm3, %v6062_v26  ;;  %v7504_v26 = vrot.slane %v3604_v39, 5 }
  0xe2   : > { %5975 = vmatpush3.bf16.msra.mxu0 %v4547_v53  ;;  %5912 = vmatprep.mubr.msk.bf16.mxu0 %vm669_vm3, %v6063_v38  ;;  %v3610_v38 = vrot.slane %v3608_v49, 4  ;;  %v4338_v53 = vrot.slane %v5401_v57, 5  ;;  %v7518_v57 = vld [vmem:[%s6135_s23 + $0x34] sm:$0xf] }
  0xe4   : > { %5875 = vmatmul.mubr.msk.bf16.vlgmr.msra.gmra.mxu1 %vm669_vm3, %v5304_v58  ;;  %v7513_v58 = vrot.slane %v3628_v34, 5  ;;  %v3611_v39 = vor.u32 %v3610_v38, %v7504_v26  ;;  %v4340_v49 = vrot.slane %v4338_v53, 4  ;;  %v3625_v34 = vor.u32 %v3624_v11, %v3621_v18 }
  0xe5   : > { %5941 = vmatpush3.bf16.msra.mxu1 %v4077_v22  ;;  %5878 = vmatprep.mubr.msk.bf16.mxu1 %vm669_vm3, %v5305_v5  ;;  %v7511_v5 = vpop.f32.mrf.mxu0  ;;  %v3601_v22 = vor.u32 %v3600_v20, %v3597_v17  ;;  %v3643_v17 = vshrl.u32 %v5406_v19, 16  ;;  %v3656_v38 = vshrl.u32 %v7518_v57, 16  ;;  %v7543_v61 = vsel %vm6465_vm7, %v5497_v27, %v4338_v53  ;;  %v5409_v19 = vld [vmem:[%s6135_s23 + $0x3c] sm:$0xf] }
  0xe6   : > { %v3635_v41 = vor.u32 %v3634_v51, %v7513_v58  ;;  %v3612_v8 = vrot.slane %v3611_v39, 4  ;;  %v3640_v11 = vrot.slane %v3638_v52, 5  ;;  %v5498_v51 = vrot.slane %v5482_v16, 9  ;;  %v7557_v39 = vld [vmem:[%s6135_s23 + $0x38] sm:$0x1] }
  0xe7   : > { %v7535_v20 = vpop.f32.mrf.mxu0  ;;  %v3602_v18 = vrot.slane %v3601_v22, 4  ;;  %v3626_v12 = vrot.slane %v3625_v34, 4  ;;  %v4348_v22 = vrot.slane %v7508_v63, 5  ;;  %v3658_v52 = vrot.slane %v3656_v38, 4 }
  0xe8   : > { %v3636_v27 = vrot.slane %v3635_v41, 4  ;;  %v3667_v34 = vshrl.u32 %v5409_v19, 16  ;;  %v3670_v16 = vshll.u32 %v5409_v19, 16  ;;  %v7570_v41 = vld [vmem:[%s6135_s23 + $0x40] sm:$0xf] }
  0xe9   : > { %5913 = vmatmul.mubr.msk.bf16.gmra.mxu0 %vm669_vm3, %v6064_v37  ;;  %v7554_v53 = vpop.f32.mrf.mxu0  ;;  %v3607_v63 = vsel %vm6179_vm4, %v3602_v18, %v7504_v26  ;;  %v3631_v26 = vsel %vm6179_vm4, %v3626_v12, %v7513_v58  ;;  %v5483_v18 = vld [vmem:[%s6135_s23 + $0x30] sm:$0xe]  ;;  %v3676_v24 = vshll.u32 %v7570_v41, 16  ;;  %v3680_v33 = vshrl.u32 %v7570_v41, 16 }
  0xea   : > { %5916 = vmatprep.mubr.msk.bf16.mxu0 %vm669_vm3, %v6065_v44  ;;  %v7526_v37 = vpop.f32.mrf.mxu1  ;;  %v4345_v44 = vrot.slane %v7492_v36, 5  ;;  %v3616_v36 = vrot.slane %v3614_v45, 5  ;;  %v3645_v45 = vrot.slane %v3643_v17, 4  ;;  %v3641_v58 = vsel %vm6179_vm4, %v3636_v27, %v3640_v11 }
  0xeb   : > { %9009 = vst [vmem:[#allocation4_spill] sm:$0xff] %v7526_v37  ;;  %v7599_v12 = vpop.f32.mrf.mxu0  ;;  %v3672_v19 = vrot.slane %v3670_v16, 5  ;;  %v3704_v11 = vshrl.u32 %v7592_v7, 16 }
  0xec   : > { %5879 = vmatmul.mubr.msk.bf16.gmra.mxu1 %vm669_vm3, %v5306_v48  ;;  %v3652_v48 = vshll.u32 %v7518_v57, 16  ;;  %v7550_v6 = vpop.f32.mrf.mxu1  ;;  %v4347_v4 = vrot.slane %v4345_v44, 4  ;;  %v3617_v17 = vsel %vm6179_vm4, %v3612_v8, %v3616_v36  ;;  %v4352_v36 = vrot.slane %v7518_v57, 5  ;;  %v6069_v8 = vld [vmem:[%s6135_s23 + $0x78] sm:$0xff]  }
  0xed   : > { %5882 = vmatprep.mubr.msk.bf16.mxu1 %vm669_vm3, %v5307_v40  ;;  %v7547_v40 = vsel %vm6465_vm7, %v4340_v49, %v4341_v46  ;;  %9010 = vst [vmem:[#allocation3_spill] sm:$0xff] %v7550_v6  ;;  %v3648_v49 = vrot.slane %v3646_v10, 5  ;;  %v7613_v27 = vcombine.low %v3607_v63, %v3617_v17  ;;  %v7615_v57 = vcombine.low %v3631_v26, %v3641_v58  ;;  %v7629_v17 = vld [vmem:[%s6135_s23 + $0x58] sm:$0xf]  ;;  %v7635_v58 = vld [vmem:[%s6135_s23 + $0x44] sm:$0x1] }
  0xee   : > { %v7559_v46 = vrot.slane %v3652_v48, 5  ;;  %v7576_v10 = vpop.f32.mrf.mxu1  ;;  %v7583_v48 = vsel %vm6465_vm7, %v5498_v51, %v4345_v44  ;;  %v7587_v38 = vsel %vm6465_vm7, %v4347_v4, %v4348_v22  ;;  %v3669_v51 = vrot.slane %v3667_v34, 4  ;;  %v5415_v34 = vld [vmem:[%s6135_s23 + $0x54] sm:$0xf] }
  0xef   : > { %9011 = vst [vmem:[#allocation6_spill] sm:$0xff] %v7576_v10  ;;  %v3649_v44 = vor.u32 %v3648_v49, %v3645_v45  ;;  %v3694_v22 = vshll.u32 %v5412_v3, 16  ;;  %v4354_v13 = vrot.slane %v4352_v36, 4  ;;  %v4355_v63 = vrot.slane %v7557_v39, 5  ;;  %v5484_v49 = vld [vmem:[%s6135_s23 + $0x3c] sm:$0xe] }
  0xf0   : > { %v3659_v4 = vor.u32 %v3658_v52, %v7559_v46  ;;  %v7611_v45 = vpop.f32.mrf.mxu1  ;;  %v5499_v52 = vrot.slane %v5483_v18, 9  ;;  %v3673_v18 = vor.u32 %v3672_v19, %v3669_v51  ;;  %v9014_v6 = vcombine.low %v7324_v28, %v7340_v1 }
  0xf1   : > { %5917 = vmatmul.mubr.msk.bf16.gmra.mxu0 %vm669_vm3, %v6066_v21  ;;  %v3700_v21 = vshll.u32 %v7592_v7, 16  ;;  %9012 = vst [vmem:[#allocation5_spill] sm:$0xff] %v7611_v45  ;;  %v3696_v45 = vrot.slane %v3694_v22, 5  ;;  %v3715_v51 = vshrl.u32 %v5415_v34, 16  ;;  %v3718_v19 = vshll.u32 %v5415_v34, 16 }
  0xf2   : > { %5920 = vmatprep.mubr.msk.bf16.mxu0 %vm669_vm3, %v6067_v60  ;;  %v3662_v60 = vshll.u32 %v7557_v39, 16  ;;  %v7632_v26 = vrot.slane %v3659_v4, 4  ;;  %v3706_v39 = vrot.slane %v3704_v11, 4  ;;  %v7670_v22 = vsel %vm6465_vm7, %v4354_v13, %v4355_v63 }
  0xf3   : > { %v7640_v10 = vrot.slane %v3700_v21, 5  ;;  %v9016_v21 = vcombine.low %v7333_v25, %v7352_v14  ;;  %v4359_v25 = vrot.slane %v7570_v41, 5  ;;  %v6071_v14 = vld [vmem:[%s6135_s23 + $0x90] sm:$0xff]   ;;  %v5500_v1 = vrot.slane %v5484_v49, 9  ;;  %v5418_v41 = vld [vmem:[%s6135_s23 + $0x60] sm:$0xf] }
  0xf4   : > { %5883 = vmatmul.mubr.msk.bf16.gmra.mxu1 %vm669_vm3, %v5308_v35  ;;  %v6068_v35 = vld [vmem:[%s6135_s23 + $0x6c] sm:$0xff]   ;;  %v7625_v62 = vrot.slane %v3662_v60, 5  ;;  %v3717_v37 = vrot.slane %v3715_v51, 4 }
  0xf5   : > { %5886 = vmatprep.mubr.msk.bf16.mxu1 %vm669_vm3, %v5309_v23  ;;  %v3691_v23 = vshrl.u32 %v5412_v3, 16  ;;  %v7623_v3 = vrot.slane %v3649_v44, 4  ;;  %v3682_v44 = vrot.slane %v3680_v33, 4  ;;  %v3728_v33 = vshrl.u32 %v7629_v17, 16 }
  0xf6   : > { %v7621_v16 = vpop.f32.mrf.mxu0  ;;  %v3707_v13 = vor.u32 %v3706_v39, %v7640_v10  ;;  %v4366_v39 = vrot.slane %v7592_v7, 5  ;;  %v9020_v7 = vcombine.low %v7344_v43, %v7361_v2  ;;  %v9022_v43 = vcombine.low %v7365_v59, %v7375_v50  ;;  %v6072_v2 = vld [vmem:[%s6135_s23 + $0x9c] sm:$0xff]  }
  0xf7   : > { %9013 = vst [vmem:[#allocation8_spill] sm:$0xff] %v7621_v16  ;;  %v3693_v60 = vrot.slane %v3691_v23, 4  ;;  %v6070_v23 = vld [vmem:[%s6135_s23 + $0x84] sm:$0xff]   ;;  %v7697_v16 = vld [vmem:[%s6135_s23 + $0x5c] sm:$0x1]  ;;  %v4373_v59 = vrot.slane %v7629_v17, 5 }
  0xf8   : > { %v7658_v28 = vpop.f32.mrf.mxu0 }
  0xf9   : > { %5921 = vmatmul.mubr.msk.bf16.gmra.mxu0 %vm669_vm3, %v6068_v35  ;;  %v7637_v35 = vrot.slane %v3676_v24, 5  ;;  %v3724_v24 = vshll.u32 %v7629_v17, 16  ;;  %9017 = vst [vmem:[#allocation12_spill] sm:$0xff] %v7658_v28  ;;  %v3720_v28 = vrot.slane %v3718_v19, 5 }
  0xfa   : > { %5924 = vmatprep.mubr.msk.bf16.mxu0 %vm669_vm3, %v6069_v8  ;;  %v7646_v4 = vpop.f32.mrf.mxu1  ;;  %v7649_v8 = vld [vmem:[%s6135_s23 + $0x50] sm:$0x1]  ;;  %v7690_v49 = vpop.f32.mrf.mxu0 }
  0xfb   : > { %9015 = vst [vmem:[#allocation7_spill] sm:$0xff] %v7646_v4  ;;  %v3683_v34 = vor.u32 %v3682_v44, %v7637_v35  ;;  %v7680_v4 = vrot.slane %v3673_v18, 4  ;;  %v7687_v11 = vrot.slane %v3724_v24, 5  ;;  %v3730_v44 = vrot.slane %v3728_v33, 4  ;;  %9019 = vst [vmem:[#allocation2_spill] sm:$0xff] %v7690_v49 }
  0xfc   : > { %5887 = vmatmul.mubr.msk.bf16.gmra.mxu1 %vm669_vm3, %v9014_v6  ;;  %v7666_v6 = vsel %vm6465_vm7, %v5499_v52, %v4352_v36  ;;  %v3697_v36 = vor.u32 %v3696_v45, %v3693_v60  ;;  %v3710_v52 = vshll.u32 %v7649_v8, 16  ;;  %v7685_v63 = vpop.f32.mrf.mxu1  ;;  %v4361_v18 = vrot.slane %v4359_v25, 4  ;;  %v5485_v24 = vld [vmem:[%s6135_s23 + $0x48] sm:$0xe] }
  0xfd   : > { %5890 = vmatprep.mubr.msk.bf16.mxu1 %vm669_vm3, %v9016_v21  ;;  %v3686_v21 = vshll.u32 %v7635_v58, 16  ;;  %9018 = vst [vmem:[#allocation10_spill] sm:$0xff] %v7685_v63  ;;  %v4362_v60 = vrot.slane %v7635_v58, 5  ;;  %v3684_v51 = vrot.slane %v3683_v34, 4  ;;  %v3739_v33 = vshrl.u32 %v5418_v41, 16 }
  0xfe   : > { %v7703_v63 = vsel %vm6465_vm7, %v5500_v1, %v4359_v25  ;;  %v3698_v45 = vrot.slane %v3697_v36, 4  ;;  %v3708_v49 = vrot.slane %v3707_v13, 4  ;;  %v3712_v58 = vrot.slane %v3710_v52, 5  ;;  %v7718_v36 = vld [vmem:[%s6135_s23 + $0x64] sm:$0xf]  ;;  %v7725_v13 = vpop.f32.mrf.mxu0 }
  0xff   : > { %v3688_v19 = vrot.slane %v3686_v21, 5  ;;  %v3679_v34 = vsel %vm6179_vm4, %v7680_v4, %v7637_v35  ;;  %v3721_v21 = vor.u32 %v3720_v28, %v3717_v37  ;;  %v3731_v1 = vor.u32 %v3730_v44, %v7687_v11  ;;  %9023 = vst [vmem:[#allocation14_spill] sm:$0xff] %v7725_v13  ;;  %v5486_v28 = vld [vmem:[%s6135_s23 + $0x54] sm:$0xe]  ;;  %v6076_v13 = vld [vmem:[%s6135_s23 + $0xcc] sm:$0xff]  }
 0x100   : > { %v3734_v25 = vshll.u32 %v7697_v16, 16  ;;  %v7729_v52 = vsel %vm6465_vm7, %v4361_v18, %v4362_v60  ;;  %v5501_v35 = vrot.slane %v5485_v24, 9  ;;  %v4368_v37 = vrot.slane %v4366_v39, 4 }
 0x101   : > { %5925 = vmatmul.mubr.msk.bf16.gmra.mxu0 %vm669_vm3, %v6070_v23  ;;  %v3742_v23 = vshll.u32 %v5418_v41, 16  ;;  %v4369_v4 = vrot.slane %v7649_v8, 5  ;;  %v6073_v41 = vld [vmem:[%s6135_s23 + $0xa8] sm:$0xff]   ;;  %v3689_v44 = vsel %vm6179_vm4, %v3684_v51, %v3688_v19  ;;  %v3741_v50 = vrot.slane %v3739_v33, 4 }
 0x102   : > { %5928 = vmatprep.mubr.msk.bf16.mxu0 %vm669_vm3, %v6071_v14  ;;  %v7709_v14 = vpop.f32.mrf.mxu1  ;;  %v3713_v18 = vsel %vm6179_vm4, %v3708_v49, %v3712_v58  ;;  %v3748_v60 = vshll.u32 %v7718_v36, 16  ;;  %v3752_v8 = vshrl.u32 %v7718_v36, 16  ;;  %v3732_v51 = vrot.slane %v3731_v1, 4  ;;  %v7747_v33 = vld [vmem:[%s6135_s23 + $0x68] sm:$0x1] }
 0x103   : > { %9021 = vst [vmem:[#allocation13_spill] sm:$0xff] %v7709_v14  ;;  %v3722_v14 = vrot.slane %v3721_v21, 4  ;;  %v3736_v17 = vrot.slane %v3734_v25, 5  ;;  %v5502_v19 = vrot.slane %v5486_v28, 9  ;;  %v9026_v49 = vsel %vm6179_vm4, %v7632_v26, %v7625_v62  ;;  %v5421_v25 = vld [vmem:[%s6135_s23 + $0x6c] sm:$0xf] }
 0x104   : > { %5891 = vmatmul.mubr.msk.bf16.gmra.mxu1 %vm669_vm3, %v9020_v7  ;;  %v3744_v7 = vrot.slane %v3742_v23, 5  ;;  %v7744_v24 = vpop.f32.mrf.mxu1  ;;  %v7768_v21 = vsel %vm6465_vm7, %v5501_v35, %v4366_v39  ;;  %v7772_v1 = vsel %vm6465_vm7, %v4368_v37, %v4369_v4  ;;  %v7775_v62 = vcombine.low %v3679_v34, %v3689_v44  ;;  %v5487_v4 = vld [vmem:[%s6135_s23 + $0x60] sm:$0xe]  ;;  %v5427_v44 = vld [vmem:[%s6135_s23 + $0x84] sm:$0xf] }
 0x105   : > { %5894 = vmatprep.mubr.msk.bf16.mxu1 %vm669_vm3, %v9022_v43  ;;  %v3703_v43 = vsel %vm6179_vm4, %v3698_v45, %v7640_v10  ;;  %9024 = vst [vmem:[#allocation15_spill] sm:$0xff] %v7744_v24  ;;  %v9027_v45 = vsel %vm6179_vm4, %v7623_v3, %v7559_v46  ;;  %v4375_v46 = vrot.slane %v4373_v59, 4  ;;  %v4376_v3 = vrot.slane %v7697_v16, 5 }
 0x106   : > { %v7762_v23 = vcombine.low %v9027_v45, %v9026_v49  ;;  %9028 = vst [vmem:[#allocation11_spill] sm:$0xff] %v7775_v62  ;;  %v3745_v26 = vor.u32 %v3744_v7, %v3741_v50  ;;  %v7782_v28 = vcombine.low %v3703_v43, %v3713_v18  ;;  %v7784_v39 = vrot.slane %v3748_v60, 5 }
 0x107   : > { %v7750_v10 = vpop.f32.mrf.mxu0  ;;  %v7786_v35 = vrot.slane %v3752_v8, 4  ;;  %v3758_v37 = vshll.u32 %v7747_v33, 16  ;;  %v9030_v34 = vcombine.low %v7383_v54, %v7398_v56  ;;  %v3727_v50 = vsel %vm6179_vm4, %v3722_v14, %v7687_v11  ;;  %v5424_v54 = vld [vmem:[%s6135_s23 + $0x78] sm:$0xf] }
 0x108   : > { %9025 = vst [vmem:[#allocation9_spill] sm:$0xff] %v7750_v10  ;;  %9029 = vst [vmem:[#allocation16_spill] sm:$0xff] %v7782_v28  ;;  %v3737_v7 = vsel %vm6179_vm4, %v3732_v51, %v3736_v17  ;;  %v7806_v43 = vsel %vm6465_vm7, %v5502_v19, %v4373_v59  ;;  %v9032_v56 = vcombine.low %v7390_v29, %v7411_v42  ;;  %v3763_v60 = vshrl.u32 %v5421_v25, 16  ;;  %v7818_v51 = vld [vmem:[%s6135_s23 + $0x7c] sm:$0xf]  ;;  %v6075_v59 = vld [vmem:[%s6135_s23 + $0xc0] sm:$0xff]  }
 0x109   : > { %5929 = vmatmul.mubr.msk.bf16.gmra.mxu0 %vm669_vm3, %v6072_v2  ;;  %v7780_v2 = vld [vmem:[%s6135_s23 + $0x70] sm:$0xf]  ;;  %v7813_v18 = vpop.f32.mrf.mxu0  ;;  %v3766_v8 = vshll.u32 %v5421_v25, 16  ;;  %v7823_v17 = vsel %vm6465_vm7, %v4375_v46, %v4376_v3  ;;  %v7825_v29 = vrot.slane %v3745_v26, 4  ;;  %v5503_v42 = vrot.slane %v5487_v4, 9 }
 0x10a   : > { %5932 = vmatprep.mubr.msk.bf16.mxu0 %vm669_vm3, %v6073_v41  ;;  %v6074_v41 = vld [vmem:[%s6135_s23 + $0xb4] sm:$0xff]   ;;  %9033 = vst [vmem:[#allocation18_spill] sm:$0xff] %v7813_v18  ;;  %v3772_v11 = vshll.u32 %v7780_v2, 16  ;;  %v3776_v14 = vshrl.u32 %v7780_v2, 16  ;;  %v4380_v19 = vrot.slane %v7718_v36, 5  ;;  %v7828_v49 = vcombine.low %v3727_v50, %v3737_v7 }
 0x10b   : > { %v3755_v45 = vor.u32 %v7786_v35, %v7784_v39  ;;  %v7832_v25 = vrot.slane %v3758_v37, 5  ;;  %v3787_v46 = vshrl.u32 %v5424_v54, 16  ;;  %v3790_v3 = vshll.u32 %v5424_v54, 16  ;;  %v7844_v4 = vld [vmem:[%s6135_s23 + $0x88] sm:$0xf]  ;;  %v7847_v35 = vpop.f32.mrf.mxu0 }
 0x10c   : > { %5895 = vmatmul.mubr.msk.bf16.gmra.mxu1 %vm669_vm3, %v9030_v34  ;;  %v7794_v16 = vpop.f32.mrf.mxu1  ;;  %9034 = vst [vmem:[#allocation19_spill] sm:$0xff] %v7828_v49  ;;  %v4383_v34 = vrot.slane %v7747_v33, 5  ;;  %v3796_v36 = vshll.u32 %v7818_v51, 16  ;;  %v3800_v26 = vshrl.u32 %v7818_v51, 16  ;;  %9036 = vst [vmem:[#allocation21_spill] sm:$0xff] %v7847_v35  ;;  %v3765_v33 = vrot.slane %v3763_v60, 4 }
 0x10d   : > { %9031 = vst [vmem:[#allocation17_spill] sm:$0xff] %v7794_v16  ;;  %5898 = vmatprep.mubr.msk.bf16.mxu1 %vm669_vm3, %v9032_v56  ;;  %v7836_v56 = vld [vmem:[%s6135_s23 + $0x74] sm:$0x1]  ;;  %v3768_v37 = vrot.slane %v3766_v8, 5  ;;  %v7849_v50 = vrot.slane %v3772_v11, 5  ;;  %v3778_v7 = vrot.slane %v3776_v14, 4  ;;  %v9037_v54 = vcombine.low %v7402_v30, %v7418_v55  ;;  %v7877_v49 = vpop.f32.mrf.mxu0 }
 0x10e   : > { %v7839_v58 = vpop.f32.mrf.mxu1  ;;  %v4382_v16 = vrot.slane %v4380_v19, 4  ;;  %v7862_v60 = vld [vmem:[%s6135_s23 + $0x80] sm:$0x1]  ;;  %v7865_v8 = vld [vmem:[%s6135_s23 + $0x6c] sm:$0xe]  ;;  %v3811_v11 = vshrl.u32 %v5427_v44, 16 }
 0x10f   : > { %9035 = vst [vmem:[#allocation20_spill] sm:$0xff] %v7839_v58  ;;  %v7858_v58 = vsel %vm6465_vm7, %v5503_v42, %v4380_v19  ;;  %v3814_v14 = vshll.u32 %v5427_v44, 16  ;;  %v3824_v24 = vshrl.u32 %v7844_v4, 16  ;;  %v3789_v19 = vrot.slane %v3787_v46, 4  ;;  %9039 = vst [vmem:[#allocation23_spill] sm:$0xff] %v7877_v49 }
 0x110   : > { %v7873_v42 = vpop.f32.mrf.mxu1  ;;  %v3792_v35 = vrot.slane %v3790_v3, 5  ;;  %v7875_v18 = vrot.slane %v3796_v36, 5  ;;  %v3802_v10 = vrot.slane %v3800_v26, 4  ;;  %v9040_v44 = vcombine.low %v7422_v15, %v7450_v32  ;;  %v7896_v32 = vld [vmem:[%s6135_s23 + $0x8c] sm:$0x1] }
 0x111   : > { %5933 = vmatmul.mubr.msk.bf16.gmra.mxu0 %vm669_vm3, %v6074_v41  ;;  %v3782_v41 = vshll.u32 %v7836_v56, 16  ;;  %9038 = vst [vmem:[#allocation22_spill] sm:$0xff] %v7873_v42  ;;  %v3769_v30 = vor.u32 %v3768_v37, %v3765_v33  ;;  %v3779_v55 = vor.u32 %v3778_v7, %v7849_v50  ;;  %v3806_v46 = vshll.u32 %v7862_v60, 16  ;;  %v5489_v33 = vld [vmem:[%s6135_s23 + $0x78] sm:$0xe] }
 0x112   : > { %5936 = vmatprep.mubr.msk.bf16.mxu0 %vm669_vm3, %v6075_v59  ;;  %v3820_v59 = vshll.u32 %v7844_v4, 16  ;;  %v7887_v3 = vrot.slane %v3755_v45, 4  ;;  %v7891_v36 = vsel %vm6465_vm7, %v4382_v16, %v4383_v34  ;;  %v5504_v26 = vrot.slane %v7865_v8, 9  ;;  %v7901_v42 = vpop.f32.mrf.mxu1  ;;  %v5430_v8 = vld [vmem:[%s6135_s23 + $0x90] sm:$0xf] }
 0x113   : > { %v4394_v15 = vrot.slane %v7818_v51, 5  ;;  %v3813_v37 = vrot.slane %v3811_v11, 4  ;;  %v3816_v7 = vrot.slane %v3814_v14, 5  ;;  %9041 = vst [vmem:[#allocation24_spill] sm:$0xff] %v7901_v42  ;;  %v3784_v45 = vrot.slane %v3782_v41, 5 }
 0x114   : > { %5899 = vmatmul.mubr.msk.bf16.gmra.mxu1 %vm669_vm3, %v9037_v54  ;;  %v4387_v54 = vrot.slane %v7780_v2, 5  ;;  %v7899_v2 = vrot.slane %v3820_v59, 5  ;;  %v4390_v49 = vrot.slane %v7836_v56, 5  ;;  %v3793_v16 = vor.u32 %v3792_v35, %v3789_v19  ;;  %v7910_v59 = vld [vmem:[%s6135_s23 + $0x94] sm:$0xf] }
 0x115   : > { %5902 = vmatprep.mubr.msk.bf16.mxu1 %vm669_vm3, %v9040_v44  ;;  %v3826_v44 = vrot.slane %v3824_v24, 4  ;;  %v3803_v34 = vor.u32 %v3802_v10, %v7875_v18  ;;  %v3770_v51 = vrot.slane %v3769_v30, 4  ;;  %v3780_v11 = vrot.slane %v3779_v55, 4 }
 0x116   : > { %v4389_v62 = vrot.slane %v4387_v54, 4  ;;  %v3808_v14 = vrot.slane %v3806_v46, 5  ;;  %v9042_v24 = vcombine.low %v7543_v61, %v7547_v40  ;;  %v5505_v56 = vrot.slane %v5489_v33, 9 }
 0x117   : > { %v4396_v35 = vrot.slane %v4394_v15, 4  ;;  %v4397_v10 = vrot.slane %v7862_v60, 5  ;;  %v3830_v41 = vshll.u32 %v7896_v32, 16  ;;  %v3827_v30 = vor.u32 %v3826_v44, %v7899_v2 }
 0x118   : > { %v3835_v55 = vshrl.u32 %v5430_v8, 16  ;;  %v3838_v46 = vshll.u32 %v5430_v8, 16  ;;  %v9044_v61 = vcombine.low %v7462_v9, %v7467_v47  ;;  %v3794_v40 = vrot.slane %v3793_v16, 4 }
 0x119   : > { %v7906_v28 = vpop.f32.mrf.mxu0  ;;  %5937 = vmatmul.mubr.msk.bf16.gmra.mxu0 %vm669_vm3, %v6076_v13  ;;  %v3817_v13 = vor.u32 %v3816_v7, %v3813_v37  ;;  %v3804_v33 = vrot.slane %v3803_v34, 4  ;;  %v3844_v60 = vshll.u32 %v7910_v59, 16  ;;  %v3761_v37 = vsel %vm6179_vm4, %v7887_v3, %v7832_v25 }
 0x11a   : > { %5976 = vmatprep.mubr.msk.bf16.mxu0 %vm669_vm3, %v9042_v24  ;;  %v3848_v24 = vshrl.u32 %v7910_v59, 16  ;;  %v3775_v9 = vsel %vm6179_vm4, %v3770_v51, %v7849_v50  ;;  %v7942_v47 = vsel %vm6465_vm7, %v5504_v26, %v4387_v54  ;;  %v7946_v7 = vsel %vm6465_vm7, %v4389_v62, %v4390_v49  ;;  %v5490_v54 = vld [vmem:[%s6135_s23 + $0x84] sm:$0xe]  ;;  %v9083_v31 = vld [vmem:[#allocation24_spill] sm:$0xff] }
 0x11b   : > { %v7918_v19 = vpop.f32.mrf.mxu0  ;;  %v7954_v25 = vsel %vm6465_vm7, %v5505_v56, %v4394_v15  ;;  %v7958_v50 = vsel %vm6465_vm7, %v4396_v35, %v4397_v10  ;;  %v3832_v3 = vrot.slane %v3830_v41, 5  ;;  %v3818_v62 = vrot.slane %v3817_v13, 4  ;;  %v7982_v13 = vld [vmem:[%s6135_s23 + $0x98] sm:$0x1] }
 0x11c   : > { %9043 = vst [vmem:[#allocation25_spill] sm:$0xff] %v7918_v19  ;;  %v7921_v42 = vpop.f32.mrf.mxu1  ;;  %5903 = vmatmul.mubr.msk.bf16.gmra.mxu1 %vm669_vm3, %v9044_v61  ;;  %v3828_v49 = vrot.slane %v3827_v30, 4  ;;  %v3837_v16 = vrot.slane %v3835_v55, 4  ;;  %v3840_v34 = vrot.slane %v3838_v46, 5  ;;  %v3799_v15 = vsel %vm6179_vm4, %v3794_v40, %v7875_v18  ;;  %v5433_v30 = vld [vmem:[%s6135_s23 + $0x9c] sm:$0xf] }
 0x11d   : > { %v7929_v19 = vpop.f32.mrf.mxu0  ;;  %5942 = vmatprep.mubr.msk.bf16.mxu1 %vm669_vm3, %v7613_v27  ;;  %v3785_v27 = vsel %vm6179_vm4, %v3780_v11, %v3784_v45  ;;  %v3809_v45 = vsel %vm6179_vm4, %v3804_v33, %v3808_v14  ;;  %v7970_v51 = vrot.slane %v3844_v60, 5  ;;  %v3850_v11 = vrot.slane %v3848_v24, 4  ;;  %v8013_v24 = vld [vmem:[%s6135_s23 + $0xa0] sm:$0xf] }
 0x11e   : > { %v7948_v44 = vpop.f32.mrf.mxu1  ;;  %v9045_v35 = vcombine.low %v7583_v48, %v7587_v38  ;;  %v5519_v10 = vcombine.low %v7806_v43, %v7823_v17  ;;  %v5520_v41 = vcombine.low %v7858_v58, %v7891_v36  ;;  %v5506_v18 = vrot.slane %v5490_v54, 9 }
 0x11f   : > { %v7961_v26 = vpop.f32.mrf.mxu0  ;;  %v4401_v14 = vrot.slane %v7844_v4, 5  ;;  %v9046_v48 = vcombine.low %v7666_v6, %v7670_v22  ;;  %v9047_v38 = vsel %vm6179_vm4, %v7825_v29, %v7784_v39  ;;  %v7998_v61 = vcombine.low %v3775_v9, %v3785_v27  ;;  %v5491_v29 = vld [vmem:[%s6135_s23 + $0x90] sm:$0xe]  ;;  %v9054_v4 = vld [vmem:[#allocation2_spill] sm:$0xff] }
 0x120   : > { %v7963_v8 = vpop.f32.mrf.mxu1  ;;  %v7996_v46 = vcombine.low %v9047_v38, %v3761_v37  ;;  %v8004_v60 = vcombine.low %v3799_v15, %v3809_v45  ;;  %v3823_v6 = vsel %vm6179_vm4, %v3818_v62, %v7899_v2  ;;  %v3833_v22 = vsel %vm6179_vm4, %v3828_v49, %v3832_v3 }
 0x121   : > { %v5774_v56 = vpop.f32.mrf.mxu0  ;;  %5977 = vmatmul.mubr.msk.bf16.vlgmr.msra.gmra.mxu0 %vm669_vm3, %v9045_v35  ;;  %v3841_v39 = vor.u32 %v3840_v34, %v3837_v16  ;;  %v3851_v9 = vor.u32 %v3850_v11, %v7970_v51  ;;  %v3854_v27 = vshll.u32 %v7982_v13, 16  ;;  %v3859_v54 = vshrl.u32 %v5433_v30, 16 }
 0x122   : > { %v7985_v55 = vpop.f32.mrf.mxu1  ;;  %5980 = vmatprep.mubr.msk.bf16.mxu0 %vm669_vm3, %v9046_v48  ;;  %v3862_v15 = vshll.u32 %v5433_v30, 16  ;;  %v8024_v3 = vsel %vm6465_vm7, %v5506_v18, %v4401_v14  ;;  %v4403_v62 = vrot.slane %v4401_v14, 4  ;;  %v4404_v49 = vrot.slane %v7896_v32, 5 }
 0x123   : > { %v1473_v33 = vpop.f32.mrf.mxu0  ;;  %v5507_v16 = vrot.slane %v5491_v29, 9  ;;  %v4408_v34 = vrot.slane %v7910_v59, 5  ;;  %v3868_v11 = vshll.u32 %v8013_v24, 16  ;;  %v3872_v35 = vshrl.u32 %v8013_v24, 16 }
 0x124   : > { %v5740_v37 = vpop.f32.mrf.mxu1  ;;  %5943 = vmatmul.mubr.msk.bf16.vlgmr.msra.gmra.mxu1 %vm669_vm3, %v7615_v57  ;;  %v8033_v48 = vcombine.low %v3823_v6, %v3833_v22  ;;  %v8035_v18 = vrot.slane %v3841_v39, 4  ;;  %v3852_v32 = vrot.slane %v3851_v9, 4  ;;  %v3856_v38 = vrot.slane %v3854_v27, 5  ;;  %v5436_v22 = vld [vmem:[%s6135_s23 + $0xa8] sm:$0xf] }
 0x125   : > { %v1057_v45 = vadd.f32 %v5740_v37, %v7511_v5  ;;  %v5775_v2 = vpop.f32.mrf.mxu0  ;;  %5946 = vmatprep.mubr.msk.bf16.mxu1 %vm669_vm3, %v7762_v23  ;;  %v3861_v29 = vrot.slane %v3859_v54, 4  ;;  %v3864_v59 = vrot.slane %v3862_v15, 5  ;;  %v4411_v6 = vrot.slane %v7982_v13, 5  ;;  %v8061_v27 = vld [vmem:[%s6135_s23 + $0xac] sm:$0xf] }
 0x126   : > { %v1048_v57 = vpop.f32.mrf.mxu1  ;;  %v3874_v9 = vrot.slane %v3872_v35, 4  ;;  %v9051_v35 = vld [vmem:[#allocation8_spill] sm:$0xff] }
 0x127   : > { %v8030_v5 = vadd.f32 %v5774_v56, %v1057_v45  ;;  %v1049_v23 = vadd.f32 %v1048_v57, %v7535_v20  ;;  %v1476_v30 = vpop.f32.mrf.mxu0  ;;  %v9048_v45 = vcombine.low %v7703_v63, %v7729_v52  ;;  %v8046_v20 = vsel %vm6465_vm7, %v4403_v62, %v4404_v49  ;;  %v5492_v62 = vld [vmem:[%s6135_s23 + $0x9c] sm:$0xe] }
 0x128   : > { %v5741_v14 = vpop.f32.mrf.mxu1  ;;  %v4410_v63 = vrot.slane %v4408_v34, 4  ;;  %v8058_v52 = vrot.slane %v3868_v11, 5  ;;  %v4415_v49 = vrot.slane %v8013_v24, 5  ;;  %v3892_v24 = vshll.u32 %v8061_v27, 16 }
 0x129   : > { %v8037_v37 = vadd.f32 %v1473_v33, %v1049_v23  ;;  %v1060_v40 = vadd.f32 %v5741_v14, %v7554_v53  ;;  %v5778_v56 = vpop.f32.mrf.mxu0  ;;  %5981 = vmatmul.mubr.msk.bf16.gmra.mxu0 %vm669_vm3, %v9048_v45  ;;  %v9049_v33 = vcombine.low %v7768_v21, %v7772_v1  ;;  %v8056_v53 = vsel %vm6465_vm7, %v5507_v16, %v4408_v34  ;;  %v5435_v1 = vld [vmem:[%s6135_s23 + $0xa4] sm:$0x1]  ;;  %v9050_v16 = vld [vmem:[#allocation11_spill] sm:$0xff] }
 0x12a   : > { %v1051_v39 = vpop.f32.mrf.mxu1  ;;  %v3847_v21 = vsel %vm6179_vm4, %v8035_v18, %v7970_v51  ;;  %v3883_v34 = vshrl.u32 %v5436_v22, 16  ;;  %v9052_v51 = vld [vmem:[#allocation16_spill] sm:$0xff]  ;;  %v3896_v18 = vshrl.u32 %v8061_v27, 16 }
 0x12b   : > { %5984 = vmatprep.mubr.msk.bf16.mxu0 %vm669_vm3, %v9049_v33  ;;  %v8063_v54 = vadd.f32 %v5775_v2, %v1060_v40  ;;  %v1052_v13 = vadd.f32 %v1051_v39, %v7599_v12  ;;  %v1489_v15 = vpop.f32.mrf.mxu0  ;;  %v3857_v40 = vsel %vm6179_vm4, %v3852_v32, %v3856_v38  ;;  %v3865_v2 = vor.u32 %v3864_v59, %v3861_v29  ;;  %v9053_v59 = vld [vmem:[#allocation12_spill] sm:$0xff] }
 0x12c   : > { %v5744_v57 = vpop.f32.mrf.mxu1  ;;  %5947 = vmatmul.mubr.msk.bf16.gmra.mxu1 %vm669_vm3, %v9050_v16  ;;  %v3886_v12 = vshll.u32 %v5436_v22, 16  ;;  %v8086_v39 = vsel %vm6465_vm7, %v4410_v63, %v4411_v6  ;;  %v3875_v32 = vor.u32 %v3874_v9, %v8058_v52  ;;  %v3878_v38 = vshll.u32 %v5435_v1, 16 }
 0x12d   : > { %v8077_v11 = vadd.f32 %v1476_v30, %v1052_v13  ;;  %v1073_v23 = vadd.f32 %v5744_v57, %v9051_v35  ;;  %v5779_v14 = vpop.f32.mrf.mxu0  ;;  %5950 = vmatprep.mubr.msk.bf16.mxu1 %vm669_vm3, %v9052_v51  ;;  %v5508_v30 = vrot.slane %v5492_v62, 9  ;;  %v4417_v13 = vrot.slane %v4415_v49, 4 }
 0x12e   : > { %v1064_v45 = vpop.f32.mrf.mxu1  ;;  %v4418_v57 = vrot.slane %v5435_v1, 5  ;;  %v8094_v51 = vrot.slane %v3865_v2, 4  ;;  %v3885_v6 = vrot.slane %v3883_v34, 4  ;;  %v3888_v63 = vrot.slane %v3886_v12, 5  ;;  %v8104_v1 = vld [vmem:[%s6135_s23 + $0xb0] sm:$0x1] }
 0x12f   : > { %v8089_v29 = vadd.f32 %v5778_v56, %v1073_v23  ;;  %v1065_v22 = vadd.f32 %v1064_v45, %v9053_v59  ;;  %v1492_v33 = vpop.f32.mrf.mxu0  ;;  %v8106_v23 = vrot.slane %v3892_v24, 5  ;;  %v3898_v2 = vrot.slane %v3896_v18, 4  ;;  %v9055_v12 = vld [vmem:[#allocation14_spill] sm:$0xff] }
 0x130   : > { %v5745_v16 = vpop.f32.mrf.mxu1  ;;  %v8116_v43 = vrot.slane %v3875_v32, 4  ;;  %v8118_v17 = vrot.slane %v3878_v38, 5  ;;  %v8126_v58 = vsel %vm6465_vm7, %v5508_v30, %v4415_v49  ;;  %v8130_v36 = vsel %vm6465_vm7, %v4417_v13, %v4418_v57  ;;  %v8142_v30 = vld [vmem:[%s6135_s23 + $0xb8] sm:$0xf] }
 0x131   : > { %v8096_v9 = vadd.f32 %v1489_v15, %v1065_v22  ;;  %v1076_v62 = vadd.f32 %v5745_v16, %v9054_v4  ;;  %v5782_v56 = vpop.f32.mrf.mxu0  ;;  %5985 = vmatmul.mubr.msk.bf16.gmra.mxu0 %vm669_vm3, %v5519_v10  ;;  %v8112_v15 = vcombine.low %v3847_v21, %v3857_v40  ;;  %v5493_v10 = vld [vmem:[%s6135_s23 + $0xa8] sm:$0xe]  ;;  %v3889_v32 = vor.u32 %v3888_v63, %v3885_v6  ;;  %v9057_v22 = vld [vmem:[#allocation9_spill] sm:$0xff] }
 0x132   : > { %v1067_v45 = vpop.f32.mrf.mxu1  ;;  %5988 = vmatprep.mubr.msk.bf16.mxu0 %vm669_vm3, %v5520_v41  ;;  %v5439_v41 = vld [vmem:[%s6135_s23 + $0xb4] sm:$0xf]  ;;  %v9056_v40 = vld [vmem:[#allocation19_spill] sm:$0xff]  ;;  %v3902_v38 = vshll.u32 %v8104_v1, 16  ;;  %v4422_v49 = vrot.slane %v8061_v27, 5  ;;  %v3899_v16 = vor.u32 %v3898_v2, %v8106_v23  ;;  %v3881_v27 = vsel %vm6179_vm4, %v8116_v43, %v8118_v17 }
 0x133   : > { %v8121_v34 = vadd.f32 %v5779_v14, %v1076_v62  ;;  %v1068_v24 = vadd.f32 %v1067_v45, %v9055_v12  ;;  %v1505_v18 = vpop.f32.mrf.mxu0  ;;  %v5509_v62 = vrot.slane %v5493_v10, 9  ;;  %v3907_v6 = vshrl.u32 %v5439_v41, 16 }
 0x134   : > { %v5748_v21 = vpop.f32.mrf.mxu1  ;;  %5951 = vmatmul.mubr.msk.bf16.gmra.mxu1 %vm669_vm3, %v9056_v40  ;;  %v3910_v63 = vshll.u32 %v5439_v41, 16  ;;  %v3916_v2 = vshll.u32 %v8142_v30, 16  ;;  %v3920_v10 = vshrl.u32 %v8142_v30, 16  ;;  %v5442_v40 = vld [vmem:[%s6135_s23 + $0xc0] sm:$0xf]  ;;  %v3890_v4 = vrot.slane %v3889_v32, 4 }
 0x135   : > { %v8144_v59 = vadd.f32 %v1492_v33, %v1068_v24  ;;  %v1089_v13 = vadd.f32 %v5748_v21, %v9057_v22  ;;  %v5783_v57 = vpop.f32.mrf.mxu0  ;;  %5954 = vmatprep.mubr.msk.bf16.mxu1 %vm669_vm3, %v7996_v46  ;;  %v9059_v24 = vld [vmem:[#allocation18_spill] sm:$0xff]  ;;  %v3904_v43 = vrot.slane %v3902_v38, 5  ;;  %v4424_v17 = vrot.slane %v4422_v49, 4 }
 0x136   : > { %v1080_v45 = vpop.f32.mrf.mxu1  ;;  %v4425_v33 = vrot.slane %v8104_v1, 5  ;;  %v8172_v14 = vsel %vm6465_vm7, %v5509_v62, %v4422_v49  ;;  %v8175_v32 = vld [vmem:[%s6135_s23 + $0xc4] sm:$0xf]  ;;  %v9063_v1 = vcombine.low %v7954_v25, %v7958_v50  ;;  %v8187_v62 = vrot.slane %v3916_v2, 5 }
 0x137   : > { %v8156_v12 = vadd.f32 %v5782_v56, %v1089_v13  ;;  %v1081_v21 = vadd.f32 %v1080_v45, %v9059_v24  ;;  %v1508_v46 = vpop.f32.mrf.mxu0  ;;  %v9061_v56 = vld [vmem:[#allocation21_spill] sm:$0xff]  ;;  %v9062_v45 = vcombine.low %v7942_v47, %v7946_v7  ;;  %v3900_v24 = vrot.slane %v3899_v16, 4  ;;  %v9064_v16 = vld [vmem:[#allocation23_spill] sm:$0xff] }
 0x138   : > { %v5749_v22 = vpop.f32.mrf.mxu1  ;;  %v3931_v47 = vshrl.u32 %v5442_v40, 16  ;;  %v3934_v7 = vshll.u32 %v5442_v40, 16  ;;  %v3895_v25 = vsel %vm6179_vm4, %v3890_v4, %v8106_v23  ;;  %v8196_v50 = vsel %vm6465_vm7, %v4424_v17, %v4425_v33  ;;  %v5494_v40 = vld [vmem:[%s6135_s23 + $0xb4] sm:$0xe] }
 0x139   : > { %9058 = vst [vmem:[#allocation11_spill] sm:$0xff] %v8156_v12  ;;  %v8163_v35 = vadd.f32 %v1505_v18, %v1081_v21  ;;  %v1092_v41 = vadd.f32 %v5749_v22, %v9061_v56  ;;  %v5786_v13 = vpop.f32.mrf.mxu0  ;;  %5989 = vmatmul.mubr.msk.bf16.gmra.mxu0 %vm669_vm3, %v9062_v45  ;;  %v8182_v18 = vld [vmem:[%s6135_s23 + $0xbc] sm:$0x1]  ;;  %v3909_v21 = vrot.slane %v3907_v6, 4  ;;  %v3912_v22 = vrot.slane %v3910_v63, 5 }
 0x13a   : > { %v1083_v38 = vpop.f32.mrf.mxu1  ;;  %5992 = vmatprep.mubr.msk.bf16.mxu0 %vm669_vm3, %v9063_v1  ;;  %v3944_v6 = vshrl.u32 %v8175_v32, 16  ;;  %v3926_v23 = vshll.u32 %v8182_v18, 16  ;;  %v4429_v17 = vrot.slane %v8142_v30, 5  ;;  %v9065_v1 = vld [vmem:[#allocation25_spill] sm:$0xff] }
 0x13b   : > { %9060 = vst [vmem:[#allocation8_spill] sm:$0xff] %v8163_v35  ;;  %v8184_v56 = vadd.f32 %v5783_v57, %v1092_v41  ;;  %v1084_v45 = vadd.f32 %v1083_v38, %v9064_v16  ;;  %v1521_v49 = vpop.f32.mrf.mxu0  ;;  %v3922_v35 = vrot.slane %v3920_v10, 4  ;;  %v3940_v57 = vshll.u32 %v8175_v32, 16 }
 0x13c   : > { %v5752_v12 = vpop.f32.mrf.mxu1  ;;  %5955 = vmatmul.mubr.msk.bf16.gmra.mxu1 %vm669_vm3, %v7998_v61  ;;  %v3905_v61 = vsel %vm6179_vm4, %v3900_v24, %v3904_v43  ;;  %v3913_v33 = vor.u32 %v3912_v22, %v3909_v21  ;;  %v3933_v41 = vrot.slane %v3931_v47, 4  ;;  %v3936_v38 = vrot.slane %v3934_v7, 5 }
 0x13d   : > { %v8200_v63 = vadd.f32 %v1508_v46, %v1084_v45  ;;  %v1105_v2 = vadd.f32 %v5752_v12, %v7906_v28  ;;  %v5787_v10 = vpop.f32.mrf.mxu0  ;;  %5958 = vmatprep.mubr.msk.bf16.mxu1 %vm669_vm3, %v8004_v60  ;;  %v9066_v60 = vsel %vm6179_vm4, %v8094_v51, %v8058_v52  ;;  %v3923_v24 = vor.u32 %v3922_v35, %v8187_v62 }
 0x13e   : > { %v1096_v4 = vpop.f32.mrf.mxu1  ;;  %v8218_v43 = vcombine.low %v9066_v60, %v3881_v27  ;;  %v8221_v30 = vcombine.low %v3895_v25, %v3905_v61  ;;  %v8225_v22 = vrot.slane %v3940_v57, 5  ;;  %v3946_v47 = vrot.slane %v3944_v6, 4  ;;  %v5444_v27 = vld [vmem:[%s6135_s23 + $0xc8] sm:$0x1] }
 0x13f   : > { %v8210_v46 = vadd.f32 %v5786_v13, %v1105_v2  ;;  %v1097_v28 = vadd.f32 %v1096_v4, %v9065_v1  ;;  %v1524_v12 = vpop.f32.mrf.mxu0  ;;  %v5526_v13 = vcombine.low %v8172_v14, %v8196_v50  ;;  %v9067_v52 = vcombine.low %v8024_v3, %v8046_v20  ;;  %v5445_v14 = vld [vmem:[%s6135_s23 + $0xcc] sm:$0xf]  ;;  %v8246_v20 = vld [vmem:[%s6135_s23 + $0xd0] sm:$0xf]  ;;  %v5495_v4 = vld [vmem:[%s6135_s23 + $0xc0] sm:$0xe] }
 0x140   : > { %v5753_v21 = vpop.f32.mrf.mxu1  ;;  %v8234_v35 = vrot.slane %v3926_v23, 5  ;;  %v5510_v51 = vrot.slane %v5494_v40, 9  ;;  %v9068_v50 = vcombine.low %v8056_v53, %v8086_v39  ;;  %v4432_v57 = vrot.slane %v8182_v18, 5 }
 0x141   : > { %v8227_v7 = vadd.f32 %v1521_v49, %v1097_v28  ;;  %v1108_v16 = vadd.f32 %v5753_v21, %v7929_v19  ;;  %v5790_v45 = vpop.f32.mrf.mxu0  ;;  %5993 = vmatmul.mubr.msk.bf16.gmra.mxu0 %vm669_vm3, %v9067_v52  ;;  %v8242_v49 = vrot.slane %v3913_v33, 4  ;;  %v4431_v19 = vrot.slane %v4429_v17, 4 }
 0x142   : > { %v1099_v25 = vpop.f32.mrf.mxu1  ;;  %5996 = vmatprep.mubr.msk.bf16.mxu0 %vm669_vm3, %v9068_v50  ;;  %v3937_v3 = vor.u32 %v3936_v38, %v3933_v41  ;;  %v8251_v23 = vrot.slane %v3923_v24, 4  ;;  %v4436_v53 = vrot.slane %v8175_v32, 5  ;;  %v3947_v33 = vor.u32 %v3946_v47, %v8225_v22 }
 0x143   : > { %v8248_v6 = vadd.f32 %v5787_v10, %v1108_v16  ;;  %v1100_v2 = vadd.f32 %v1099_v25, %v7961_v26  ;;  %v1537_v61 = vpop.f32.mrf.mxu0  ;;  %v3950_v18 = vshll.u32 %v5444_v27, 16  ;;  %v3955_v40 = vshrl.u32 %v5445_v14, 16  ;;  %v9071_v10 = vld [vmem:[#allocation4_spill] sm:$0xff]  ;;  %v9072_v16 = vld [vmem:[#allocation3_spill] sm:$0xff] }
 0x144   : > { %v5756_v39 = vpop.f32.mrf.mxu1  ;;  %5959 = vmatmul.mubr.msk.bf16.gmra.mxu1 %vm669_vm3, %v8033_v48  ;;  %v3958_v41 = vshll.u32 %v5445_v14, 16  ;;  %v3964_v28 = vshll.u32 %v8246_v20, 16  ;;  %v3968_v32 = vshrl.u32 %v8246_v20, 16  ;;  %v4430_v48 = vsel %vm6465_vm7, %v5510_v51, %v4429_v17  ;;  %v9073_v17 = vld [vmem:[#allocation6_spill] sm:$0xff] }
 0x145   : > { %9069 = vst [vmem:[#allocation16_spill] sm:$0xff] %v8248_v6  ;;  %v8258_v38 = vadd.f32 %v1524_v12, %v1100_v2  ;;  %v1121_v1 = vadd.f32 %v5756_v39, %v9071_v10  ;;  %v5791_v26 = vpop.f32.mrf.mxu0  ;;  %5962 = vmatprep.mubr.msk.bf16.mxu1 %vm669_vm3, %v8112_v15  ;;  %v4433_v24 = vsel %vm6465_vm7, %v4431_v19, %v4432_v57  ;;  %v3938_v21 = vrot.slane %v3937_v3, 4 }
 0x146   : > { %v1112_v60 = vpop.f32.mrf.mxu1  ;;  %v5511_v12 = vrot.slane %v5495_v4, 9  ;;  %v4438_v25 = vrot.slane %v4436_v53, 4  ;;  %v4439_v15 = vrot.slane %v5444_v27, 5  ;;  %v3948_v2 = vrot.slane %v3947_v33, 4  ;;  %v5447_v33 = vld [vmem:[%s6135_s23 + $0xd4] sm:$0x1] }
 0x147   : > { %9070 = vst [vmem:[#allocation12_spill] sm:$0xff] %v8258_v38  ;;  %v8269_v47 = vadd.f32 %v5790_v45, %v1121_v1  ;;  %v1113_v52 = vadd.f32 %v1112_v60, %v9072_v16  ;;  %v1540_v14 = vpop.f32.mrf.mxu0  ;;  %v3952_v39 = vrot.slane %v3950_v18, 5  ;;  %v3957_v10 = vrot.slane %v3955_v40, 4  ;;  %v9075_v18 = vld [vmem:[#allocation5_spill] sm:$0xff] }
 0x148   : > { %v5757_v50 = vpop.f32.mrf.mxu1  ;;  %v3960_v38 = vrot.slane %v3958_v41, 5  ;;  %v9074_v45 = vcombine.low %v8126_v58, %v8130_v36  ;;  %v8279_v57 = vrot.slane %v3964_v28, 5  ;;  %v3970_v27 = vrot.slane %v3968_v32, 4 }
 0x149   : > { %v8272_v6 = vadd.f32 %v1537_v61, %v1113_v52  ;;  %v1124_v51 = vadd.f32 %v5757_v50, %v9073_v17  ;;  %v5794_v19 = vpop.f32.mrf.mxu0  ;;  %v3919_v61 = vsel %vm6179_vm4, %v8242_v49, %v8187_v62  ;;  %v3929_v4 = vsel %vm6179_vm4, %v8251_v23, %v8234_v35  ;;  %v5496_v62 = vld [vmem:[%s6135_s23 + $0xcc] sm:$0xe] }
 0x14a   : > { %5997 = vmatmul.mubr.msk.bf16.gmra.mxu0 %vm669_vm3, %v9074_v45  ;;  %v1115_v3 = vpop.f32.mrf.mxu1  ;;  %v4443_v58 = vrot.slane %v8246_v20, 5  ;;  %v4440_v1 = vsel %vm6465_vm7, %v4438_v25, %v4439_v15  ;;  %v5527_v35 = vcombine.low %v4430_v48, %v4433_v24  ;;  %v3943_v20 = vsel %vm6179_vm4, %v3938_v21, %v8225_v22  ;;  %v9077_v25 = vld [vmem:[#allocation10_spill] sm:$0xff] }
 0x14b   : > { %6000 = vmatprep.mubr.msk.bf16.mxu0 %vm669_vm3, %v5526_v13  ;;  %v8292_v36 = vadd.f32 %v5791_v26, %v1124_v51  ;;  %v1116_v40 = vadd.f32 %v1115_v3, %v9075_v18  ;;  %v1553_v41 = vpop.f32.mrf.mxu0  ;;  %v4437_v13 = vsel %vm6465_vm7, %v5511_v12, %v4436_v53  ;;  %v3953_v23 = vsel %vm6179_vm4, %v3948_v2, %v3952_v39  ;;  %v9076_v53 = vld [vmem:[#allocation7_spill] sm:$0xff] }
 0x14c   : > { %v5760_v49 = vpop.f32.mrf.mxu1  ;;  %5963 = vmatmul.mubr.msk.bf16.gmra.mxu1 %vm669_vm3, %v8218_v43  ;;  %v3961_v26 = vor.u32 %v3960_v38, %v3957_v10  ;;  %v3971_v12 = vor.u32 %v3970_v27, %v8279_v57  ;;  %v3974_v43 = vshll.u32 %v5447_v33, 16  ;;  %v5528_v24 = vcombine.low %v4437_v13, %v4440_v1 }
 0x14d   : > { %v8307_v28 = vadd.f32 %v1540_v14, %v1116_v40  ;;  %v1137_v32 = vadd.f32 %v5760_v49, %v9076_v53  ;;  %v5795_v60 = vpop.f32.mrf.mxu0  ;;  %5966 = vmatprep.mubr.msk.bf16.mxu1 %vm669_vm3, %v8221_v30  ;;  %v5512_v16 = vrot.slane %v5496_v62, 9  ;;  %v4445_v52 = vrot.slane %v4443_v58, 4  ;;  %v9078_v30 = vld [vmem:[#allocation13_spill] sm:$0xff] }
 0x14e   : > { %v1128_v48 = vpop.f32.mrf.mxu1  ;;  %v4446_v22 = vrot.slane %v5447_v33, 5  ;;  %v5462_v50 = vcombine.low %v3919_v61, %v3929_v4  ;;  %v5463_v2 = vcombine.low %v3943_v20, %v3953_v23  ;;  %v3962_v39 = vrot.slane %v3961_v26, 4  ;;  %v9079_v33 = vld [vmem:[#allocation15_spill] sm:$0xff]  ;;  %v9080_v62 = vld [vmem:[#allocation17_spill] sm:$0xff]  ;;  %v9081_v26 = vld [vmem:[#allocation20_spill] sm:$0xff] }
 0x14f   : > { %v8313_v21 = vadd.f32 %v5794_v19, %v1137_v32  ;;  %v1129_v38 = vadd.f32 %v1128_v48, %v9077_v25  ;;  %v1556_v14 = vpop.f32.mrf.mxu0  ;;  %v3972_v45 = vrot.slane %v3971_v12, 4  ;;  %v3976_v27 = vrot.slane %v3974_v43, 5  ;;  %v9082_v43 = vld [vmem:[#allocation22_spill] sm:$0xff] }
 0x150   : > { %v5761_v15 = vpop.f32.mrf.mxu1  ;;  %v4444_v19 = vsel %vm6465_vm7, %v5512_v16, %v4443_v58  ;;  %v4447_v61 = vsel %vm6465_vm7, %v4445_v52, %v4446_v22  ;;  %v3967_v13 = vsel %vm6179_vm4, %v3962_v39, %v8279_v57 }
 0x151   : > { %v8316_v10 = vadd.f32 %v1553_v41, %v1129_v38  ;;  %v1140_v17 = vadd.f32 %v5761_v15, %v9078_v30  ;;  %v5798_v51 = vpop.f32.mrf.mxu0  ;;  %v3977_v0 = vsel %vm6179_vm4, %v3972_v45, %v3976_v27 }
 0x152   : > { %6001 = vmatmul.mubr.msk.bf16.gmra.mxu0 %vm669_vm3, %v5527_v35  ;;  %v1131_v3 = vpop.f32.mrf.mxu1  ;;  %v5529_v35 = vcombine.low %v4444_v19, %v4447_v61  ;;  %v5464_v12 = vcombine.low %v3967_v13, %v3977_v0 }
 0x153   : > { %6004 = vmatprep.mubr.msk.bf16.mxu0 %vm669_vm3, %v5528_v24  ;;  %v8325_v4 = vadd.f32 %v5795_v60, %v1140_v17  ;;  %v1132_v18 = vadd.f32 %v1131_v3, %v9079_v33  ;;  %v1569_v40 = vpop.f32.mrf.mxu0 }
 0x154   : > { %v5764_v41 = vpop.f32.mrf.mxu1  ;;  %5967 = vmatmul.mubr.msk.bf16.gmra.mxu1 %vm669_vm3, %v5462_v50 }
 0x155   : > { %v8332_v1 = vadd.f32 %v1556_v14, %v1132_v18  ;;  %v1153_v49 = vadd.f32 %v5764_v41, %v9080_v62  ;;  %v5799_v58 = vpop.f32.mrf.mxu0  ;;  %5970 = vmatprep.mubr.msk.bf16.mxu1 %vm669_vm3, %v5463_v2 }
 0x156   : > { %v1144_v20 = vpop.f32.mrf.mxu1 }
 0x157   : > { %v8338_v23 = vadd.f32 %v5798_v51, %v1153_v49  ;;  %v1145_v53 = vadd.f32 %v1144_v20, %v9081_v26  ;;  %v1572_v32 = vpop.f32.mrf.mxu0 }
 0x158   : > { %v5765_v60 = vpop.f32.mrf.mxu1 }
 0x159   : > { %v8341_v57 = vadd.f32 %v1569_v40, %v1145_v53  ;;  %v1156_v48 = vadd.f32 %v5765_v60, %v9082_v43  ;;  %v5802_v24 = vpop.f32.mrf.mxu0 }
 0x15a   : > { %6005 = vmatmul.mubr.msk.bf16.gmra.mxu0 %vm669_vm3, %v5529_v35  ;;  %v1147_v16 = vpop.f32.mrf.mxu1 }
 0x15b   : > { %v8345_v52 = vadd.f32 %v5799_v58, %v1156_v48  ;;  %v1148_v22 = vadd.f32 %v1147_v16, %v9083_v31  ;;  %v1585_v25 = vpop.f32.mrf.mxu0 }
 0x15c   : > { %v5768_v38 = vpop.f32.mrf.mxu1  ;;  %5971 = vmatmul.mubr.msk.bf16.gmra.mxu1 %vm669_vm3, %v5464_v12 }
 0x15d   : > { %v8349_v14 = vadd.f32 %v1572_v32, %v1148_v22  ;;  %v1169_v15 = vadd.f32 %v5768_v38, %v7921_v42  ;;  %v5803_v50 = vpop.f32.mrf.mxu0 }
 0x15e   : > { %v1160_v2 = vpop.f32.mrf.mxu1 }
 0x15f   : > { %v8352_v39 = vadd.f32 %v5802_v24, %v1169_v15  ;;  %v1161_v30 = vadd.f32 %v1160_v2, %v7948_v44  ;;  %v1588_v17 = vpop.f32.mrf.mxu0 }
 0x160   : > { %v5769_v51 = vpop.f32.mrf.mxu1 }
 0x161   : > { %v8355_v45 = vadd.f32 %v1585_v25, %v1161_v30  ;;  %v1172_v27 = vadd.f32 %v5769_v51, %v7963_v8  ;;  %v5842_v3 = vpop.f32.mrf.mxu0  ;;  %v9084_v30 = vld [vmem:[#allocation11_spill] sm:$0xff] }
 0x162   : > { %v1163_v19 = vpop.f32.mrf.mxu1 }
 0x163   : > { %v8358_v61 = vadd.f32 %v5803_v50, %v1172_v27  ;;  %v1164_v33 = vadd.f32 %v1163_v19, %v7985_v55  ;;  %v2558_v18 = vpop.f32.mrf.mxu0 }
 0x164   : > { %v5808_v42 = vpop.f32.mrf.mxu1 }
 0x165   : > { %v8361_v40 = vadd.f32 %v1588_v17, %v1164_v33  ;;  %v1961_v41 = vadd.f32 %v5808_v42, %v8030_v5  ;;  %v5843_v13 = vpop.f32.mrf.mxu0 }
 0x166   : > { %v1832_v44 = vpop.f32.mrf.mxu1 }
 0x167   : > { %v8364_v62 = vadd.f32 %v5842_v3, %v1961_v41  ;;  %v1959_v49 = vadd.f32 %v1832_v44, %v8037_v37  ;;  %v2561_v58 = vpop.f32.mrf.mxu0  ;;  %v9085_v3 = vld [vmem:[#allocation8_spill] sm:$0xff] }
 0x168   : > { %v5809_v8 = vpop.f32.mrf.mxu1 }
 0x169   : > { %v8367_v0 = vadd.f32 %v2558_v18, %v1959_v49  ;;  %v1962_v35 = vadd.f32 %v5809_v8, %v8063_v54  ;;  %v5846_v20 = vpop.f32.mrf.mxu0 }
 0x16a   : > { %v1835_v55 = vpop.f32.mrf.mxu1 }
 0x16b   : > { %v8370_v26 = vadd.f32 %v5843_v13, %v1962_v35  ;;  %v1960_v53 = vadd.f32 %v1835_v55, %v8077_v11  ;;  %v2574_v32 = vpop.f32.mrf.mxu0 }
 0x16c   : > { %v5812_v5 = vpop.f32.mrf.mxu1 }
 0x16d   : > { %v8373_v60 = vadd.f32 %v2561_v58, %v1960_v53  ;;  %v1965_v12 = vadd.f32 %v5812_v5, %v8089_v29  ;;  %v5847_v43 = vpop.f32.mrf.mxu0 }
 0x16e   : > { %v1848_v37 = vpop.f32.mrf.mxu1 }
 0x16f   : > { %v8376_v48 = vadd.f32 %v5846_v20, %v1965_v12  ;;  %v1963_v24 = vadd.f32 %v1848_v37, %v8096_v9  ;;  %v2577_v16 = vpop.f32.mrf.mxu0 }
 0x170   : > { %v5813_v54 = vpop.f32.mrf.mxu1 }
 0x171   : > { %v8379_v31 = vadd.f32 %v2574_v32, %v1963_v24  ;;  %v1966_v22 = vadd.f32 %v5813_v54, %v8121_v34  ;;  %v5850_v25 = vpop.f32.mrf.mxu0  ;;  %v9087_v54 = vld [vmem:[#allocation12_spill] sm:$0xff] }
 0x172   : > { %v1851_v11 = vpop.f32.mrf.mxu1 }
 0x173   : > { %v8382_v38 = vadd.f32 %v5847_v43, %v1966_v22  ;;  %v1964_v15 = vadd.f32 %v1851_v11, %v8144_v59  ;;  %v2590_v50 = vpop.f32.mrf.mxu0  ;;  %v9086_v43 = vld [vmem:[#allocation16_spill] sm:$0xff] }
 0x174   : > { %v5816_v29 = vpop.f32.mrf.mxu1 }
 0x175   : > { %v8385_v2 = vadd.f32 %v2577_v16, %v1964_v15  ;;  %v1969_v17 = vadd.f32 %v5816_v29, %v9084_v30  ;;  %v5851_v51 = vpop.f32.mrf.mxu0 }
 0x176   : > { %v1864_v9 = vpop.f32.mrf.mxu1 }
 0x177   : > { %v8388_v27 = vadd.f32 %v5850_v25, %v1969_v17  ;;  %v1967_v19 = vadd.f32 %v1864_v9, %v9085_v3  ;;  %v2593_v33 = vpop.f32.mrf.mxu0 }
 0x178   : > { %v5817_v34 = vpop.f32.mrf.mxu1 }
 0x179   : > { %v8391_v18 = vadd.f32 %v2590_v50, %v1967_v19  ;;  %v1970_v42 = vadd.f32 %v5817_v34, %v8184_v56  ;;  %v5854_v41 = vpop.f32.mrf.mxu0 }
 0x17a   : > { %v1867_v59 = vpop.f32.mrf.mxu1 }
 0x17b   : > { %v8394_v13 = vadd.f32 %v5851_v51, %v1970_v42  ;;  %v1968_v44 = vadd.f32 %v1867_v59, %v8200_v63  ;;  %v2606_v49 = vpop.f32.mrf.mxu0 }
 0x17c   : > { %v5820_v58 = vpop.f32.mrf.mxu1 }
 0x17d   : > { %v8397_v8 = vadd.f32 %v2593_v33, %v1968_v44  ;;  %v1973_v35 = vadd.f32 %v5820_v58, %v8210_v46  ;;  %v5855_v20 = vpop.f32.mrf.mxu0 }
 0x17e   : > { %v1880_v55 = vpop.f32.mrf.mxu1 }
 0x17f   : > { %v8400_v53 = vadd.f32 %v5854_v41, %v1973_v35  ;;  %v1971_v32 = vadd.f32 %v1880_v55, %v8227_v7  ;;  %v2609_v5 = vpop.f32.mrf.mxu0 }
 0x180   : > { %v5821_v56 = vpop.f32.mrf.mxu1 }
 0x181   : > { %v8403_v12 = vadd.f32 %v2606_v49, %v1971_v32  ;;  %v1974_v37 = vadd.f32 %v5821_v56, %v9086_v43  ;;  %v5858_v24 = vpop.f32.mrf.mxu0 }
 0x182   : > { %v1883_v63 = vpop.f32.mrf.mxu1 }
 0x183   : > { %v8406_v16 = vadd.f32 %v5855_v20, %v1974_v37  ;;  %v1972_v22 = vadd.f32 %v1883_v63, %v9087_v54  ;;  %v2622_v25 = vpop.f32.mrf.mxu0 }
 0x184   : > { %v5824_v46 = vpop.f32.mrf.mxu1 }
 0x185   : > { %v8409_v11 = vadd.f32 %v2609_v5, %v1972_v22  ;;  %v1977_v15 = vadd.f32 %v5824_v46, %v8269_v47  ;;  %v5859_v50 = vpop.f32.mrf.mxu0 }
 0x186   : > { %v1896_v7 = vpop.f32.mrf.mxu1 }
 0x187   : > { %v8412_v29 = vadd.f32 %v5858_v24, %v1977_v15  ;;  %v1975_v30 = vadd.f32 %v1896_v7, %v8272_v6  ;;  %v2625_v17 = vpop.f32.mrf.mxu0 }
 0x188   : > { %v5825_v51 = vpop.f32.mrf.mxu1 }
 0x189   : > { %v8415_v9 = vadd.f32 %v2622_v25, %v1975_v30  ;;  %v1978_v3 = vadd.f32 %v5825_v51, %v8292_v36  ;;  %v5862_v19 = vpop.f32.mrf.mxu0 }
 0x18a   : > { %v1899_v33 = vpop.f32.mrf.mxu1 }
 0x18b   : > { %v8418_v34 = vadd.f32 %v5859_v50, %v1978_v3  ;;  %v1976_v42 = vadd.f32 %v1899_v33, %v8307_v28  ;;  %v2638_v41 = vpop.f32.mrf.mxu0 }
 0x18c   : > { %v5828_v47 = vpop.f32.mrf.mxu1 }
 0x18d   : > { %9088 = vst [vmem:[#allocation2_spill] sm:$0xff] %v8418_v34  ;;  %v8421_v59 = vadd.f32 %v2625_v17, %v1976_v42  ;;  %v1981_v44 = vadd.f32 %v5828_v47, %v8313_v21  ;;  %v5863_v49 = vpop.f32.mrf.mxu0 }
 0x18e   : > { %v1912_v6 = vpop.f32.mrf.mxu1 }
 0x18f   : > { %9089 = vst [vmem:[#allocation14_spill] sm:$0xff] %v8421_v59  ;;  %v8424_v58 = vadd.f32 %v5862_v19, %v1981_v44  ;;  %v1979_v35 = vadd.f32 %v1912_v6, %v8316_v10  ;;  %v2641_v20 = vpop.f32.mrf.mxu0 }
 0x190   : > { %v5829_v36 = vpop.f32.mrf.mxu1 }
 0x191   : > { %9090 = vst [vmem:[#allocation19_spill] sm:$0xff] %v8424_v58  ;;  %v8427_v55 = vadd.f32 %v2638_v41, %v1979_v35  ;;  %v1982_v32 = vadd.f32 %v5829_v36, %v8325_v4  ;;  %v5866_v5 = vpop.f32.mrf.mxu0 }
 0x192   : > { %v1915_v28 = vpop.f32.mrf.mxu1 }
 0x193   : > { %9091 = vst [vmem:[#allocation9_spill] sm:$0xff] %v8427_v55  ;;  %v8430_v56 = vadd.f32 %v5863_v49, %v1982_v32  ;;  %v1980_v43 = vadd.f32 %v1915_v28, %v8332_v1  ;;  %v2654_v37 = vpop.f32.mrf.mxu0 }
 0x194   : > { %v5832_v21 = vpop.f32.mrf.mxu1 }
 0x195   : > { %9092 = vst [vmem:[#allocation18_spill] sm:$0xff] %v8430_v56  ;;  %v8433_v24 = vadd.f32 %v2641_v20, %v1980_v43  ;;  %v1985_v63 = vadd.f32 %v5832_v21, %v8338_v23  ;;  %v5867_v54 = vpop.f32.mrf.mxu0 }
 0x196   : > { %v1928_v10 = vpop.f32.mrf.mxu1 }
 0x197   : > { %9093 = vst [vmem:[#allocation21_spill] sm:$0xff] %v8433_v24  ;;  %v8436_v22 = vadd.f32 %v5866_v5, %v1985_v63  ;;  %v1983_v25 = vadd.f32 %v1928_v10, %v8341_v57  ;;  %v2657_v46 = vpop.f32.mrf.mxu0 }
 0x198   : > { %v5833_v4 = vpop.f32.mrf.mxu1 }
 0x199   : > { %9094 = vst [vmem:[#allocation23_spill] sm:$0xff] %v8436_v22  ;;  %v8439_v15 = vadd.f32 %v2654_v37, %v1983_v25  ;;  %v1986_v50 = vadd.f32 %v5833_v4, %v8345_v52  ;;  %v5870_v7 = vpop.f32.mrf.mxu0 }
 0x19a   : > { %v1931_v1 = vpop.f32.mrf.mxu1 }
 0x19b   : > { %9095 = vst [vmem:[#allocation25_spill] sm:$0xff] %v8439_v15  ;;  %v8442_v30 = vadd.f32 %v5867_v54, %v1986_v50  ;;  %v1984_v17 = vadd.f32 %v1931_v1, %v8349_v14  ;;  %v2670_v51 = vpop.f32.mrf.mxu0 }
 0x19c   : > { %v5836_v23 = vpop.f32.mrf.mxu1 }
 0x19d   : > { %9096 = vst [vmem:[#allocation4_spill] sm:$0xff] %v8442_v30  ;;  %v8445_v3 = vadd.f32 %v2657_v46, %v1984_v17  ;;  %v1989_v19 = vadd.f32 %v5836_v23, %v8352_v39  ;;  %v5871_v33 = vpop.f32.mrf.mxu0 }
 0x19e   : > { %v1944_v57 = vpop.f32.mrf.mxu1 }
 0x19f   : > { %9097 = vst [vmem:[#allocation3_spill] sm:$0xff] %v8445_v3  ;;  %v8448_v42 = vadd.f32 %v5870_v7, %v1989_v19  ;;  %v1987_v41 = vadd.f32 %v1944_v57, %v8355_v45  ;;  %v2673_v47 = vpop.f32.mrf.mxu0 }
 0x1a0   : > { %v5837_v52 = vpop.f32.mrf.mxu1 }
 0x1a1   : > { %9098 = vst [vmem:[#allocation6_spill] sm:$0xff] %v8448_v42  ;;  %v8451_v44 = vadd.f32 %v2670_v51, %v1987_v41  ;;  %v1990_v49 = vadd.f32 %v5837_v52, %v8358_v61  ;;  %v8454_v6 = vpop.f32.mrf.mxu0 }
 0x1a2   : > { %v1947_v14 = vpop.f32.mrf.mxu1 }
 0x1a3   : > { %9099 = vst [vmem:[#allocation5_spill] sm:$0xff] %v8451_v44  ;;  %v8456_v35 = vadd.f32 %v5871_v33, %v1990_v49  ;;  %v1988_v20 = vadd.f32 %v1947_v14, %v8361_v40  ;;  %v8459_v39 = vpop.f32.mrf.mxu0 }
 0x1a4   : > { %v5876_v36 = vpop.f32.mrf.mxu1 }
 0x1a5   : > { %9100 = vst [vmem:[#allocation7_spill] sm:$0xff] %v8456_v35  ;;  %v8461_v32 = vadd.f32 %v2673_v47, %v1988_v20  ;;  %v8463_v5 = vpop.f32.mrf.mxu0 }
 0x1a6   : > { %v3028_v45 = vpop.f32.mrf.mxu1 }
 0x1a7   : > { %9101 = vst [vmem:[#allocation10_spill] sm:$0xff] %v8461_v32  ;;  %v8465_v28 = vpop.f32.mrf.mxu0 }
 0x1a8   : > { %v5877_v43 = vpop.f32.mrf.mxu1 }
 0x1a9   : > { %v8467_v37 = vpop.f32.mrf.mxu0 }
 0x1aa   : > { %v8469_v61 = vpop.f32.mrf.mxu1 }
 0x1ab   : > { %v8471_v21 = vpop.f32.mrf.mxu0 }
 0x1ac   : > { %v8473_v63 = vpop.f32.mrf.mxu1 }
 0x1ad   : > { %v8475_v40 = vpop.f32.mrf.mxu0 }
 0x1ae   : > { %v8477_v54 = vpop.f32.mrf.mxu1 }
 0x1af   : > { %v8479_v10 = vpop.f32.mrf.mxu0 }
 0x1b0   : > { %v8481_v25 = vpop.f32.mrf.mxu1 }
 0x1b1   : > { %v8483_v46 = vpop.f32.mrf.mxu0 }
 0x1b2   : > { %v8485_v4 = vpop.f32.mrf.mxu1 }
 0x1b3   : > { %v8487_v50 = vpop.f32.mrf.mxu0 }
 0x1b4   : > { %v8489_v7 = vpop.f32.mrf.mxu1 }
 0x1b5   : > { %v8491_v1 = vpop.f32.mrf.mxu0 }
 0x1b6   : > { %v8493_v17 = vpop.f32.mrf.mxu1 }
 0x1b7   : > { %v8495_v51 = vpop.f32.mrf.mxu0 }
 0x1b8   : > { %v8497_v23 = vpop.f32.mrf.mxu1 }
 0x1b9   : > { %v8499_v19 = vpop.f32.mrf.mxu0 }
 0x1ba   : > { %v8501_v33 = vpop.f32.mrf.mxu1 }
 0x1bb   : > { %v8503_v57 = vpop.f32.mrf.mxu0 }
 0x1bc   : > { %v8505_v41 = vpop.f32.mrf.mxu1 }
 0x1bd   : > { %v8507_v47 = vpop.f32.mrf.mxu0 }
 0x1be   : > { %v8509_v52 = vpop.f32.mrf.mxu1 }
 0x1bf   : > { %v8511_v49 = vpop.f32.mrf.mxu0 }
 0x1c0   : > { %v8513_v14 = vpop.f32.mrf.mxu1 }
 0x1c1   : > { %v8515_v20 = vpop.f32.mrf.mxu0 }
 0x1c2   : > { %v8517_v32 = vpop.f32.mrf.mxu1 }
 0x1c3   : > { %v8519_v35 = vpop.f32.mrf.mxu0 }
 0x1c4   : > { %9102 = vst [vmem:[#allocation13_spill] sm:$0xff] %v8519_v35  ;;  %v8521_v44 = vpop.f32.mrf.mxu1 }
 0x1c5   : > { %v8523_v42 = vpop.f32.mrf.mxu0 }
 0x1c6   : > { %9103 = vst [vmem:[#allocation15_spill] sm:$0xff] %v8523_v42  ;;  %v8525_v3 = vpop.f32.mrf.mxu1 }
 0x1c7   : > { %v8527_v30 = vpop.f32.mrf.mxu0 }
 0x1c8   : > { %9104 = vst [vmem:[#allocation17_spill] sm:$0xff] %v8527_v30  ;;  %v8529_v15 = vpop.f32.mrf.mxu1 }
 0x1c9   : > { %9105 = vst [vmem:[#allocation20_spill] sm:$0xff] %v8529_v15  ;;  %v8531_v22 = vpop.f32.mrf.mxu0 }
 0x1ca   : > { %9106 = vst [vmem:[#allocation22_spill] sm:$0xff] %v8531_v22  ;;  %v8533_v24 = vpop.f32.mrf.mxu1 }
 0x1cb   : > { %9107 = vst [vmem:[#allocation24_spill] sm:$0xff] %v8533_v24  ;;  %v8535_v56 = vpop.f32.mrf.mxu0 }
 0x1cc   : > { %9108 = vst [vmem:[#allocation11_spill] sm:$0xff] %v8535_v56  ;;  %v8537_v55 = vpop.f32.mrf.mxu1 }
 0x1cd   : > { %9109 = vst [vmem:[#allocation8_spill] sm:$0xff] %v8537_v55  ;;  %v8539_v58 = vpop.f32.mrf.mxu0 }
 0x1ce   : > { %9110 = vst [vmem:[#allocation16_spill] sm:$0xff] %v8539_v58  ;;  %v8541_v59 = vpop.f32.mrf.mxu1 }
 0x1cf   : > { %9111 = vst [vmem:[#allocation12_spill] sm:$0xff] %v8541_v59  ;;  %v8543_v35 = vpop.f32.mrf.mxu0 }
 0x1d0   : > { %9112 = vst [vmem:[#allocation26_spill] sm:$0xff] %v8543_v35  ;;  %v8545_v42 = vpop.f32.mrf.mxu1 }
 0x1d1   : > { %9113 = vst [vmem:[#allocation27_spill] sm:$0xff] %v8545_v42  ;;  %v8547_v34 = vpop.f32.mrf.mxu0 }
 0x1d2   : > { %9114 = vst [vmem:[#allocation28_spill] sm:$0xff] %v8547_v34  ;;  %v8549_v30 = vpop.f32.mrf.mxu1 }
 0x1d3   : > { %9115 = vst [vmem:[#allocation29_spill] sm:$0xff] %v8549_v30  ;;  %v8551_v15 = vpop.f32.mrf.mxu0 }
 0x1d4   : > { %9116 = vst [vmem:[#allocation30_spill] sm:$0xff] %v8551_v15  ;;  %v8553_v22 = vpop.f32.mrf.mxu1 }
 0x1d5   : > { %9117 = vst [vmem:[#allocation31_spill] sm:$0xff] %v8553_v22  ;;  %v8555_v24 = vpop.f32.mrf.mxu0 }
 0x1d6   : > { %9118 = vst [vmem:[#allocation32_spill] sm:$0xff] %v8555_v24  ;;  %v8557_v56 = vpop.f32.mrf.mxu1  ;;  %v3157_v24 = vadd.f32 %v5876_v36, %v8364_v62  ;;  %v3156_v62 = vadd.f32 %v8469_v61, %v8373_v60 }
 0x1d7   : > { %9119 = vst [vmem:[#allocation33_spill] sm:$0xff] %v8557_v56  ;;  %v8559_v55 = vpop.f32.mrf.mxu0 }
 0x1d8   : > { %9120 = vst [vmem:[#allocation34_spill] sm:$0xff] %v8559_v55  ;;  %v8561_v58 = vpop.f32.mrf.mxu1 }
 0x1d9   : > { %9121 = vst [vmem:[#allocation35_spill] sm:$0xff] %v8561_v58  ;;  %v8563_v35 = vpop.f32.mrf.mxu0  ;;  %v3155_v58 = vadd.f32 %v3028_v45, %v8367_v0 }
 0x1da   : > { %9122 = vst [vmem:[#allocation36_spill] sm:$0xff] %v8563_v35  ;;  %v8565_v42 = vpop.f32.mrf.mxu1 }
 0x1db   : > { %9123 = vst [vmem:[#allocation37_spill] sm:$0xff] %v8565_v42  ;;  %v8567_v34 = vpop.f32.mrf.mxu0  ;;  %v3516_v42 = vadd.f32 %v8454_v6, %v3157_v24  ;;  %v3161_v24 = vadd.f32 %v8473_v63, %v8376_v48 }
 0x1dc   : > { %9124 = vst [vmem:[#allocation38_spill] sm:$0xff] %v8567_v34  ;;  %v8569_v30 = vpop.f32.mrf.mxu1  ;;  %v3158_v34 = vadd.f32 %v5877_v43, %v8370_v26 }
 0x1dd   : > { %9125 = vst [vmem:[#allocation39_spill] sm:$0xff] %v8569_v30  ;;  %v8571_v15 = vpop.f32.mrf.mxu0  ;;  %v3520_v48 = vadd.f32 %v8467_v37, %v3161_v24 }
 0x1de   : > { %9126 = vst [vmem:[#allocation40_spill] sm:$0xff] %v8571_v15  ;;  %v8573_v22 = vpop.f32.mrf.mxu1  ;;  %v3517_v26 = vadd.f32 %v8463_v5, %v3158_v34 }
 0x1df   : > { %9127 = vst [vmem:[#allocation41_spill] sm:$0xff] %v8573_v22  ;;  %v8576_v56 = vpop.f32.mrf.mxu0  ;;  %v3514_v22 = vadd.f32 %v8459_v39, %v3155_v58 }
 0x1e0   : > { %9128 = vst [vmem:[#allocation42_spill] sm:$0xff] %v8576_v56  ;;  %v8578_v55 = vpop.f32.mrf.mxu1 }
 0x1e1   : > { %v5978_v59 = vpop.f32.mrf.mxu0 }
 0x1e2   : > { %v8581_v35 = vpop.f32.mrf.mxu1 }
 0x1e3   : > { %v4583_v30 = vpop.f32.mrf.mxu0 }
 0x1e4   : > { %v5944_v15 = vpop.f32.mrf.mxu1 }
 0x1e5   : > { %v4242_v36 = vadd.f32 %v5944_v15, %v3516_v42  ;;  %v5979_v56 = vpop.f32.mrf.mxu0  ;;  %v3515_v15 = vadd.f32 %v8465_v28, %v3156_v62  ;;  %v3159_v42 = vadd.f32 %v8477_v54, %v8379_v31 }
 0x1e6   : > { %v4113_v0 = vpop.f32.mrf.mxu1 }
 0x1e7   : > { %v8597_v6 = vadd.f32 %v5978_v59, %v4242_v36  ;;  %v4240_v58 = vadd.f32 %v4113_v0, %v3514_v22  ;;  %v4586_v39 = vpop.f32.mrf.mxu0  ;;  %v3162_v59 = vadd.f32 %v8481_v25, %v8382_v38  ;;  %v3518_v63 = vadd.f32 %v8471_v21, %v3159_v42 }
 0x1e8   : > { %v5945_v60 = vpop.f32.mrf.mxu1  ;;  %v3165_v25 = vadd.f32 %v8489_v7, %v8388_v27  ;;  %v3163_v0 = vadd.f32 %v8493_v17, %v8391_v18 }
 0x1e9   : > { %4883 = vst [vmem:[%s8592_s14 + $0x10] sm:$0xff] %v8597_v6  ;;  %v8604_v45 = vadd.f32 %v4583_v30, %v4240_v58  ;;  %v4243_v43 = vadd.f32 %v5945_v60, %v3517_v26  ;;  %v5982_v34 = vpop.f32.mrf.mxu0  ;;  %v3160_v30 = vadd.f32 %v8485_v4, %v8385_v2  ;;  %v3521_v62 = vadd.f32 %v8475_v40, %v3162_v59 }
 0x1ea   : > { %v4116_v5 = vpop.f32.mrf.mxu1  ;;  %v3169_v59 = vadd.f32 %v8505_v41, %v8400_v53 }
 0x1eb   : > { %4881 = vst [vmem:[%s8592_s14] sm:$0xff] %v8604_v45  ;;  %v8611_v22 = vadd.f32 %v5979_v56, %v4243_v43  ;;  %v4241_v28 = vadd.f32 %v4116_v5, %v3515_v15  ;;  %v4599_v61 = vpop.f32.mrf.mxu0  ;;  %v3519_v24 = vadd.f32 %v8479_v10, %v3160_v30  ;;  %v3166_v15 = vadd.f32 %v8497_v23, %v8394_v13 }
 0x1ec   : > { %v5948_v31 = vpop.f32.mrf.mxu1  ;;  %v3522_v43 = vadd.f32 %v8487_v50, %v3163_v0  ;;  %v3164_v5 = vadd.f32 %v8501_v33, %v8397_v8  ;;  %v3168_v0 = vadd.f32 %v8517_v32, %v8409_v11 }
 0x1ed   : > { %4884 = vst [vmem:[%s8592_s14 + $0x18] sm:$0xff] %v8611_v22  ;;  %v8618_v37 = vadd.f32 %v4586_v39, %v4241_v28  ;;  %v4246_v54 = vadd.f32 %v5948_v31, %v3520_v48  ;;  %v5983_v38 = vpop.f32.mrf.mxu0  ;;  %v3524_v39 = vadd.f32 %v8483_v46, %v3165_v25  ;;  %v3528_v25 = vadd.f32 %v8499_v19, %v3169_v59 }
 0x1ee   : > { %v4129_v56 = vpop.f32.mrf.mxu1 }
 0x1ef   : > { %v4742_v36 = vadd.f32 %v8618_v37, %v8604_v45  ;;  %4882 = vst [vmem:[%s8592_s14 + $0x8] sm:$0xff] %v8618_v37  ;;  %v8627_v2 = vadd.f32 %v5982_v34, %v4246_v54  ;;  %v4244_v21 = vadd.f32 %v4129_v56, %v3518_v63  ;;  %v4602_v4 = vpop.f32.mrf.mxu0  ;;  %v3167_v63 = vadd.f32 %v8509_v52, %v8403_v12 }
 0x1f0   : > { %v5949_v26 = vpop.f32.mrf.mxu1  ;;  %v3523_v54 = vadd.f32 %v8495_v51, %v3164_v5 }
 0x1f1   : > { %v4743_v27 = vadd.f32 %v4742_v36, %v8597_v6  ;;  %4887 = vst [vmem:[%s8592_s14 + $0x30] sm:$0xff] %v8627_v2  ;;  %v8635_v40 = vadd.f32 %v4599_v61, %v4244_v21  ;;  %v4247_v7 = vadd.f32 %v5949_v26, %v3521_v62  ;;  %v5986_v58 = vpop.f32.mrf.mxu0  ;;  %v3525_v61 = vadd.f32 %v8491_v1, %v3166_v15 }
 0x1f2   : > { %v4132_v60 = vpop.f32.mrf.mxu1  ;;  %v3170_v62 = vadd.f32 %v8513_v14, %v8406_v16  ;;  %v3526_v21 = vadd.f32 %v8503_v57, %v3167_v63  ;;  %v3527_v15 = vadd.f32 %v8511_v49, %v3168_v0 }
 0x1f3   : > { %v4744_v18 = vadd.f32 %v4743_v27, %v8611_v22  ;;  %4885 = vst [vmem:[%s8592_s14 + $0x20] sm:$0xff] %v8635_v40  ;;  %v8643_v10 = vadd.f32 %v5983_v38, %v4247_v7  ;;  %v4245_v17 = vadd.f32 %v4132_v60, %v3519_v24  ;;  %v4615_v42 = vpop.f32.mrf.mxu0  ;;  %v3173_v24 = vadd.f32 %v8521_v44, %v8412_v29 }
 0x1f4   : > { %v5952_v34 = vpop.f32.mrf.mxu1  ;;  %v3529_v7 = vadd.f32 %v8507_v47, %v3170_v62 }
 0x1f5   : > { %v4745_v46 = vadd.f32 %v4744_v18, %v8635_v40  ;;  %4888 = vst [vmem:[%s8592_s14 + $0x38] sm:$0xff] %v8643_v10  ;;  %v8651_v13 = vadd.f32 %v4602_v4, %v4245_v17  ;;  %v4250_v23 = vadd.f32 %v5952_v34, %v3524_v39  ;;  %v5987_v48 = vpop.f32.mrf.mxu0  ;;  %v3171_v39 = vadd.f32 %v8525_v3, %v8415_v9  ;;  %v9130_v34 = vld [vmem:[#allocation20_spill] sm:$0xff] }
 0x1f6   : > { %v4145_v28 = vpop.f32.mrf.mxu1  ;;  %v3532_v17 = vadd.f32 %v8515_v20, %v3173_v24 }
 0x1f7   : > { %v4746_v50 = vadd.f32 %v4745_v46, %v8651_v13  ;;  %4886 = vst [vmem:[%s8592_s14 + $0x28] sm:$0xff] %v8651_v13  ;;  %v8659_v8 = vadd.f32 %v5986_v58, %v4250_v23  ;;  %v4248_v33 = vadd.f32 %v4145_v28, %v3522_v43  ;;  %v4618_v31 = vpop.f32.mrf.mxu0  ;;  %v9129_v43 = vld [vmem:[#allocation2_spill] sm:$0xff]  ;;  %v9131_v23 = vld [vmem:[#allocation13_spill] sm:$0xff] }
 0x1f8   : > { %v5953_v30 = vpop.f32.mrf.mxu1  ;;  %v3174_v5 = vadd.f32 %v9130_v34, %v9129_v43  ;;  %v9132_v28 = vld [vmem:[#allocation14_spill] sm:$0xff] }
 0x1f9   : > { %v4747_v53 = vadd.f32 %v4746_v50, %v8627_v2  ;;  %4891 = vst [vmem:[%s8592_s14 + $0x50] sm:$0xff] %v8659_v8  ;;  %v8667_v1 = vadd.f32 %v4615_v42, %v4248_v33  ;;  %v4251_v41 = vadd.f32 %v5953_v30, %v3525_v61  ;;  %v5990_v38 = vpop.f32.mrf.mxu0  ;;  %v9133_v61 = vld [vmem:[#allocation24_spill] sm:$0xff]  ;;  %v9134_v30 = vld [vmem:[#allocation19_spill] sm:$0xff] }
 0x1fa   : > { %v4148_v56 = vpop.f32.mrf.mxu1  ;;  %v3172_v50 = vadd.f32 %v9133_v61, %v9132_v28  ;;  %v9146_v28 = vld [vmem:[#allocation23_spill] sm:$0xff] }
 0x1fb   : > { %v4748_v12 = vadd.f32 %v4747_v53, %v8643_v10  ;;  %4889 = vst [vmem:[%s8592_s14 + $0x40] sm:$0xff] %v8667_v1  ;;  %v8675_v51 = vadd.f32 %v5987_v48, %v4251_v41  ;;  %v4249_v52 = vadd.f32 %v4148_v56, %v3523_v54  ;;  %v4631_v36 = vpop.f32.mrf.mxu0  ;;  %v3530_v48 = vadd.f32 %v9131_v23, %v3171_v39  ;;  %v9135_v54 = vld [vmem:[#allocation8_spill] sm:$0xff]  ;;  %v9141_v39 = vld [vmem:[#allocation18_spill] sm:$0xff]  ;;  %v9147_v61 = vld [vmem:[#allocation31_spill] sm:$0xff] }
 0x1fc   : > { %v5956_v4 = vpop.f32.mrf.mxu1  ;;  %v3177_v53 = vadd.f32 %v9135_v54, %v9134_v30 }
 0x1fd   : > { %v4749_v19 = vadd.f32 %v4748_v12, %v8667_v1  ;;  %4892 = vst [vmem:[%s8592_s14 + $0x58] sm:$0xff] %v8675_v51  ;;  %v8683_v16 = vadd.f32 %v4618_v31, %v4249_v52  ;;  %v4254_v14 = vadd.f32 %v5956_v4, %v3528_v25  ;;  %v5991_v26 = vpop.f32.mrf.mxu0 }
 0x1fe   : > { %v4161_v27 = vpop.f32.mrf.mxu1 }
 0x1ff   : > { %v4750_v57 = vadd.f32 %v4749_v19, %v8683_v16  ;;  %4890 = vst [vmem:[%s8592_s14 + $0x48] sm:$0xff] %v8683_v16  ;;  %v8691_v11 = vadd.f32 %v5990_v38, %v4254_v14  ;;  %v4252_v32 = vadd.f32 %v4161_v27, %v3526_v21  ;;  %v4634_v58 = vpop.f32.mrf.mxu0  ;;  %v9136_v38 = vld [vmem:[#allocation15_spill] sm:$0xff]  ;;  %v9138_v21 = vld [vmem:[#allocation12_spill] sm:$0xff]  ;;  %v9139_v19 = vld [vmem:[#allocation17_spill] sm:$0xff] }
 0x200   : > { %v5957_v60 = vpop.f32.mrf.mxu1  ;;  %v3533_v25 = vadd.f32 %v9136_v38, %v3174_v5  ;;  %v3531_v14 = vadd.f32 %v9139_v19, %v3172_v50  ;;  %v9144_v5 = vld [vmem:[#allocation21_spill] sm:$0xff]  ;;  %v3181_v50 = vadd.f32 %v9147_v61, %v9146_v28 }
 0x201   : > { %v4751_v29 = vadd.f32 %v4750_v57, %v8659_v8  ;;  %4895 = vst [vmem:[%s8592_s14 + $0x70] sm:$0xff] %v8691_v11  ;;  %v8699_v44 = vadd.f32 %v4631_v36, %v4252_v32  ;;  %v4255_v47 = vadd.f32 %v5957_v60, %v3529_v7  ;;  %v5994_v18 = vpop.f32.mrf.mxu0  ;;  %v9137_v36 = vld [vmem:[#allocation9_spill] sm:$0xff]  ;;  %v9140_v57 = vld [vmem:[#allocation22_spill] sm:$0xff]  ;;  %v9142_v60 = vld [vmem:[#allocation27_spill] sm:$0xff] }
 0x202   : > { %v4164_v42 = vpop.f32.mrf.mxu1  ;;  %v3175_v4 = vadd.f32 %v9138_v21, %v9137_v36  ;;  %v3536_v32 = vadd.f32 %v9140_v57, %v3177_v53  ;;  %v9149_v38 = vld [vmem:[#allocation25_spill] sm:$0xff]  ;;  %v9154_v57 = vld [vmem:[#allocation35_spill] sm:$0xff] }
 0x203   : > { %v4752_v9 = vadd.f32 %v4751_v29, %v8675_v51  ;;  %4893 = vst [vmem:[%s8592_s14 + $0x60] sm:$0xff] %v8699_v44  ;;  %v8707_v3 = vadd.f32 %v5991_v26, %v4255_v47  ;;  %v4253_v49 = vadd.f32 %v4164_v42, %v3527_v15  ;;  %v4647_v46 = vpop.f32.mrf.mxu0  ;;  %v3178_v15 = vadd.f32 %v9142_v60, %v9141_v39  ;;  %v9143_v42 = vld [vmem:[#allocation11_spill] sm:$0xff] }
 0x204   : > { %v5960_v59 = vpop.f32.mrf.mxu1  ;;  %v3534_v43 = vadd.f32 %v9143_v42, %v3175_v4  ;;  %v9156_v42 = vld [vmem:[#allocation3_spill] sm:$0xff] }
 0x205   : > { %v4753_v20 = vadd.f32 %v4752_v9, %v8699_v44  ;;  %4896 = vst [vmem:[%s8592_s14 + $0x78] sm:$0xff] %v8707_v3  ;;  %v8715_v33 = vadd.f32 %v4634_v58, %v4253_v49  ;;  %v4258_v31 = vadd.f32 %v5960_v59, %v3532_v17  ;;  %v5995_v63 = vpop.f32.mrf.mxu0  ;;  %v9145_v9 = vld [vmem:[#allocation29_spill] sm:$0xff] }
 0x206   : > { %v4177_v41 = vpop.f32.mrf.mxu1  ;;  %v3176_v49 = vadd.f32 %v9145_v9, %v9144_v5 }
 0x207   : > { %v4754_v56 = vadd.f32 %v4753_v20, %v8715_v33  ;;  %4894 = vst [vmem:[%s8592_s14 + $0x68] sm:$0xff] %v8715_v33  ;;  %v8723_v62 = vadd.f32 %v5994_v18, %v4258_v31  ;;  %v4256_v12 = vadd.f32 %v4177_v41, %v3530_v48  ;;  %v4650_v52 = vpop.f32.mrf.mxu0  ;;  %v9148_v31 = vld [vmem:[#allocation16_spill] sm:$0xff] }
 0x208   : > { %v5961_v0 = vpop.f32.mrf.mxu1 }
 0x209   : > { %v4755_v26 = vadd.f32 %v4754_v56, %v8691_v11  ;;  %4899 = vst [vmem:[%s8592_s14 + $0x90] sm:$0xff] %v8723_v62  ;;  %v8731_v24 = vadd.f32 %v4647_v46, %v4256_v12  ;;  %v4259_v27 = vadd.f32 %v5961_v0, %v3533_v25  ;;  %v9150_v25 = vld [vmem:[#allocation33_spill] sm:$0xff] }
 0x20a   : > { %v5998_v7 = vpop.f32.mrf.mxu0  ;;  %v4180_v58 = vpop.f32.mrf.mxu1  ;;  %v3179_v56 = vadd.f32 %v9150_v25, %v9149_v38  ;;  %v9161_v38 = vld [vmem:[#allocation5_spill] sm:$0xff] }
 0x20b   : > { %v4756_v29 = vadd.f32 %v4755_v26, %v8707_v3  ;;  %4897 = vst [vmem:[%s8592_s14 + $0x80] sm:$0xff] %v8731_v24  ;;  %v8739_v47 = vadd.f32 %v5995_v63, %v4259_v27  ;;  %v4257_v18 = vadd.f32 %v4180_v58, %v3531_v14  ;;  %v3537_v63 = vadd.f32 %v9148_v31, %v3178_v15  ;;  %v9152_v14 = vld [vmem:[#allocation28_spill] sm:$0xff] }
 0x20c   : > { %v4663_v17 = vpop.f32.mrf.mxu0  ;;  %v5964_v34 = vpop.f32.mrf.mxu1  ;;  %v3540_v26 = vadd.f32 %v9152_v14, %v3181_v50  ;;  %v9160_v50 = vld [vmem:[#allocation32_spill] sm:$0xff] }
 0x20d   : > { %v4757_v46 = vadd.f32 %v4756_v29, %v8731_v24  ;;  %4900 = vst [vmem:[%s8592_s14 + $0x98] sm:$0xff] %v8739_v47  ;;  %v8747_v23 = vadd.f32 %v4650_v52, %v4257_v18  ;;  %v4262_v48 = vadd.f32 %v5964_v34, %v3536_v32  ;;  %v9151_v52 = vld [vmem:[#allocation26_spill] sm:$0xff] }
 0x20e   : > { %v5999_v59 = vpop.f32.mrf.mxu0  ;;  %v4193_v20 = vpop.f32.mrf.mxu1  ;;  %v3535_v36 = vadd.f32 %v9151_v52, %v3176_v49  ;;  %v9155_v29 = vld [vmem:[#allocation30_spill] sm:$0xff] }
 0x20f   : > { %v4758_v30 = vadd.f32 %v4757_v46, %v8747_v23  ;;  %4898 = vst [vmem:[%s8592_s14 + $0x88] sm:$0xff] %v8747_v23  ;;  %v8755_v54 = vadd.f32 %v5998_v7, %v4262_v48  ;;  %v4260_v53 = vadd.f32 %v4193_v20, %v3534_v43  ;;  %v9153_v7 = vld [vmem:[#allocation4_spill] sm:$0xff]  ;;  %v3538_v18 = vadd.f32 %v9155_v29, %v3179_v56  ;;  %v9157_v43 = vld [vmem:[#allocation37_spill] sm:$0xff]  ;;  %v9158_v48 = vld [vmem:[#allocation6_spill] sm:$0xff] }
 0x210   : > { %v4666_v41 = vpop.f32.mrf.mxu0  ;;  %v5965_v12 = vpop.f32.mrf.mxu1  ;;  %v3182_v32 = vadd.f32 %v9154_v57, %v9153_v7  ;;  %v3180_v34 = vadd.f32 %v9157_v43, %v9156_v42  ;;  %v9165_v7 = vld [vmem:[#allocation7_spill] sm:$0xff]  ;;  %v9166_v29 = vld [vmem:[#allocation38_spill] sm:$0xff] }
 0x211   : > { %v4759_v21 = vadd.f32 %v4758_v30, %v8723_v62  ;;  %4903 = vst [vmem:[%s8592_s14 + $0xb0] sm:$0xff] %v8755_v54  ;;  %v8763_v4 = vadd.f32 %v4663_v17, %v4260_v53  ;;  %v4263_v0 = vadd.f32 %v5965_v12, %v3537_v63  ;;  %v9163_v12 = vld [vmem:[#allocation34_spill] sm:$0xff]  ;;  %v3186_v57 = vadd.f32 %v8578_v55, %v9165_v7 }
 0x212   : > { %v6002_v19 = vpop.f32.mrf.mxu0  ;;  %v4196_v27 = vpop.f32.mrf.mxu1  ;;  %v3541_v20 = vadd.f32 %v9160_v50, %v3182_v32  ;;  %v3539_v52 = vadd.f32 %v9163_v12, %v3180_v34  ;;  %v9167_v42 = vld [vmem:[#allocation10_spill] sm:$0xff] }
 0x213   : > { %v4760_v58 = vadd.f32 %v4759_v21, %v8739_v47  ;;  %4901 = vst [vmem:[%s8592_s14 + $0xa0] sm:$0xff] %v8763_v4  ;;  %v8771_v39 = vadd.f32 %v5999_v59, %v4263_v0  ;;  %v4261_v60 = vadd.f32 %v4196_v27, %v3535_v36  ;;  %v9159_v59 = vld [vmem:[#allocation39_spill] sm:$0xff]  ;;  %v3184_v43 = vadd.f32 %v8581_v35, %v9167_v42 }
 0x214   : > { %v4679_v15 = vpop.f32.mrf.mxu0  ;;  %v5968_v17 = vpop.f32.mrf.mxu1  ;;  %v3185_v28 = vadd.f32 %v9159_v59, %v9158_v48  ;;  %v9168_v48 = vld [vmem:[#allocation40_spill] sm:$0xff] }
 0x215   : > { %v4761_v5 = vadd.f32 %v4760_v58, %v8763_v4  ;;  %4904 = vst [vmem:[%s8592_s14 + $0xb8] sm:$0xff] %v8771_v39  ;;  %v8779_v9 = vadd.f32 %v4666_v41, %v4261_v60  ;;  %v4266_v49 = vadd.f32 %v5968_v17, %v3540_v26  ;;  %v9162_v41 = vld [vmem:[#allocation41_spill] sm:$0xff]  ;;  %v9164_v26 = vld [vmem:[#allocation36_spill] sm:$0xff] }
 0x216   : > { %v6003_v46 = vpop.f32.mrf.mxu0  ;;  %v4209_v61 = vpop.f32.mrf.mxu1  ;;  %v3183_v25 = vadd.f32 %v9162_v41, %v9161_v38 }
 0x217   : > { %v4762_v31 = vadd.f32 %v4761_v5, %v8779_v9  ;;  %4902 = vst [vmem:[%s8592_s14 + $0xa8] sm:$0xff] %v8779_v9  ;;  %v8787_v63 = vadd.f32 %v6002_v19, %v4266_v49  ;;  %v4264_v30 = vadd.f32 %v4209_v61, %v3538_v18  ;;  %v3544_v19 = vadd.f32 %v9164_v26, %v3185_v28 }
 0x218   : > { %v4682_v53 = vpop.f32.mrf.mxu0  ;;  %v5969_v56 = vpop.f32.mrf.mxu1  ;;  %v3542_v18 = vadd.f32 %v9166_v29, %v3183_v25 }
 0x219   : > { %v4763_v36 = vadd.f32 %v4762_v31, %v8755_v54  ;;  %4907 = vst [vmem:[%s8592_s14 + $0xd0] sm:$0xff] %v8787_v63  ;;  %v8795_v21 = vadd.f32 %v4679_v15, %v4264_v30  ;;  %v4267_v0 = vadd.f32 %v5969_v56, %v3541_v20  ;;  %v9169_v31 = vld [vmem:[#allocation42_spill] sm:$0xff] }
 0x21a   : > { %v6006_v14 = vpop.f32.mrf.mxu0  ;;  %v4212_v27 = vpop.f32.mrf.mxu1  ;;  %v3543_v35 = vadd.f32 %v9169_v31, %v3184_v43 }
 0x21b   : > { %v4764_v32 = vadd.f32 %v4763_v36, %v8771_v39  ;;  %4905 = vst [vmem:[%s8592_s14 + $0xc0] sm:$0xff] %v8795_v21  ;;  %v8803_v58 = vadd.f32 %v6003_v46, %v4267_v0  ;;  %v4265_v60 = vadd.f32 %v4212_v27, %v3539_v52  ;;  %v3545_v46 = vadd.f32 %v9168_v48, %v3186_v57 }
 0x21c   : > { %v5972_v15 = vpop.f32.mrf.mxu1  ;;  %v4695_v17 = vpop.f32.mrf.mxu0 }
 0x21d   : > { %v4765_v34 = vadd.f32 %v4764_v32, %v8795_v21  ;;  %4908 = vst [vmem:[%s8592_s14 + $0xd8] sm:$0xff] %v8803_v58  ;;  %v4735_v55 = vadd.f32 %v4682_v53, %v4265_v60  ;;  %v4270_v5 = vadd.f32 %v5972_v15, %v3544_v19 }
 0x21e   : > { %v4225_v49 = vpop.f32.mrf.mxu1  ;;  %v6007_v20 = vpop.f32.mrf.mxu0 }
 0x21f   : > { %v4766_v59 = vadd.f32 %v4765_v34, %v4735_v55  ;;  %4906 = vst [vmem:[%s8592_s14 + $0xc8] sm:$0xff] %v4735_v55  ;;  %v4740_v28 = vadd.f32 %v6006_v14, %v4270_v5  ;;  %v4268_v61 = vadd.f32 %v4225_v49, %v3542_v18 }
 0x220   : > { %v5973_v50 = vpop.f32.mrf.mxu1  ;;  %v4698_v52 = vpop.f32.mrf.mxu0 }
 0x221   : > { %v4767_v30 = vadd.f32 %v4766_v59, %v8787_v63  ;;  %4911 = vst [vmem:[%s8592_s14 + $0xf0] sm:$0xff] %v4740_v28  ;;  %v4738_v38 = vadd.f32 %v4695_v17, %v4268_v61  ;;  %v4271_v53 = vadd.f32 %v5973_v50, %v3545_v46 }
 0x222   : > { %v4228_v41 = vpop.f32.mrf.mxu1 }
 0x223   : > { %v4768_v25 = vadd.f32 %v4767_v30, %v8803_v58  ;;  %4909 = vst [vmem:[%s8592_s14 + $0xe0] sm:$0xff] %v4738_v38  ;;  %v4741_v56 = vadd.f32 %v6007_v20, %v4271_v53  ;;  %v4269_v12 = vadd.f32 %v4228_v41, %v3543_v35 }
 0x225   : > { %v4769_v36 = vadd.f32 %v4768_v25, %v4738_v38  ;;  %4912 = vst [vmem:[%s8592_s14 + $0xf8] sm:$0xff] %v4741_v56  ;;  %v4739_v0 = vadd.f32 %v4698_v52, %v4269_v12 }
 0x227   : > { %v4770_v14 = vadd.f32 %v4769_v36, %v4739_v0  ;;  %4910 = vst [vmem:[%s8592_s14 + $0xe8] sm:$0xff] %v4739_v0 }
 0x229   : > { %v4771_v26 = vadd.f32 %v4770_v14, %v4740_v28 }
 0x22b   : > { %v4772_v19 = vadd.f32 %v4771_v26, %v4741_v56 }
 0x22d   : > { %v4773_v27 = vrot.slane %v4772_v19, 4 }
 0x22f   : > { %v4774_v7 = vadd.f32 %v4773_v27, %v4772_v19 }
 0x231   : > { %v4775_v57 = vrot.slane %v4774_v7, 2 }
 0x233   : > { %v4776_v32 = vadd.f32 %v4775_v57, %v4774_v7 }
 0x235   : > { %v4777_v60 = vrot.slane %v4776_v32, 1 }
 0x237   : > { %v4778_v29 = vadd.f32 %v4777_v60, %v4776_v32 }
 0x239   : > { %v4779_v18 = vmul.f32 0.00390625, %v4778_v29  ;;  %4913 = vst [vmem:[%s8824_s18] sm:$0x1] %v4778_v29 }
 0x23b   : > { %v4789_v15 = vsub.f32 %v8683_v16, %v4779_v18  ;;  %v4791_v17 = vsub.f32 %v8675_v51, %v4779_v18  ;;  %v4792_v42 = vsub.f32 %v8699_v44, %v4779_v18  ;;  %v4793_v43 = vsub.f32 %v8715_v33, %v4779_v18 }
 0x23c   : > { %v4794_v34 = vsub.f32 %v8691_v11, %v4779_v18  ;;  %v4795_v5 = vsub.f32 %v8707_v3, %v4779_v18  ;;  %v4796_v49 = vsub.f32 %v8731_v24, %v4779_v18  ;;  %v4797_v48 = vsub.f32 %v8747_v23, %v4779_v18 }
 0x23d   : > { %v4798_v46 = vsub.f32 %v8723_v62, %v4779_v18  ;;  %v4799_v59 = vsub.f32 %v8739_v47, %v4779_v18  ;;  %v4800_v16 = vsub.f32 %v8763_v4, %v4779_v18  ;;  %v4801_v51 = vsub.f32 %v8779_v9, %v4779_v18 }
 0x23e   : > { %v4802_v44 = vsub.f32 %v8755_v54, %v4779_v18  ;;  %v8841_v33 = vsub.f32 %v8771_v39, %v4779_v18  ;;  %v8844_v11 = vsub.f32 %v8795_v21, %v4779_v18  ;;  %v8846_v3 = vsub.f32 %v4735_v55, %v4779_v18 }
 0x23f   : > { %v8849_v24 = vsub.f32 %v8787_v63, %v4779_v18  ;;  %v8852_v62 = vsub.f32 %v8803_v58, %v4779_v18  ;;  %v8854_v47 = vsub.f32 %v4738_v38, %v4779_v18  ;;  %v8856_v23 = vsub.f32 %v4739_v0, %v4779_v18 }
 0x240   : > { %v8858_v4 = vsub.f32 %v4740_v28, %v4779_v18  ;;  %v8860_v54 = vsub.f32 %v4741_v56, %v4779_v18  ;;  %v4780_v39 = vsub.f32 %v8604_v45, %v4779_v18  ;;  %v4781_v9 = vsub.f32 %v8618_v37, %v4779_v18 }
 0x241   : > { %v4782_v21 = vsub.f32 %v8597_v6, %v4779_v18  ;;  %v4783_v61 = vsub.f32 %v8611_v22, %v4779_v18  ;;  %v4784_v58 = vsub.f32 %v8635_v40, %v4779_v18  ;;  %v4785_v31 = vsub.f32 %v8651_v13, %v4779_v18 }
 0x242   : > { %v4812_v55 = vmul.f32 %v4780_v39, %v4780_v39  ;;  %v4813_v63 = vmul.f32 %v4781_v9, %v4781_v9  ;;  %v4786_v30 = vsub.f32 %v8627_v2, %v4779_v18  ;;  %v4787_v37 = vsub.f32 %v8643_v10, %v4779_v18 }
 0x243   : > { %v4814_v50 = vmul.f32 %v4782_v21, %v4782_v21  ;;  %v4815_v28 = vmul.f32 %v4783_v61, %v4783_v61  ;;  %v4816_v38 = vmul.f32 %v4784_v58, %v4784_v58  ;;  %v4817_v53 = vmul.f32 %v4785_v31, %v4785_v31 }
 0x244   : > { %v4844_v20 = vadd.f32 %v4813_v63, %v4812_v55  ;;  %v4788_v41 = vsub.f32 %v8667_v1, %v4779_v18  ;;  %v4818_v25 = vmul.f32 %v4786_v30, %v4786_v30  ;;  %v4819_v56 = vmul.f32 %v4787_v37, %v4787_v37 }
 0x245   : > { %v4790_v12 = vsub.f32 %v8659_v8, %v4779_v18  ;;  %v4821_v36 = vmul.f32 %v4789_v15, %v4789_v15  ;;  %v4823_v26 = vmul.f32 %v4791_v17, %v4791_v17  ;;  %v4824_v27 = vmul.f32 %v4792_v42, %v4792_v42 }
 0x246   : > { %v4845_v35 = vadd.f32 %v4844_v20, %v4814_v50  ;;  %v4820_v52 = vmul.f32 %v4788_v41, %v4788_v41  ;;  %v4825_v7 = vmul.f32 %v4793_v43, %v4793_v43  ;;  %v4826_v32 = vmul.f32 %v4794_v34, %v4794_v34 }
 0x247   : > { %v4822_v14 = vmul.f32 %v4790_v12, %v4790_v12  ;;  %v4827_v60 = vmul.f32 %v4795_v5, %v4795_v5  ;;  %v4828_v39 = vmul.f32 %v4796_v49, %v4796_v49  ;;  %v4829_v21 = vmul.f32 %v4797_v48, %v4797_v48 }
 0x248   : > { %v4846_v45 = vadd.f32 %v4845_v35, %v4815_v28  ;;  %v4830_v18 = vmul.f32 %v4798_v46, %v4798_v46  ;;  %v4831_v15 = vmul.f32 %v4799_v59, %v4799_v59  ;;  %v4832_v61 = vmul.f32 %v4800_v16, %v4800_v16 }
 0x249   : > { %v4833_v17 = vmul.f32 %v4801_v51, %v4801_v51  ;;  %v4834_v42 = vmul.f32 %v4802_v44, %v4802_v44  ;;  %v4835_v43 = vmul.f32 %v8841_v33, %v8841_v33  ;;  %v4836_v5 = vmul.f32 %v8844_v11, %v8844_v11 }
 0x24a   : > { %v4847_v6 = vadd.f32 %v4846_v45, %v4816_v38  ;;  %v4837_v48 = vmul.f32 %v8846_v3, %v8846_v3  ;;  %v4838_v59 = vmul.f32 %v8849_v24, %v8849_v24  ;;  %v4839_v51 = vmul.f32 %v8852_v62, %v8852_v62 }
 0x24b   : > { %v4840_v33 = vmul.f32 %v8854_v47, %v8854_v47  ;;  %v4841_v11 = vmul.f32 %v8856_v23, %v8856_v23  ;;  %v4842_v3 = vmul.f32 %v8858_v4, %v8858_v4  ;;  %v4843_v24 = vmul.f32 %v8860_v54, %v8860_v54 }
 0x24c   : > { %v4848_v22 = vadd.f32 %v4847_v6, %v4817_v53 }
 0x24e   : > { %v4849_v40 = vadd.f32 %v4848_v22, %v4818_v25 }
 0x250   : > { %v4850_v13 = vadd.f32 %v4849_v40, %v4819_v56 }
 0x252   : > { %v4851_v0 = vadd.f32 %v4850_v13, %v4820_v52 }
 0x254   : > { %v4852_v2 = vadd.f32 %v4851_v0, %v4821_v36 }
 0x256   : > { %v4853_v19 = vadd.f32 %v4852_v2, %v4822_v14 }
 0x258   : > { %v4854_v10 = vadd.f32 %v4853_v19, %v4823_v26 }
 0x25a   : > { %v4855_v57 = vadd.f32 %v4854_v10, %v4824_v27 }
 0x25c   : > { %v4856_v1 = vadd.f32 %v4855_v57, %v4825_v7 }
 0x25e   : > { %v4857_v29 = vadd.f32 %v4856_v1, %v4826_v32 }
 0x260   : > { %v4858_v9 = vadd.f32 %v4857_v29, %v4827_v60 }
 0x262   : > { %v4859_v8 = vadd.f32 %v4858_v9, %v4828_v39 }
 0x264   : > { %v4860_v55 = vadd.f32 %v4859_v8, %v4829_v21 }
 0x266   : > { %v4861_v63 = vadd.f32 %v4860_v55, %v4830_v18 }
 0x268   : > { %v4862_v58 = vadd.f32 %v4861_v63, %v4831_v15 }
 0x26a   : > { %v4863_v50 = vadd.f32 %v4862_v58, %v4832_v61 }
 0x26c   : > { %v4864_v20 = vadd.f32 %v4863_v50, %v4833_v17 }
 0x26e   : > { %v4865_v34 = vadd.f32 %v4864_v20, %v4834_v42 }
 0x270   : > { %v4866_v49 = vadd.f32 %v4865_v34, %v4835_v43 }
 0x272   : > { %v4867_v46 = vadd.f32 %v4866_v49, %v4836_v5 }
 0x274   : > { %v4868_v16 = vadd.f32 %v4867_v46, %v4837_v48 }
 0x276   : > { %v4869_v44 = vadd.f32 %v4868_v16, %v4838_v59 }
 0x278   : > { %v4870_v31 = vadd.f32 %v4869_v44, %v4839_v51 }
 0x27a   : > { %v4871_v28 = vadd.f32 %v4870_v31, %v4840_v33 }
 0x27c   : > { %v4872_v35 = vadd.f32 %v4871_v28, %v4841_v11 }
 0x27e   : > { %v4873_v30 = vadd.f32 %v4872_v35, %v4842_v3 }
 0x280   : > { %v4874_v38 = vadd.f32 %v4873_v30, %v4843_v24 }
 0x282   : > { %v4875_v62 = vrot.slane %v4874_v38, 4 }
 0x284   : > { %v4876_v45 = vadd.f32 %v4875_v62, %v4874_v38 }
 0x286   : > { %v4877_v37 = vrot.slane %v4876_v45, 2 }
 0x288   : > { %v4878_v53 = vadd.f32 %v4877_v37, %v4876_v45 }
 0x28a   : > { %v4879_v6 = vrot.slane %v4878_v53, 1 }
 0x28c   : > { %v4880_v47 = vadd.f32 %v4879_v6, %v4878_v53 }
 0x28e   : > { %4914 = vst [vmem:[%s8824_s18 + $0x1] sm:$0x1] %v4880_v47 }
 0x28f PF: > { %s14_s12 = sadd.s32 1, %s6085_s12  }
 0x290   : > { %p11_p4 = scmp.ge.s32.totalorder %s14_s12, 4  }
 0x292   :  { %13 = sbr.rel (!%p11_p4) target bundleno = 1 (0x1), region = 80 }

</bundles_post_ra>
